<compile_context>
chip_gen: v5e
topology: v5e:2x2
jax: 0.10.0
libtpu: 0.0.40
codegen_flags: <defaults>
</compile_context>

<pallas_src>
import functools

import jax
import jax.numpy as jnp
from jax import lax
from jax.experimental import pallas as pl
from jax.experimental.pallas import tpu as pltpu


# ----------------------------------------------------------------------------
# Pallas kernel: one (batch, row-band) step.
# ----------------------------------------------------------------------------
def _bottleneck_kernel(d, TH, H, W,
                       x_ref, w1_ref, b1_ref, w2_ref, b2_ref, w3_ref, b3_ref,
                       slope_ref, o_ref, pad_ref):
    """
    x_ref    : (1, Cin, Hp, Wpad) bf16  whole zero-padded image (VMEM resident)
    w*_ref   : folded conv+BN weights (bf16); b*_ref: (C, 1) f32 biases
    slope_ref: (3,) f32 PReLU slopes in SMEM
    o_ref    : (1, Cout, TH, W)  f32   de-halo'd output row band
    pad_ref  : (Cip, L + 2*SH)   bf16  im2col scratch (taps = static lane shifts)
    """
    Cin = x_ref.shape[1]
    Wpad = x_ref.shape[3]
    THp = TH + 2 * d
    L = THp * Wpad
    SH = d * (Wpad + 1)                  # largest |flat shift| of a 3x3 tap

    h = pl.program_id(1)
    row0 = h * TH
    row0_ds = pl.multiple_of(row0, 8) if TH % 8 == 0 else row0

    # halo'd row band, sliced from the resident padded image, flattened on lanes
    xb = x_ref[0, :, pl.ds(row0_ds, THp), :]          # (Cin, THp, Wpad) bf16
    x2 = xb.reshape(Cin, L)                           # (Cin, L) bf16

    # ---- conv1: 1x1 conv (+ folded BN) + PReLU -----------------------------
    h1 = jnp.dot(w1_ref[...], x2, preferred_element_type=jnp.float32)
    h1 = h1 + b1_ref[...]
    h1 = jnp.where(h1 >= 0, h1, slope_ref[0] * h1)

    # In-kernel validity mask: conv2 zero-pads *its input*, so kill everything
    # outside the real image (border ring + lane-padding columns).
    rb = lax.broadcasted_iota(jnp.int32, (THp, Wpad), 0) + row0
    cc = lax.broadcasted_iota(jnp.int32, (THp, Wpad), 1)
    valid = (rb >= d) & (rb < d + H) & (cc >= d) & (cc < d + W)
    mask = valid.astype(jnp.float32).reshape(1, L)
    h1 = h1 * mask                                    # (Cip, L) f32

    # ---- conv2: 3x3 dilated conv (+ folded BN) as one wide-K im2col matmul --
    # bf16 scratch; +/-SH margins are never read for any stored output element
    # (all kept taps stay inside [SH, SH+L)), so they are left uninitialized.
    pad_ref[:, SH:SH + L] = h1.astype(jnp.bfloat16)
    taps = []
    for ky in range(3):
        for kx in range(3):
            s = (ky - 1) * d * Wpad + (kx - 1) * d
            taps.append(pad_ref[:, SH + s:SH + s + L])
    taps = jnp.concatenate(taps, axis=0)              # (9*Cip, L) bf16
    h2 = jnp.dot(w2_ref[...], taps, preferred_element_type=jnp.float32)
    h2 = h2 + b2_ref[...]
    h2 = jnp.where(h2 >= 0, h2, slope_ref[1] * h2)    # (Cip, L) f32

    # ---- conv3: 1x1 conv (+ folded BN); Dropout2d == identity at inference --
    h3 = jnp.dot(w3_ref[...], h2.astype(jnp.bfloat16),
                 preferred_element_type=jnp.float32)
    h3 = h3 + b3_ref[...]                             # (Cout, L) f32

    # ---- residual + final PReLU (regular bottleneck: Cin == Cout) ----------
    y = h3 + x2.astype(jnp.float32)
    y = jnp.where(y >= 0, y, slope_ref[2] * y)

    # ---- de-halo: rows [d, d+TH), cols [d, d+W) -> straight to output ------
    Cout = o_ref.shape[1]
    y = y.reshape(Cout, THp, Wpad)
    o_ref[0] = y[:, d:d + TH, d:d + W].astype(o_ref.dtype)


# ----------------------------------------------------------------------------
# VMEM sizing (generation aware) and tile selection
# ----------------------------------------------------------------------------
def _round_up(v, m):
    return (v + m - 1) // m * m


def _vmem_capacity_bytes():
    try:
        return int(pltpu.get_tpu_info().vmem_capacity_bytes)
    except Exception:
        return 64 * 2**20            # conservative fallback (v7x per-core VMEM)


def _vmem_estimate(Cin, Cip, Cout, H, W, d, TH, Wpad):
    THp = TH + 2 * d
    Hp = H + 2 * d
    L = THp * Wpad
    SH = d * (Wpad + 1)
    img = 2 * Cin * Hp * Wpad * 2              # resident padded image (bf16, x2 buffers)
    outb = 2 * Cout * TH * W * 4               # output band (f32, x2 buffers)
    padsc = Cip * (L + 2 * SH) * 2             # bf16 im2col scratch
    taps = 9 * Cip * L * 2                     # bf16 tap concat
    inter = (2 * Cip + 2 * Cout + Cin) * L * 4  # live f32 intermediates
    wts = (Cip * Cin + 9 * Cip * Cip + Cout * Cip) * 2 + (2 * Cip + Cout) * 4
    return int(img + outb + padsc + taps + inter + wts)


def _pick_tile_h(H, W, Cin, Cip, Cout, d, Wpad, budget_bytes):
    """Largest valid row-band (multiple of 8 dividing H, or full H) in budget."""
    cands = [t for t in range(8, H, 8) if H % t == 0] + [H]
    fits = [t for t in cands
            if _vmem_estimate(Cin, Cip, Cout, H, W, d, t, Wpad) <= budget_bytes]
    return max(fits) if fits else min(cands)


# ----------------------------------------------------------------------------
# Wrapper
# ----------------------------------------------------------------------------
def bottleneck_pallas(x_nchw, params, dilation=1, tile_h=None):
    """x_nchw: (N, Cin, H, W) float32 -> (N, Cout, H, W) float32."""
    w1, b1, w2f, b2, w3, b3, slopes = params
    N, Cin, H, W = x_nchw.shape
    Ci = w1.shape[0]
    Cout = w3.shape[0]
    if Cout != Cin:
        raise ValueError("regular Bottleneck requires in_channels == out_channels")
    d = int(dilation)

    Hp = H + 2 * d
    Wpad = _round_up(W + 2 * d, 128)     # lane-dense padded row width
    Cip = _round_up(Ci, 16)              # bf16 sublane packing across concat

    # zero-pad inter channels so every bf16 tap block is 16-row aligned
    if Cip != Ci:
        pc = Cip - Ci
        w1 = jnp.pad(w1, ((0, pc), (0, 0)))
        b1 = jnp.pad(b1, ((0, pc), (0, 0)))
        w2f = jnp.pad(w2f.reshape(Ci, 9, Ci),
                      ((0, pc), (0, 0), (0, pc))).reshape(Cip, 9 * Cip)
        b2 = jnp.pad(b2, ((0, pc), (0, 0)))
        w3 = jnp.pad(w3, ((0, 0), (0, pc)))

    cap = _vmem_capacity_bytes()
    budget = min(96 * 2**20, int(0.7 * cap))
    if tile_h is None:
        tile_h = _pick_tile_h(H, W, Cin, Cip, Cout, d, Wpad, budget)
    TH = int(tile_h)
    if H % TH != 0:
        raise ValueError("tile_h must divide H")
    if TH != H and TH % 8 != 0:
        raise ValueError("tile_h must be a multiple of 8 (or the full height)")
    nb = H // TH
    THp = TH + 2 * d
    L = THp * Wpad
    SH = d * (Wpad + 1)

    est = _vmem_estimate(Cin, Cip, Cout, H, W, d, TH, Wpad)
    vmem_limit = int(min(int(0.9 * cap), max(32 * 2**20, 2 * est)))

    # Single fused pad + bf16 cast pass: (N,Cin,H,W) -> (N,Cin,Hp,Wpad).
    xpad = jnp.pad(x_nchw.astype(jnp.bfloat16),
                   ((0, 0), (0, 0), (d, d), (d, Wpad - W - d)))

    kernel = functools.partial(_bottleneck_kernel, d, TH, H, W)

    def _const_spec(shape, single_buffer):
        ndim = len(shape)
        imap = lambda n, h: (0,) * ndim
        if single_buffer:
            return pl.BlockSpec(shape, imap, pipeline_mode=pl.Buffered(1))
        return pl.BlockSpec(shape, imap)

    def _run(single_buffer_weights):
        in_specs = [
            # whole padded image: block index constant along the band axis, so
            # it stays resident in VMEM and is fetched once per batch element.
            pl.BlockSpec((1, Cin, Hp, Wpad), lambda n, h: (n, 0, 0, 0)),
            _const_spec(w1.shape, single_buffer_weights),
            _const_spec(b1.shape, single_buffer_weights),
            _const_spec(w2f.shape, single_buffer_weights),
            _const_spec(b2.shape, single_buffer_weights),
            _const_spec(w3.shape, single_buffer_weights),
            _const_spec(b3.shape, single_buffer_weights),
            pl.BlockSpec(memory_space=pltpu.MemorySpace.SMEM),  # PReLU slopes
        ]
        return pl.pallas_call(
            kernel,
            out_shape=jax.ShapeDtypeStruct((N, Cout, H, W), jnp.float32),
            grid_spec=pltpu.PrefetchScalarGridSpec(
                num_scalar_prefetch=0,
                grid=(N, nb),
                in_specs=in_specs,
                out_specs=pl.BlockSpec((1, Cout, TH, W),
                                       lambda n, h: (n, 0, h, 0)),
                scratch_shapes=[pltpu.VMEM((Cip, L + 2 * SH), jnp.bfloat16)],
            ),
            compiler_params=pltpu.CompilerParams(
                dimension_semantics=("parallel", "parallel"),
                vmem_limit_bytes=vmem_limit),
        )(xpad, w1, b1, w2f, b2, w3, b3, slopes)

    try:
        # single-buffer the never-changing weight/bias blocks (saves VMEM)
        return _run(True)
    except Exception:
        # fallback if this jax build rejects pl.Buffered(1)
        return _run(False)


# ----------------------------------------------------------------------------
# Deterministic parameters: conv weights with folded BatchNorm + PReLU slopes
# ----------------------------------------------------------------------------
def make_params(key, in_channels, inter_channels, out_channels):
    ks = jax.random.split(key, 15)
    eps = 1e-5
    Ci = inter_channels

    def bn_fold(kg, kb, km, kv, c):
        gamma = 1.0 + 0.1 * jax.random.normal(kg, (c,), jnp.float32)
        beta = 0.1 * jax.random.normal(kb, (c,), jnp.float32)
        mean = 0.1 * jax.random.normal(km, (c,), jnp.float32)
        var = jnp.abs(jax.random.normal(kv, (c,), jnp.float32)) + 0.5
        scale = gamma / jnp.sqrt(var + eps)
        bias = beta - mean * scale
        return scale, bias

    # conv1: torch (Ci, Cin, 1, 1) -> (Ci, Cin), BN scale on output channels
    w1_t = 0.1 * jax.random.normal(ks[0], (Ci, in_channels), jnp.float32)
    s1, b1 = bn_fold(ks[1], ks[2], ks[3], ks[4], Ci)
    w1 = (w1_t * s1[:, None]).astype(jnp.bfloat16)

    # conv2: torch (Ci, Ci, 3, 3) -> im2col layout (Ci, 9*Ci),
    # column order (ky, kx, cin) to match the kernel's tap concatenation.
    w2_t = 0.1 * jax.random.normal(ks[5], (Ci, Ci, 3, 3), jnp.float32)
    s2, b2 = bn_fold(ks[6], ks[7], ks[8], ks[9], Ci)
    w2f = jnp.transpose(w2_t * s2[:, None, None, None], (0, 2, 3, 1))
    w2f = w2f.reshape(Ci, 9 * Ci).astype(jnp.bfloat16)

    # conv3: torch (Cout, Ci, 1, 1) -> (Cout, Ci)
    w3_t = 0.1 * jax.random.normal(ks[10], (out_channels, Ci), jnp.float32)
    s3, b3 = bn_fold(ks[11], ks[12], ks[13], ks[14], out_channels)
    w3 = (w3_t * s3[:, None]).astype(jnp.bfloat16)

    slopes = jnp.full((3,), 0.25, jnp.float32)          # nn.PReLU() default

    return (w1, b1.reshape(-1, 1).astype(jnp.float32),
            w2f, b2.reshape(-1, 1).astype(jnp.float32),
            w3, b3.reshape(-1, 1).astype(jnp.float32),
            slopes)


# ----------------------------------------------------------------------------
# Pure-JAX NCHW reference (same bf16 quantization points as the kernel)
# ----------------------------------------------------------------------------
def bottleneck_ref(x_nchw, params, dilation=1):
    w1, b1, w2f, b2, w3, b3, slopes = params
    d = int(dilation)
    Ci = w1.shape[0]
    f32 = jnp.float32
    q = lambda t: t.astype(jnp.bfloat16).astype(f32)
    prelu = lambda v, a: jnp.where(v >= 0, v, a * v)
    hi = lax.Precision.HIGHEST

    x = q(x_nchw)
    w1f, w3f = w1.astype(f32), w3.astype(f32)
    w2 = w2f.astype(f32).reshape(Ci, 3, 3, Ci).transpose(0, 3, 1, 2)   # OIHW

    h1 = jnp.einsum('nchw,dc->ndhw', x, w1f, precision=hi) + b1.reshape(1, -1, 1, 1)
    h1 = q(prelu(h1, slopes[0]))
    h2 = lax.conv_general_dilated(
        h1, w2, window_strides=(1, 1),
        padding=[(d, d), (d, d)], rhs_dilation=(d, d),
        dimension_numbers=('NCHW', 'OIHW', 'NCHW'), precision=hi)
    h2 = q(prelu(h2 + b2.reshape(1, -1, 1, 1), slopes[1]))
    h3 = jnp.einsum('nchw,dc->ndhw', h2, w3f, precision=hi) + b3.reshape(1, -1, 1, 1)
    return prelu(h3 + x, slopes[2])


if __name__ == "__main__":
    key = jax.random.PRNGKey(0)
    k_x, k_p = jax.random.split(key)

    N, Cin, H, W = 2, 8, 16, 16
    inter = 8
    Cout = Cin              # regular bottleneck: residual needs Cin == Cout

    x = jax.random.normal(k_x, (N, Cin, H, W), jnp.float32)
    params = make_params(k_p, Cin, inter, Cout)

    configs = [
        (1, 8),      # dilation 1, two row-bands: exercises halos + edge masking
        (1, None),   # dilation 1, auto tile (whole image resident per step)
        (2, 8),      # dilated bottleneck
    ]
    for dil, th in configs:
        out = bottleneck_pallas(x, params, dilation=dil, tile_h=th)
        out = jax.block_until_ready(out)
        ref = bottleneck_ref(x, params, dilation=dil)
        assert out.shape == (N, Cout, H, W)
        max_err = float(jnp.max(jnp.abs(out - ref)))
        assert jnp.allclose(out, ref, atol=2e-2, rtol=2e-2), \
            f"dilation={dil} tile_h={th}: mismatch vs reference (max abs err {max_err})"

    print("KERNEL_OK")
</pallas_src>

<mosaic_0001>
module attributes {stable_mosaic.version = 11 : i64} {
  func.func @_bottleneck_kernel(%arg0: i32, %arg1: i32, %arg2: memref<1x8x18x128xbf16, #tpu.memory_space<vmem>>, %arg3: memref<16x8xbf16, #tpu.memory_space<vmem>>, %arg4: memref<16x1xf32, #tpu.memory_space<vmem>>, %arg5: memref<16x144xbf16, #tpu.memory_space<vmem>>, %arg6: memref<16x1xf32, #tpu.memory_space<vmem>>, %arg7: memref<8x16xbf16, #tpu.memory_space<vmem>>, %arg8: memref<8x1xf32, #tpu.memory_space<vmem>>, %arg9: memref<3xf32, #tpu.memory_space<smem>>, %arg10: memref<1x8x8x16xf32, #tpu.memory_space<vmem>>, %arg11: memref<16x1538xbf16, #tpu.memory_space<vmem>>) attributes {dimension_semantics = [#tpu.dimension_semantics<parallel>, #tpu.dimension_semantics<parallel>], iteration_bounds = array<i64: 2, 2>, scalar_prefetch = 0 : i64, scratch_operands = 1 : i64, tpu.core_type = #tpu.core_type<tc>, window_params = [{transform_indices = @transform_0, window_bounds = array<i64: 1, 8, 18, 128>}, {pipeline_mode = #tpu.pipeline_mode<synchronous>, transform_indices = @transform_1, window_bounds = array<i64: 16, 8>}, {pipeline_mode = #tpu.pipeline_mode<synchronous>, transform_indices = @transform_2, window_bounds = array<i64: 16, 1>}, {pipeline_mode = #tpu.pipeline_mode<synchronous>, transform_indices = @transform_3, window_bounds = array<i64: 16, 144>}, {pipeline_mode = #tpu.pipeline_mode<synchronous>, transform_indices = @transform_4, window_bounds = array<i64: 16, 1>}, {pipeline_mode = #tpu.pipeline_mode<synchronous>, transform_indices = @transform_5, window_bounds = array<i64: 8, 16>}, {pipeline_mode = #tpu.pipeline_mode<synchronous>, transform_indices = @transform_6, window_bounds = array<i64: 8, 1>}, {transform_indices = @transform_7, window_bounds = array<i64: 3>}, {transform_indices = @transform_8, window_bounds = array<i64: 1, 8, 8, 16>}]} {
    %c8_i32 = arith.constant 8 : i32
    %0 = arith.muli %arg1, %c8_i32 : i32
    %1 = tpu.assume_multiple %0, 8 : i32
    %c0 = arith.constant 0 : index
    %c0_0 = arith.constant 0 : index
    %2 = arith.index_cast %1 : i32 to index
    %c0_1 = arith.constant 0 : index
    %3 = vector.load %arg2[%c0, %c0_0, %2, %c0_1] : memref<1x8x18x128xbf16, #tpu.memory_space<vmem>>, vector<1x8x10x128xbf16>
    %4 = vector.shape_cast %3 : vector<1x8x10x128xbf16> to vector<8x10x128xbf16>
    %5 = vector.shape_cast %4 : vector<8x10x128xbf16> to vector<8x1280xbf16>
    %c0_2 = arith.constant 0 : index
    %c0_3 = arith.constant 0 : index
    %6 = vector.load %arg3[%c0_2, %c0_3] : memref<16x8xbf16, #tpu.memory_space<vmem>>, vector<16x8xbf16>
    %cst = arith.constant dense<0.000000e+00> : vector<16x1280xf32>
    %7 = tpu.matmul %6, %5, %cst {dimension_numbers = #tpu.dot_dimension_numbers<[1], [0], [0], [1], [0, 0, 1, 1], [], []>} : vector<16x8xbf16>, vector<8x1280xbf16>, vector<16x1280xf32> -> vector<16x1280xf32>
    %c0_4 = arith.constant 0 : index
    %c0_5 = arith.constant 0 : index
    %8 = vector.load %arg4[%c0_4, %c0_5] : memref<16x1xf32, #tpu.memory_space<vmem>>, vector<16x1xf32>
    %9 = vector.broadcast %8 : vector<16x1xf32> to vector<16x1280xf32>
    %10 = arith.addf %7, %9 : vector<16x1280xf32>
    %cst_6 = arith.constant 0.000000e+00 : f32
    %11 = vector.broadcast %cst_6 : f32 to vector<16x1280xf32>
    %12 = arith.cmpf oge, %10, %11 : vector<16x1280xf32>
    %c0_7 = arith.constant 0 : index
    %13 = memref.load %arg9[%c0_7] : memref<3xf32, #tpu.memory_space<smem>>
    %14 = vector.broadcast %13 : f32 to vector<16x1280xf32>
    %15 = arith.mulf %14, %10 : vector<16x1280xf32>
    %16 = arith.select %12, %10, %15 : vector<16x1280xi1>, vector<16x1280xf32>
    %17 = tpu.iota {dimensions = array<i32: 0>} : vector<10x128xi32>
    %18 = vector.broadcast %0 : i32 to vector<10x128xi32>
    %19 = arith.addi %17, %18 : vector<10x128xi32>
    %20 = tpu.iota {dimensions = array<i32: 1>} : vector<10x128xi32>
    %c1_i32 = arith.constant 1 : i32
    %21 = vector.broadcast %c1_i32 : i32 to vector<10x128xi32>
    %22 = arith.cmpi sge, %19, %21 : vector<10x128xi32>
    %c17_i32 = arith.constant 17 : i32
    %23 = vector.broadcast %c17_i32 : i32 to vector<10x128xi32>
    %24 = arith.cmpi slt, %19, %23 : vector<10x128xi32>
    %25 = arith.andi %22, %24 : vector<10x128xi1>
    %c1_i32_8 = arith.constant 1 : i32
    %26 = vector.broadcast %c1_i32_8 : i32 to vector<10x128xi32>
    %27 = arith.cmpi sge, %20, %26 : vector<10x128xi32>
    %28 = arith.andi %25, %27 : vector<10x128xi1>
    %c17_i32_9 = arith.constant 17 : i32
    %29 = vector.broadcast %c17_i32_9 : i32 to vector<10x128xi32>
    %30 = arith.cmpi slt, %20, %29 : vector<10x128xi32>
    %31 = arith.andi %28, %30 : vector<10x128xi1>
    %32 = arith.extui %31 : vector<10x128xi1> to vector<10x128xi32>
    %33 = arith.sitofp %32 : vector<10x128xi32> to vector<10x128xf32>
    %34 = vector.shape_cast %33 : vector<10x128xf32> to vector<1x1280xf32>
    %35 = vector.broadcast %34 : vector<1x1280xf32> to vector<16x1280xf32>
    %36 = arith.mulf %16, %35 : vector<16x1280xf32>
    %37 = arith.truncf %36 : vector<16x1280xf32> to vector<16x1280xbf16>
    %c0_10 = arith.constant 0 : index
    %c129 = arith.constant 129 : index
    %38 = vector.load %arg11[%c0_10, %c129] : memref<16x1538xbf16, #tpu.memory_space<vmem>>, vector<16x1280xbf16>
    tpu.vector_store %arg11[%c0_10, %c129], %37 {strides = array<i32>} : memref<16x1538xbf16, #tpu.memory_space<vmem>>, vector<16x1280xbf16>,
    %c0_11 = arith.constant 0 : index
    %c0_12 = arith.constant 0 : index
    %39 = vector.load %arg11[%c0_11, %c0_12] : memref<16x1538xbf16, #tpu.memory_space<vmem>>, vector<16x1280xbf16>
    %c0_13 = arith.constant 0 : index
    %c1 = arith.constant 1 : index
    %40 = vector.load %arg11[%c0_13, %c1] : memref<16x1538xbf16, #tpu.memory_space<vmem>>, vector<16x1280xbf16>
    %c0_14 = arith.constant 0 : index
    %c2 = arith.constant 2 : index
    %41 = vector.load %arg11[%c0_14, %c2] : memref<16x1538xbf16, #tpu.memory_space<vmem>>, vector<16x1280xbf16>
    %c0_15 = arith.constant 0 : index
    %c128 = arith.constant 128 : index
    %42 = vector.load %arg11[%c0_15, %c128] : memref<16x1538xbf16, #tpu.memory_space<vmem>>, vector<16x1280xbf16>
    %c0_16 = arith.constant 0 : index
    %c129_17 = arith.constant 129 : index
    %43 = vector.load %arg11[%c0_16, %c129_17] : memref<16x1538xbf16, #tpu.memory_space<vmem>>, vector<16x1280xbf16>
    %c0_18 = arith.constant 0 : index
    %c130 = arith.constant 130 : index
    %44 = vector.load %arg11[%c0_18, %c130] : memref<16x1538xbf16, #tpu.memory_space<vmem>>, vector<16x1280xbf16>
    %c0_19 = arith.constant 0 : index
    %c256 = arith.constant 256 : index
    %45 = vector.load %arg11[%c0_19, %c256] : memref<16x1538xbf16, #tpu.memory_space<vmem>>, vector<16x1280xbf16>
    %c0_20 = arith.constant 0 : index
    %c257 = arith.constant 257 : index
    %46 = vector.load %arg11[%c0_20, %c257] : memref<16x1538xbf16, #tpu.memory_space<vmem>>, vector<16x1280xbf16>
    %c0_21 = arith.constant 0 : index
    %c258 = arith.constant 258 : index
    %47 = vector.load %arg11[%c0_21, %c258] : memref<16x1538xbf16, #tpu.memory_space<vmem>>, vector<16x1280xbf16>
    %48 = tpu.concatenate %39, %40, %41, %42, %43, %44, %45, %46, %47 in 0 : vector<16x1280xbf16>, vector<16x1280xbf16>, vector<16x1280xbf16>, vector<16x1280xbf16>, vector<16x1280xbf16>, vector<16x1280xbf16>, vector<16x1280xbf16>, vector<16x1280xbf16>, vector<16x1280xbf16> -> vector<144x1280xbf16>
    %c0_22 = arith.constant 0 : index
    %c0_23 = arith.constant 0 : index
    %49 = vector.load %arg5[%c0_22, %c0_23] : memref<16x144xbf16, #tpu.memory_space<vmem>>, vector<16x144xbf16>
    %cst_24 = arith.constant dense<0.000000e+00> : vector<16x1280xf32>
    %50 = tpu.matmul %49, %48, %cst_24 {dimension_numbers = #tpu.dot_dimension_numbers<[1], [0], [0], [1], [0, 0, 1, 1], [], []>} : vector<16x144xbf16>, vector<144x1280xbf16>, vector<16x1280xf32> -> vector<16x1280xf32>
    %c0_25 = arith.constant 0 : index
    %c0_26 = arith.constant 0 : index
    %51 = vector.load %arg6[%c0_25, %c0_26] : memref<16x1xf32, #tpu.memory_space<vmem>>, vector<16x1xf32>
    %52 = vector.broadcast %51 : vector<16x1xf32> to vector<16x1280xf32>
    %53 = arith.addf %50, %52 : vector<16x1280xf32>
    %cst_27 = arith.constant 0.000000e+00 : f32
    %54 = vector.broadcast %cst_27 : f32 to vector<16x1280xf32>
    %55 = arith.cmpf oge, %53, %54 : vector<16x1280xf32>
    %c1_28 = arith.constant 1 : index
    %56 = memref.load %arg9[%c1_28] : memref<3xf32, #tpu.memory_space<smem>>
    %57 = vector.broadcast %56 : f32 to vector<16x1280xf32>
    %58 = arith.mulf %57, %53 : vector<16x1280xf32>
    %59 = arith.select %55, %53, %58 : vector<16x1280xi1>, vector<16x1280xf32>
    %c0_29 = arith.constant 0 : index
    %c0_30 = arith.constant 0 : index
    %60 = vector.load %arg7[%c0_29, %c0_30] : memref<8x16xbf16, #tpu.memory_space<vmem>>, vector<8x16xbf16>
    %61 = arith.truncf %59 : vector<16x1280xf32> to vector<16x1280xbf16>
    %cst_31 = arith.constant dense<0.000000e+00> : vector<8x1280xf32>
    %62 = tpu.matmul %60, %61, %cst_31 {dimension_numbers = #tpu.dot_dimension_numbers<[1], [0], [0], [1], [0, 0, 1, 1], [], []>} : vector<8x16xbf16>, vector<16x1280xbf16>, vector<8x1280xf32> -> vector<8x1280xf32>
    %c0_32 = arith.constant 0 : index
    %c0_33 = arith.constant 0 : index
    %63 = vector.load %arg8[%c0_32, %c0_33] : memref<8x1xf32, #tpu.memory_space<vmem>>, vector<8x1xf32>
    %64 = vector.broadcast %63 : vector<8x1xf32> to vector<8x1280xf32>
    %65 = arith.addf %62, %64 : vector<8x1280xf32>
    %66 = arith.extf %5 : vector<8x1280xbf16> to vector<8x1280xf32>
    %67 = arith.addf %65, %66 : vector<8x1280xf32>
    %cst_34 = arith.constant 0.000000e+00 : f32
    %68 = vector.broadcast %cst_34 : f32 to vector<8x1280xf32>
    %69 = arith.cmpf oge, %67, %68 : vector<8x1280xf32>
    %c2_35 = arith.constant 2 : index
    %70 = memref.load %arg9[%c2_35] : memref<3xf32, #tpu.memory_space<smem>>
    %71 = vector.broadcast %70 : f32 to vector<8x1280xf32>
    %72 = arith.mulf %71, %67 : vector<8x1280xf32>
    %73 = arith.select %69, %67, %72 : vector<8x1280xi1>, vector<8x1280xf32>
    %74 = vector.shape_cast %73 : vector<8x1280xf32> to vector<8x10x128xf32>
    %75 = vector.extract_strided_slice %74 {offsets = [0, 1, 1], sizes = [8, 8, 16], strides = [1, 1, 1]} : vector<8x10x128xf32> to vector<8x8x16xf32>
    %c0_36 = arith.constant 0 : index
    %c0_37 = arith.constant 0 : index
    %c0_38 = arith.constant 0 : index
    %c0_39 = arith.constant 0 : index
    %76 = vector.load %arg10[%c0_36, %c0_37, %c0_38, %c0_39] : memref<1x8x8x16xf32, #tpu.memory_space<vmem>>, vector<1x8x8x16xf32>
    %77 = vector.shape_cast %76 : vector<1x8x8x16xf32> to vector<8x8x16xf32>
    %78 = vector.shape_cast %75 : vector<8x8x16xf32> to vector<1x8x8x16xf32>
    tpu.vector_store %arg10[%c0_36, %c0_37, %c0_38, %c0_39], %78 {strides = array<i32>} : memref<1x8x8x16xf32, #tpu.memory_space<vmem>>, vector<1x8x8x16xf32>,
    return
  }
  func.func @transform_0(%arg0: i32, %arg1: i32) -> (i32, i32, i32, i32) {
    %c0_i32 = arith.constant 0 : i32
    %c0_i32_0 = arith.constant 0 : i32
    %c0_i32_1 = arith.constant 0 : i32
    %c0_i32_2 = arith.constant 0 : i32
    return %arg0, %c0_i32, %c0_i32_0, %c0_i32_1 : i32, i32, i32, i32
  }
  func.func @transform_1(%arg0: i32, %arg1: i32) -> (i32, i32) {
    %c0_i32 = arith.constant 0 : i32
    %c0_i32_0 = arith.constant 0 : i32
    %c0_i32_1 = arith.constant 0 : i32
    return %c0_i32, %c0_i32_0 : i32, i32
  }
  func.func @transform_2(%arg0: i32, %arg1: i32) -> (i32, i32) {
    %c0_i32 = arith.constant 0 : i32
    %c0_i32_0 = arith.constant 0 : i32
    %c0_i32_1 = arith.constant 0 : i32
    return %c0_i32, %c0_i32_0 : i32, i32
  }
  func.func @transform_3(%arg0: i32, %arg1: i32) -> (i32, i32) {
    %c0_i32 = arith.constant 0 : i32
    %c0_i32_0 = arith.constant 0 : i32
    %c0_i32_1 = arith.constant 0 : i32
    return %c0_i32, %c0_i32_0 : i32, i32
  }
  func.func @transform_4(%arg0: i32, %arg1: i32) -> (i32, i32) {
    %c0_i32 = arith.constant 0 : i32
    %c0_i32_0 = arith.constant 0 : i32
    %c0_i32_1 = arith.constant 0 : i32
    return %c0_i32, %c0_i32_0 : i32, i32
  }
  func.func @transform_5(%arg0: i32, %arg1: i32) -> (i32, i32) {
    %c0_i32 = arith.constant 0 : i32
    %c0_i32_0 = arith.constant 0 : i32
    %c0_i32_1 = arith.constant 0 : i32
    return %c0_i32, %c0_i32_0 : i32, i32
  }
  func.func @transform_6(%arg0: i32, %arg1: i32) -> (i32, i32) {
    %c0_i32 = arith.constant 0 : i32
    %c0_i32_0 = arith.constant 0 : i32
    %c0_i32_1 = arith.constant 0 : i32
    return %c0_i32, %c0_i32_0 : i32, i32
  }
  func.func @transform_7(%arg0: i32, %arg1: i32) -> i32 {
    %c0_i32 = arith.constant 0 : i32
    %c0_i32_0 = arith.constant 0 : i32
    return %c0_i32 : i32
  }
  func.func @transform_8(%arg0: i32, %arg1: i32) -> (i32, i32, i32, i32) {
    %c0_i32 = arith.constant 0 : i32
    %c0_i32_0 = arith.constant 0 : i32
    %c0_i32_1 = arith.constant 0 : i32
    return %arg0, %c0_i32, %arg1, %c0_i32_0 : i32, i32, i32, i32
  }
}

module attributes {stable_mosaic.version = 11 : i64} {
  func.func @_bottleneck_kernel(%arg0: i32, %arg1: i32, %arg2: memref<1x8x18x128xbf16, #tpu.memory_space<vmem>>, %arg3: memref<16x8xbf16, #tpu.memory_space<vmem>>, %arg4: memref<16x1xf32, #tpu.memory_space<vmem>>, %arg5: memref<16x144xbf16, #tpu.memory_space<vmem>>, %arg6: memref<16x1xf32, #tpu.memory_space<vmem>>, %arg7: memref<8x16xbf16, #tpu.memory_space<vmem>>, %arg8: memref<8x1xf32, #tpu.memory_space<vmem>>, %arg9: memref<3xf32, #tpu.memory_space<smem>>, %arg10: memref<1x8x8x16xf32, #tpu.memory_space<vmem>>, %arg11: memref<16x1538xbf16, #tpu.memory_space<vmem>>) attributes {dimension_semantics = [#tpu.dimension_semantics<parallel>, #tpu.dimension_semantics<parallel>], iteration_bounds = array<i64: 2, 2>, scalar_prefetch = 0 : i64, scratch_operands = 1 : i64, tpu.core_type = #tpu.core_type<tc>, window_params = [{transform_indices = @transform_0, window_bounds = array<i64: 1, 8, 18, 128>}, {pipeline_mode = #tpu.pipeline_mode<synchronous>, transform_indices = @transform_1, window_bounds = array<i64: 16, 8>}, {pipeline_mode = #tpu.pipeline_mode<synchronous>, transform_indices = @transform_2, window_bounds = array<i64: 16, 1>}, {pipeline_mode = #tpu.pipeline_mode<synchronous>, transform_indices = @transform_3, window_bounds = array<i64: 16, 144>}, {pipeline_mode = #tpu.pipeline_mode<synchronous>, transform_indices = @transform_4, window_bounds = array<i64: 16, 1>}, {pipeline_mode = #tpu.pipeline_mode<synchronous>, transform_indices = @transform_5, window_bounds = array<i64: 8, 16>}, {pipeline_mode = #tpu.pipeline_mode<synchronous>, transform_indices = @transform_6, window_bounds = array<i64: 8, 1>}, {transform_indices = @transform_7, window_bounds = array<i64: 3>}, {transform_indices = @transform_8, window_bounds = array<i64: 1, 8, 8, 16>}]} {
    %c8_i32 = arith.constant 8 : i32
    %0 = arith.muli %arg1, %c8_i32 : i32
    %1 = tpu.assume_multiple %0, 8 : i32
    %c0 = arith.constant 0 : index
    %c0_0 = arith.constant 0 : index
    %2 = arith.index_cast %1 : i32 to index
    %c0_1 = arith.constant 0 : index
    %3 = vector.load %arg2[%c0, %c0_0, %2, %c0_1] : memref<1x8x18x128xbf16, #tpu.memory_space<vmem>>, vector<1x8x10x128xbf16>
    %4 = vector.shape_cast %3 : vector<1x8x10x128xbf16> to vector<8x10x128xbf16>
    %5 = vector.shape_cast %4 : vector<8x10x128xbf16> to vector<8x1280xbf16>
    %c0_2 = arith.constant 0 : index
    %c0_3 = arith.constant 0 : index
    %6 = vector.load %arg3[%c0_2, %c0_3] : memref<16x8xbf16, #tpu.memory_space<vmem>>, vector<16x8xbf16>
    %cst = arith.constant dense<0.000000e+00> : vector<16x1280xf32>
    %7 = tpu.matmul %6, %5, %cst {dimension_numbers = #tpu.dot_dimension_numbers<[1], [0], [0], [1], [0, 0, 1, 1], [], []>} : vector<16x8xbf16>, vector<8x1280xbf16>, vector<16x1280xf32> -> vector<16x1280xf32>
    %c0_4 = arith.constant 0 : index
    %c0_5 = arith.constant 0 : index
    %8 = vector.load %arg4[%c0_4, %c0_5] : memref<16x1xf32, #tpu.memory_space<vmem>>, vector<16x1xf32>
    %9 = vector.broadcast %8 : vector<16x1xf32> to vector<16x1280xf32>
    %10 = arith.addf %7, %9 : vector<16x1280xf32>
    %cst_6 = arith.constant 0.000000e+00 : f32
    %11 = vector.broadcast %cst_6 : f32 to vector<16x1280xf32>
    %12 = arith.cmpf oge, %10, %11 : vector<16x1280xf32>
    %c0_7 = arith.constant 0 : index
    %13 = memref.load %arg9[%c0_7] : memref<3xf32, #tpu.memory_space<smem>>
    %14 = vector.broadcast %13 : f32 to vector<16x1280xf32>
    %15 = arith.mulf %14, %10 : vector<16x1280xf32>
    %16 = arith.select %12, %10, %15 : vector<16x1280xi1>, vector<16x1280xf32>
    %17 = tpu.iota {dimensions = array<i32: 0>} : vector<10x128xi32>
    %18 = vector.broadcast %0 : i32 to vector<10x128xi32>
    %19 = arith.addi %17, %18 : vector<10x128xi32>
    %20 = tpu.iota {dimensions = array<i32: 1>} : vector<10x128xi32>
    %c1_i32 = arith.constant 1 : i32
    %21 = vector.broadcast %c1_i32 : i32 to vector<10x128xi32>
    %22 = arith.cmpi sge, %19, %21 : vector<10x128xi32>
    %c17_i32 = arith.constant 17 : i32
    %23 = vector.broadcast %c17_i32 : i32 to vector<10x128xi32>
    %24 = arith.cmpi slt, %19, %23 : vector<10x128xi32>
    %25 = arith.andi %22, %24 : vector<10x128xi1>
    %c1_i32_8 = arith.constant 1 : i32
    %26 = vector.broadcast %c1_i32_8 : i32 to vector<10x128xi32>
    %27 = arith.cmpi sge, %20, %26 : vector<10x128xi32>
    %28 = arith.andi %25, %27 : vector<10x128xi1>
    %c17_i32_9 = arith.constant 17 : i32
    %29 = vector.broadcast %c17_i32_9 : i32 to vector<10x128xi32>
    %30 = arith.cmpi slt, %20, %29 : vector<10x128xi32>
    %31 = arith.andi %28, %30 : vector<10x128xi1>
    %32 = arith.extui %31 : vector<10x128xi1> to vector<10x128xi32>
    %33 = arith.sitofp %32 : vector<10x128xi32> to vector<10x128xf32>
    %34 = vector.shape_cast %33 : vector<10x128xf32> to vector<1x1280xf32>
    %35 = vector.broadcast %34 : vector<1x1280xf32> to vector<16x1280xf32>
    %36 = arith.mulf %16, %35 : vector<16x1280xf32>
    %37 = arith.truncf %36 : vector<16x1280xf32> to vector<16x1280xbf16>
    %c0_10 = arith.constant 0 : index
    %c129 = arith.constant 129 : index
    %38 = vector.load %arg11[%c0_10, %c129] : memref<16x1538xbf16, #tpu.memory_space<vmem>>, vector<16x1280xbf16>
    tpu.vector_store %arg11[%c0_10, %c129], %37 {strides = array<i32>} : memref<16x1538xbf16, #tpu.memory_space<vmem>>, vector<16x1280xbf16>,
    %c0_11 = arith.constant 0 : index
    %c0_12 = arith.constant 0 : index
    %39 = vector.load %arg11[%c0_11, %c0_12] : memref<16x1538xbf16, #tpu.memory_space<vmem>>, vector<16x1280xbf16>
    %c0_13 = arith.constant 0 : index
    %c1 = arith.constant 1 : index
    %40 = vector.load %arg11[%c0_13, %c1] : memref<16x1538xbf16, #tpu.memory_space<vmem>>, vector<16x1280xbf16>
    %c0_14 = arith.constant 0 : index
    %c2 = arith.constant 2 : index
    %41 = vector.load %arg11[%c0_14, %c2] : memref<16x1538xbf16, #tpu.memory_space<vmem>>, vector<16x1280xbf16>
    %c0_15 = arith.constant 0 : index
    %c128 = arith.constant 128 : index
    %42 = vector.load %arg11[%c0_15, %c128] : memref<16x1538xbf16, #tpu.memory_space<vmem>>, vector<16x1280xbf16>
    %c0_16 = arith.constant 0 : index
    %c129_17 = arith.constant 129 : index
    %43 = vector.load %arg11[%c0_16, %c129_17] : memref<16x1538xbf16, #tpu.memory_space<vmem>>, vector<16x1280xbf16>
    %c0_18 = arith.constant 0 : index
    %c130 = arith.constant 130 : index
    %44 = vector.load %arg11[%c0_18, %c130] : memref<16x1538xbf16, #tpu.memory_space<vmem>>, vector<16x1280xbf16>
    %c0_19 = arith.constant 0 : index
    %c256 = arith.constant 256 : index
    %45 = vector.load %arg11[%c0_19, %c256] : memref<16x1538xbf16, #tpu.memory_space<vmem>>, vector<16x1280xbf16>
    %c0_20 = arith.constant 0 : index
    %c257 = arith.constant 257 : index
    %46 = vector.load %arg11[%c0_20, %c257] : memref<16x1538xbf16, #tpu.memory_space<vmem>>, vector<16x1280xbf16>
    %c0_21 = arith.constant 0 : index
    %c258 = arith.constant 258 : index
    %47 = vector.load %arg11[%c0_21, %c258] : memref<16x1538xbf16, #tpu.memory_space<vmem>>, vector<16x1280xbf16>
    %48 = tpu.concatenate %39, %40, %41, %42, %43, %44, %45, %46, %47 in 0 : vector<16x1280xbf16>, vector<16x1280xbf16>, vector<16x1280xbf16>, vector<16x1280xbf16>, vector<16x1280xbf16>, vector<16x1280xbf16>, vector<16x1280xbf16>, vector<16x1280xbf16>, vector<16x1280xbf16> -> vector<144x1280xbf16>
    %c0_22 = arith.constant 0 : index
    %c0_23 = arith.constant 0 : index
    %49 = vector.load %arg5[%c0_22, %c0_23] : memref<16x144xbf16, #tpu.memory_space<vmem>>, vector<16x144xbf16>
    %cst_24 = arith.constant dense<0.000000e+00> : vector<16x1280xf32>
    %50 = tpu.matmul %49, %48, %cst_24 {dimension_numbers = #tpu.dot_dimension_numbers<[1], [0], [0], [1], [0, 0, 1, 1], [], []>} : vector<16x144xbf16>, vector<144x1280xbf16>, vector<16x1280xf32> -> vector<16x1280xf32>
    %c0_25 = arith.constant 0 : index
    %c0_26 = arith.constant 0 : index
    %51 = vector.load %arg6[%c0_25, %c0_26] : memref<16x1xf32, #tpu.memory_space<vmem>>, vector<16x1xf32>
    %52 = vector.broadcast %51 : vector<16x1xf32> to vector<16x1280xf32>
    %53 = arith.addf %50, %52 : vector<16x1280xf32>
    %cst_27 = arith.constant 0.000000e+00 : f32
    %54 = vector.broadcast %cst_27 : f32 to vector<16x1280xf32>
    %55 = arith.cmpf oge, %53, %54 : vector<16x1280xf32>
    %c1_28 = arith.constant 1 : index
    %56 = memref.load %arg9[%c1_28] : memref<3xf32, #tpu.memory_space<smem>>
    %57 = vector.broadcast %56 : f32 to vector<16x1280xf32>
    %58 = arith.mulf %57, %53 : vector<16x1280xf32>
    %59 = arith.select %55, %53, %58 : vector<16x1280xi1>, vector<16x1280xf32>
    %c0_29 = arith.constant 0 : index
    %c0_30 = arith.constant 0 : index
    %60 = vector.load %arg7[%c0_29, %c0_30] : memref<8x16xbf16, #tpu.memory_space<vmem>>, vector<8x16xbf16>
    %61 = arith.truncf %59 : vector<16x1280xf32> to vector<16x1280xbf16>
    %cst_31 = arith.constant dense<0.000000e+00> : vector<8x1280xf32>
    %62 = tpu.matmul %60, %61, %cst_31 {dimension_numbers = #tpu.dot_dimension_numbers<[1], [0], [0], [1], [0, 0, 1, 1], [], []>} : vector<8x16xbf16>, vector<16x1280xbf16>, vector<8x1280xf32> -> vector<8x1280xf32>
    %c0_32 = arith.constant 0 : index
    %c0_33 = arith.constant 0 : index
    %63 = vector.load %arg8[%c0_32, %c0_33] : memref<8x1xf32, #tpu.memory_space<vmem>>, vector<8x1xf32>
    %64 = vector.broadcast %63 : vector<8x1xf32> to vector<8x1280xf32>
    %65 = arith.addf %62, %64 : vector<8x1280xf32>
    %66 = arith.extf %5 : vector<8x1280xbf16> to vector<8x1280xf32>
    %67 = arith.addf %65, %66 : vector<8x1280xf32>
    %cst_34 = arith.constant 0.000000e+00 : f32
    %68 = vector.broadcast %cst_34 : f32 to vector<8x1280xf32>
    %69 = arith.cmpf oge, %67, %68 : vector<8x1280xf32>
    %c2_35 = arith.constant 2 : index
    %70 = memref.load %arg9[%c2_35] : memref<3xf32, #tpu.memory_space<smem>>
    %71 = vector.broadcast %70 : f32 to vector<8x1280xf32>
    %72 = arith.mulf %71, %67 : vector<8x1280xf32>
    %73 = arith.select %69, %67, %72 : vector<8x1280xi1>, vector<8x1280xf32>
    %74 = vector.shape_cast %73 : vector<8x1280xf32> to vector<8x10x128xf32>
    %75 = vector.extract_strided_slice %74 {offsets = [0, 1, 1], sizes = [8, 8, 16], strides = [1, 1, 1]} : vector<8x10x128xf32> to vector<8x8x16xf32>
    %c0_36 = arith.constant 0 : index
    %c0_37 = arith.constant 0 : index
    %c0_38 = arith.constant 0 : index
    %c0_39 = arith.constant 0 : index
    %76 = vector.load %arg10[%c0_36, %c0_37, %c0_38, %c0_39] : memref<1x8x8x16xf32, #tpu.memory_space<vmem>>, vector<1x8x8x16xf32>
    %77 = vector.shape_cast %76 : vector<1x8x8x16xf32> to vector<8x8x16xf32>
    %78 = vector.shape_cast %75 : vector<8x8x16xf32> to vector<1x8x8x16xf32>
    tpu.vector_store %arg10[%c0_36, %c0_37, %c0_38, %c0_39], %78 {strides = array<i32>} : memref<1x8x8x16xf32, #tpu.memory_space<vmem>>, vector<1x8x8x16xf32>,
    return
  }
  func.func @transform_0(%arg0: i32, %arg1: i32) -> (i32, i32, i32, i32) {
    %c0_i32 = arith.constant 0 : i32
    %c0_i32_0 = arith.constant 0 : i32
    %c0_i32_1 = arith.constant 0 : i32
    %c0_i32_2 = arith.constant 0 : i32
    return %arg0, %c0_i32, %c0_i32_0, %c0_i32_1 : i32, i32, i32, i32
  }
  func.func @transform_1(%arg0: i32, %arg1: i32) -> (i32, i32) {
    %c0_i32 = arith.constant 0 : i32
    %c0_i32_0 = arith.constant 0 : i32
    %c0_i32_1 = arith.constant 0 : i32
    return %c0_i32, %c0_i32_0 : i32, i32
  }
  func.func @transform_2(%arg0: i32, %arg1: i32) -> (i32, i32) {
    %c0_i32 = arith.constant 0 : i32
    %c0_i32_0 = arith.constant 0 : i32
    %c0_i32_1 = arith.constant 0 : i32
    return %c0_i32, %c0_i32_0 : i32, i32
  }
  func.func @transform_3(%arg0: i32, %arg1: i32) -> (i32, i32) {
    %c0_i32 = arith.constant 0 : i32
    %c0_i32_0 = arith.constant 0 : i32
    %c0_i32_1 = arith.constant 0 : i32
    return %c0_i32, %c0_i32_0 : i32, i32
  }
  func.func @transform_4(%arg0: i32, %arg1: i32) -> (i32, i32) {
    %c0_i32 = arith.constant 0 : i32
    %c0_i32_0 = arith.constant 0 : i32
    %c0_i32_1 = arith.constant 0 : i32
    return %c0_i32, %c0_i32_0 : i32, i32
  }
  func.func @transform_5(%arg0: i32, %arg1: i32) -> (i32, i32) {
    %c0_i32 = arith.constant 0 : i32
    %c0_i32_0 = arith.constant 0 : i32
    %c0_i32_1 = arith.constant 0 : i32
    return %c0_i32, %c0_i32_0 : i32, i32
  }
  func.func @transform_6(%arg0: i32, %arg1: i32) -> (i32, i32) {
    %c0_i32 = arith.constant 0 : i32
    %c0_i32_0 = arith.constant 0 : i32
    %c0_i32_1 = arith.constant 0 : i32
    return %c0_i32, %c0_i32_0 : i32, i32
  }
  func.func @transform_7(%arg0: i32, %arg1: i32) -> i32 {
    %c0_i32 = arith.constant 0 : i32
    %c0_i32_0 = arith.constant 0 : i32
    return %c0_i32 : i32
  }
  func.func @transform_8(%arg0: i32, %arg1: i32) -> (i32, i32, i32, i32) {
    %c0_i32 = arith.constant 0 : i32
    %c0_i32_0 = arith.constant 0 : i32
    %c0_i32_1 = arith.constant 0 : i32
    return %arg0, %c0_i32, %arg1, %c0_i32_0 : i32, i32, i32, i32
  }
}

</mosaic_0001>

<bundles_post_ra>
// kernel: tpu_custom_call.1
= control target key start
LH: loop header
LB: loop body
LE: loop exit
PB: predicated region body
PF: predicated region fallthrough
CT: control target
= control target key end

     0   :  { %s3531_s0 = inlined_call_operand.vmem [shape: bf16[2,8,18,128], index: 0, kind: input, shape index: {}]   ;;  %s3532_s1 = inlined_call_operand.vmem [shape: bf16[16,8], index: 1, kind: input, shape index: {}]   ;;  %s3533_s2 = inlined_call_operand.vmem [shape: f32[16,1], index: 2, kind: input, shape index: {}]   ;;  %s3534_s3 = inlined_call_operand.vmem [shape: bf16[16,144], index: 3, kind: input, shape index: {}]   ;;  %s3535_s4 = inlined_call_operand.vmem [shape: f32[16,1], index: 4, kind: input, shape index: {}]   ;;  %s3536_s5 = inlined_call_operand.vmem [shape: bf16[8,16], index: 5, kind: input, shape index: {}]   ;;  %s3537_s6 = inlined_call_operand.vmem [shape: f32[8,1], index: 6, kind: input, shape index: {}]   ;;  %s3538_s7 = inlined_call_operand.vmem [shape: f32[3], index: 7, kind: input, shape index: {}]   ;;  %s3539_s8 = inlined_call_operand.hbm [shape: f32[2,8,16,16], index: 8, kind: output, shape index: {}]  }
   0x1   :  { %3541 = sst [smem:[#allocation10_spill]] %s3538_s7 }
   0x2   :  { %13 = vsyncpa [#allocation5], 0 }
   0x3   :  { %14 = vsyncpa [#allocation4], 0 }
   0x4   :  { %16 = vsyncpa [#allocation4 + $0x1], 0  ;;  %s2634_s27 = smov 0   ;;  %s2636_s28 = smov 0  }
   0x5   :  { %s2638_s29 = smov 0   ;;  %s2640_s30 = smov 0  }
   0x6   :  { %s2642_s9 = smov 0   ;;  %s2644_s10 = smov 0  }
   0x7   :  { %s2646_s11 = smov 0   ;;  %s2648_s12 = smov 0  }
   0x8 LB: > { %s2177_s13 = sadd.s32 4294967295, %s2576_s12   ;;  %s2178_s14 = sadd.s32 4294967294, %s2576_s12   ;;  %s2576_s12 = sphi %s2648_s12, %s22_s12   ;;  %s2572_s11 = sphi %s2646_s11, %s3553_s11   ;;  %s2568_s10 = sphi %s2644_s10, %s3552_s10   ;;  %s2564_s9 = sphi %s2642_s9, %s3551_s9   ;;  %s2560_s30 = sphi %s2640_s30, %s3550_s30   ;;  %s2556_s29 = sphi %s2638_s29, %s3549_s29   ;;  %s2552_s28 = sphi %s2636_s28, %s3548_s28   ;;  %s2548_s27 = sphi %s2634_s27, %s3547_s27  }
   0x9   : > { %s31_s15 = sadd.s32 1, %s2568_s10  ;;  %s34_s16 = sadd.s32 1, %s2572_s11 }
   0xa   : > { %p32_p0 = scmp.ge.s32.totalorder %s31_s15, 2  ;;  %s216_s17 = sadd.s32 1, %s2556_s29 }
   0xb   : > { %p226_p1 = scmp.ne.s32.totalorder %s2556_s29, %s2552_s28  ;;  %p227_p2 = scmp.eq.s32.totalorder %s2177_s13, 3 }
   0xc   : > { %s3555_s15 = smov (%p32_p0, %s31_s15), 0  ;;  %s3557_s16 = smov (!%p32_p0, %s34_s16), %s2572_s11 }
   0xd   : > { %s212_s18 = ssub.s32 %s2568_s10, %s3555_s15  ;;  %p2686_p3 = por %p227_p2, %p226_p1 }
   0xe   : > { %p36_p4 = scmp.ge.s32.totalorder %s3557_s16, 2  ;;  %p232_p5 = scmp.ne.s32.totalorder %s2552_s28, %s2548_s27 }
   0xf   : > { %p233_p6 = scmp.eq.s32.totalorder %s2178_s14, 3  ;;  %p2179_p7 = scmp.ge.s32.totalorder %s2576_s12, 1 }
  0x10   : > { %s3559_s16 = smov (%p36_p4, %s3557_s16), 0  ;;  %p240_p9 = scmp.lt.s32.totalorder %s2576_s12, 5 }
  0x11   : > { %3543 = sst [smem:[#allocation9_spill]] %s3559_s16  ;;  %p2695_p8 = por %p233_p6, %p232_p5 }
  0x12   : > { %s211_s21 = ssub.s32 %s2572_s11, %s3559_s16  ;;  %p241_p10 = pnand %p2179_p7, %p240_p9 }
  0x13   : > { %s213_s22 = sor.u32 %s212_s18, %s211_s21  ;;  %p2382_p12 = scmp.eq.s32.totalorder %s2177_s13, 0 }
  0x14   : > { %p214_p11 = scmp.eq.s32.totalorder %s213_s22, 0  ;;  %p2374_p13 = pneg %p241_p10 }
  0x15   : > { %s3545_s7 = sld [smem:[#allocation10_spill]]  ;;  %s2578_s14 = smov [#allocation3]  }
  0x16   : > { %s2706_s26 = scalar_select %p214_p11, %s2556_s29, %s216_s17  }
  0x17   : > { %p2375_p0 = pnand %p2382_p12, %p2374_p13 }
  0x18   : > { %291 = sbr.rel (%p241_p10) target bundleno = 1019 (0x3fb), region = 52 }
  0x1b   : > { %s270_s25 = sshll.u32 %s3545_s7, 4  ;;  %s271_s25 = int_to_ptr.vmem [resolvable:$true] %s270_s25 }
  0x1c   : > { %2377 = dma.vmem_to_smem (!%p2375_p0), %s271_s25, 16, %s2578_s14, [#allocation5]  }
  0x1d   : > { %2539 = dma.done.wait (%p2382_p12), [#allocation5], 16  }
  0x1e   : > { %2541 = vsyncadd (%p2382_p12), [#allocation5], 4294967280 }
  0x1f   : > { %298 = sfence }
  0x20   : > { %p327_p1 = scmp.lt.s32.totalorder %s2564_s9, 1  ;;  %s2186_s13 = sshll.u32 %s2560_s30, 3  ;;  %v2579_v0 = vmov 0   ;;  %v489_v1 = vld [vmem:[%s3533_s2] sm:$0xff]  ;;  %v2580_v2 = vmov 1983009808  }
  0x21   : > { %s334_s18 = sshra.s32 %s2186_s13, 3  ;;  %2460 = vset.pattern.permute.xlu0 %v2579_v0  ;;  %2461 = vset.pattern.permute.xlu2 %v2579_v0  ;;  %v358_v3 = vunpack.c.l.s4 %v2580_v2  ;;  %vm355_vm0 = vcmask 1047556   ;;  %v490_v4 = vld [vmem:[%s3533_s2 + $0x8] sm:$0xff]  ;;  %v2581_v17 = vmov 1934713408   ;;  %vm510_vm1 = vcmask 1043456  }
  0x22   : > { %s328_s21 = scalar_select %p327_p1, %s2564_s9, 1  ;;  %493 = vperm.xlu0 %2460, %v489_v1   ;;  %2462 = vset.pattern.permute.xlu1 %v2579_v0  ;;  %v372_v18 = vunpack.c.l.s4 %v2581_v17  ;;  %vm506_vm2 = vcmask 64512  }
  0x23   : > { %s2187_s24 = sshll.u32 %s334_s18, 2  ;;  %v2732_v14 = vunpack.c.0.s8 %v358_v3  ;;  %s2584_s22 = smov 127  }
  0x24   : > { %s2367_s23 = smul.u32 96, %s328_s21  ;;  %v2748_v37 = vunpack.c.0.s8 %v372_v18  ;;  %s2322_s14 = sld [smem:[#allocation3 + $0x1]] }
  0x26   : > { %s331_s7 = scalar_lea.vmem %s3531_s0, %s2367_s23  ;;  %s2585_s23 = smov 126  }
  0x27   : > { %s2719_s16 = scalar_lea.vmem %s331_s7, %s2187_s24 }
  0x28   : > { %v338_v5 = vld [vmem:[%s2719_s16] sm:$0xf]  ;;  %v340_v6 = vld [vmem:[%s2719_s16 + $0xc] sm:$0xf]  ;;  %v342_v7 = vld [vmem:[%s2719_s16 + $0x18] sm:$0xf] }
  0x29   : > { %v344_v8 = vld [vmem:[%s2719_s16 + $0x24] sm:$0xf]  ;;  %v346_v9 = vld [vmem:[%s2719_s16 + $0x30] sm:$0xf]  ;;  %v348_v10 = vld [vmem:[%s2719_s16 + $0x3c] sm:$0xf] }
  0x2a   : > { %v350_v11 = vld [vmem:[%s2719_s16 + $0x48] sm:$0xf]  ;;  %v352_v12 = vld [vmem:[%s2719_s16 + $0x54] sm:$0xf]  ;;  %v354_v13 = vrot.slane %v346_v9, 4  ;;  %v383_v15 = vrot.slane %v348_v10, 4  ;;  %498 = vperm.xlu0 %2460, %v490_v4  }
  0x2b   : > { %v361_v16 = vrot.slane %v350_v11, 4  ;;  %v389_v19 = vrot.slane %v352_v12, 4  ;;  %v351_v20 = vld [vmem:[%s2719_s16 + $0x4c] sm:$0x1]  ;;  %v353_v21 = vld [vmem:[%s2719_s16 + $0x58] sm:$0x1] }
  0x2c   : > { %v356_v22 = vsel %vm355_vm0, %v354_v13, %v338_v5  ;;  %v384_v23 = vsel %vm355_vm0, %v383_v15, %v340_v6  ;;  %v417_v24 = vrot.slane %v351_v20, 4  ;;  %v435_v25 = vrot.slane %v353_v21, 4  ;;  %v343_v30 = vld [vmem:[%s2719_s16 + $0x1c] sm:$0x1]  ;;  %v347_v31 = vld [vmem:[%s2719_s16 + $0x34] sm:$0x1] }
  0x2d   : > { %v360_v26 = vperm.slane %v356_v22, %v2732_v14  ;;  %v362_v27 = vsel %vm355_vm0, %v361_v16, %v342_v7  ;;  %v388_v28 = vperm.slane %v384_v23, %v2732_v14  ;;  %v390_v29 = vsel %vm355_vm0, %v389_v19, %v344_v8  ;;  %v345_v34 = vld [vmem:[%s2719_s16 + $0x28] sm:$0x1]  ;;  %v339_v40 = vld [vmem:[%s2719_s16 + $0x4] sm:$0x1]  ;;  %v349_v43 = vld [vmem:[%s2719_s16 + $0x40] sm:$0x1] }
  0x2e   : > { %v366_v32 = vperm.slane %v362_v27, %v2732_v14  ;;  %v394_v33 = vperm.slane %v390_v29, %v2732_v14  ;;  %v411_v35 = vrot.slane %v347_v31, 4  ;;  %v418_v36 = vsel %vm355_vm0, %v417_v24, %v343_v30  ;;  %v341_v4 = vld [vmem:[%s2719_s16 + $0x10] sm:$0x1]  ;;  %v2339_v8 = vld [vmem:[%s3532_s1] sm:$0xff]  ;;  %s701_s16 = sld [smem:[#allocation3]] }
  0x2f   : > { %v369_v38 = vrot.slane %v360_v26, 4  ;;  %v397_v39 = vrot.slane %v388_v28, 4  ;;  %v422_v47 = vperm.slane %v418_v36, %v2732_v14  ;;  %v436_v48 = vsel %vm355_vm0, %v435_v25, %v345_v34 }
  0x30   : > { %v367_v41 = vrot.slane %v366_v32, 4  ;;  %v395_v42 = vrot.slane %v394_v33, 4  ;;  %v412_v44 = vsel %vm355_vm0, %v411_v35, %v339_v40  ;;  %v429_v56 = vrot.slane %v349_v43, 4 }
  0x31   : > { %v370_v45 = vsel %vm355_vm0, %v366_v32, %v369_v38  ;;  %v398_v46 = vsel %vm355_vm0, %v394_v33, %v397_v39  ;;  %v416_v55 = vperm.slane %v412_v44, %v2732_v14  ;;  %v423_v5 = vrot.slane %v422_v47, 4 }
  0x32   : > { %v368_v49 = vsel %vm355_vm0, %v367_v41, %v360_v26  ;;  %v396_v50 = vsel %vm355_vm0, %v395_v42, %v388_v28  ;;  %v378_v51 = vperm.slane %v370_v45, %v2748_v37  ;;  %v406_v52 = vperm.slane %v398_v46, %v2748_v37 }
  0x33   : > { %v374_v53 = vperm.slane %v368_v49, %v2748_v37  ;;  %v402_v54 = vperm.slane %v396_v50, %v2748_v37  ;;  %v430_v19 = vsel %vm355_vm0, %v429_v56, %v341_v4  ;;  %v424_v22 = vsel %vm355_vm0, %v423_v5, %v416_v55 }
  0x34   : > { %v2764_v57 = vpack.i.b16 %v406_v52, %v378_v51  ;;  %v467_v58 = vshrl.u32 %v378_v51, 16  ;;  %v468_v59 = vshrl.u32 %v406_v52, 16  ;;  %v381_v60 = vrot.slane %v378_v51, 4 }
  0x35   : > { %v2766_v61 = vpack.i.b16 %v402_v54, %v374_v53  ;;  %v451_v62 = vshrl.u32 %v374_v53, 16  ;;  %v452_v63 = vshrl.u32 %v402_v54, 16  ;;  %v379_v0 = vrot.slane %v374_v53, 4 }
  0x36   : > { %v407_v1 = vrot.slane %v402_v54, 4  ;;  %v524_v2 = vsel %vm510_vm1, %v2764_v57, 0  ;;  %v2770_v3 = vpack.i.b16 %v468_v59, %v467_v58  ;;  %v382_v10 = vsel %vm355_vm0, 0, %v381_v60 }
  0x37   : > { %v512_v6 = vsel %vm510_vm1, %v2766_v61, 0  ;;  %v2775_v7 = vpack.i.b16 %v452_v63, %v451_v62  ;;  %v380_v9 = vsel %vm355_vm0, 0, %v379_v0  ;;  %v409_v15 = vrot.slane %v406_v52, 4 }
  0x38   : > { %548 = vmatpush.bf16.msra.mxu0 %v512_v6  ;;  %v408_v11 = vsel %vm355_vm0, 0, %v407_v1  ;;  %v459_v12 = vshrl.u32 %v380_v9, 16  ;;  %v527_v13 = vsel %vm510_vm1, %v2770_v3, 0  ;;  %v475_v21 = vshrl.u32 %v382_v10, 16 }
  0x39   : > { %v515_v16 = vsel %vm510_vm1, %v2775_v7, 0  ;;  %v2787_v17 = vpack.i.b16 %v408_v11, %v380_v9  ;;  %v460_v18 = vshrl.u32 %v408_v11, 16  ;;  %v410_v20 = vsel %vm355_vm0, 0, %v409_v15 }
  0x3a   : > { %562 = vmatpush.bf16.msra.mxu1 %v515_v16  ;;  %v2797_v25 = vpack.i.b16 %v410_v20, %v382_v10  ;;  %v476_v26 = vshrl.u32 %v410_v20, 16  ;;  %v434_v27 = vperm.slane %v430_v19, %v2732_v14  ;;  %v440_v28 = vperm.slane %v436_v48, %v2732_v14 }
  0x3b   : > { %2192 = vmatmul.msk.bf16.vlgmr.msra.gmra.mxu0 %vm506_vm2, %v2339_v8  ;;  %v518_v23 = vsel %vm510_vm1, %v2787_v17, 0  ;;  %v2795_v24 = vpack.i.b16 %v460_v18, %v459_v12  ;;  %v428_v31 = vperm.slane %v424_v22, %v2748_v37  ;;  %v743_v44 = vlaneseq }
  0x3c   : > { %604 = vmatpush.bf16.msrb.mxu0 %v524_v2  ;;  %576 = vmatpush.bf16.msra.mxu2 %v518_v23  ;;  %v530_v30 = vsel %vm510_vm1, %v2797_v25, 0  ;;  %v2807_v32 = vpack.i.b16 %v476_v26, %v475_v21  ;;  %v441_v33 = vrot.slane %v440_v28, 4  ;;  %v746_v46 = vstv %s2186_s13  ;;  %s2583_s13 = smov 1  }
  0x3d   : > { %2193 = vmatmul.msk.bf16.vlgmr.msra.gmra.mxu1 %vm506_vm2, %v2339_v8  ;;  %v521_v29 = vsel %vm510_vm1, %v2795_v24, 0  ;;  %v483_v38 = vshrl.u32 %v428_v31, 16  ;;  %v744_v45 = vshrl.u32 %v743_v44, 7  ;;  %v2831_v48 = vand.u32 127, %v743_v44 }
  0x3e   : > { %618 = vmatpush.bf16.msrb.mxu1 %v527_v13  ;;  %590 = vmatpush.bf16.msra.mxu3 %v521_v29  ;;  %v533_v34 = vsel %vm510_vm1, %v2807_v32, 0  ;;  %v442_v35 = vsel %vm355_vm0, %v441_v33, %v434_v27  ;;  %v2841_v51 = vstv %s701_s16  ;;  %v2582_v53 = vmov 0.0   ;;  %s2333_s16 = sld [smem:[#allocation3 + $0x2]] }
  0x3f   : > { %2194 = vmatmul.msk.bf16.vlgmr.msra.gmra.mxu2 %vm506_vm2, %v2339_v8  ;;  %v446_v36 = vperm.slane %v442_v35, %v2748_v37  ;;  %v747_v47 = vadd.s32 %v746_v46, %v744_v45  ;;  %vm757_vm6 = vcmp.ge.s32.totalorder %v2831_v48, 1  ;;  %vm760_vm8 = vcmp.lt.s32.totalorder %v2831_v48, 17 }
  0x40   : > { %632 = vmatpush.bf16.msrb.mxu2 %v530_v30  ;;  %v745_v19 = vadd.s32 8, %v744_v45 }
  0x41   : > { %2195 = vmatmul.msk.bf16.vlgmr.msra.gmra.mxu3 %vm506_vm2, %v2339_v8  ;;  %v2815_v39 = vpack.i.b16 %v446_v36, %v428_v31  ;;  %v484_v40 = vshrl.u32 %v446_v36, 16  ;;  %vm751_vm3 = vcmp.ge.s32.totalorder %v747_v47, 1  ;;  %vm753_vm4 = vcmp.lt.s32.totalorder %v747_v47, 17 }
  0x42   : > { %646 = vmatpush.bf16.msrb.mxu3 %v533_v34  ;;  %vm755_vm5 = vmand %vm751_vm3, %vm753_vm4  ;;  %v748_v34 = vadd.s32 %v746_v46, %v745_v19 }
  0x43   : > { %v536_v41 = vsel %vm510_vm1, %v2815_v39, 0  ;;  %v2819_v42 = vpack.i.b16 %v484_v40, %v483_v38  ;;  %vm758_vm7 = vmand %vm755_vm5, %vm757_vm6 }
  0x44   : > { %660 = vmatpush.bf16.msra.mxu0 %v536_v41  ;;  %vm761_vm9 = vmand %vm758_vm7, %vm760_vm8  ;;  %vm752_vm4 = vcmp.ge.s32.totalorder %v748_v34, 1  ;;  %vm754_vm5 = vcmp.lt.s32.totalorder %v748_v34, 17 }
  0x45   : > { %v539_v43 = vsel %vm510_vm1, %v2819_v42, 0  ;;  %v2845_v54 = vsel %vm761_vm9, 1.0, %v2582_v53 }
  0x46   : > { %674 = vmatpush.bf16.msra.mxu1 %v539_v43  ;;  %v769_v59 = vperm.slane %v2845_v54, 0  ;;  %v770_v60 = vperm.slane %v2845_v54, 1  ;;  %v771_v23 = vperm.slane %v2845_v54, 2  ;;  %v772_v26 = vperm.slane %v2845_v54, 3 }
  0x47   : > { %v773_v45 = vperm.slane %v2845_v54, 4  ;;  %v774_v46 = vperm.slane %v2845_v54, 5 }
  0x4b   : > { %2196 = vmatmul.msk.bf16.vlgmr.msrb.gmra.mxu0 %vm506_vm2, %v2339_v8 }
  0x4d   : > { %2197 = vmatmul.msk.bf16.vlgmr.msrb.gmra.mxu1 %vm506_vm2, %v2339_v8 }
  0x4f   : > { %2198 = vmatmul.msk.bf16.vlgmr.msrb.gmra.mxu2 %vm506_vm2, %v2339_v8 }
  0x51   : > { %2199 = vmatmul.msk.bf16.vlgmr.msrb.gmra.mxu3 %vm506_vm2, %v2339_v8 }
  0x5b   : > { %2200 = vmatmul.msk.bf16.vlgmr.msra.gmra.mxu0 %vm506_vm2, %v2339_v8 }
  0x5d   : > { %2201 = vmatmul.msk.bf16.vlgmr.msra.gmra.mxu1 %vm506_vm2, %v2339_v8 }
  0x94   : > { %v2837_v49 = vpop.permute.xlu0 %493 }
  0x9c   : > { %v2852_v1 = vpop.permute.xlu0 %498 }
  0xb8   : > { %v550_v50 = vpop.f32.mrf.mxu0 }
  0xb9   : > { %v551_v52 = vadd.f32 %v550_v50, %v2837_v49 }
  0xba   : > { %v564_v55 = vpop.f32.mrf.mxu1 }
  0xbb   : > { %vm681_vm10 = vcmp.ge.f32.partialorder %v551_v52, 0.0  ;;  %v703_v56 = vmul.f32 %v2841_v51, %v551_v52  ;;  %v565_v58 = vadd.f32 %v564_v55, %v2837_v49 }
  0xbd   : > { %vm682_vm11 = vcmp.ge.f32.partialorder %v565_v58, 0.0  ;;  %v704_v62 = vmul.f32 %v2841_v51, %v565_v58  ;;  %v723_v63 = vsel %vm681_vm10, %v551_v52, %v703_v56  ;;  %vm756_vm10 = vmand %vm752_vm4, %vm754_vm5 }
  0xbe   : > { %v789_v4 = vmul.f32 %v769_v59, %v723_v63 }
  0xbf   : > { %v724_v0 = vsel %vm682_vm11, %v565_v58, %v704_v62 }
  0xc0   : > { %v552_v2 = vpop.f32.mrf.mxu0  ;;  %v790_v5 = vmul.f32 %v770_v60, %v724_v0 }
  0xc1   : > { %v553_v6 = vadd.f32 %v552_v2, %v2852_v1  ;;  %v2206_v2 = vld [vmem:[#allocation2] sm:$0xf] }
  0xc2   : > { %v578_v8 = vpop.f32.mrf.mxu2  ;;  %v566_v9 = vpop.f32.mrf.mxu1  ;;  %v809_v10 = vpack.c.bf16 %v790_v5, %v789_v4  ;;  %v2345_v4 = vld [vmem:[#allocation2 + $0x30] sm:$0xf0] }
  0xc3   : > { %vm691_vm12 = vcmp.ge.f32.partialorder %v553_v6, 0.0  ;;  %v713_v11 = vmul.f32 %v2841_v51, %v553_v6  ;;  %v579_v12 = vadd.f32 %v578_v8, %v2837_v49  ;;  %v567_v13 = vadd.f32 %v566_v9, %v2852_v1 }
  0xc4   : > { %v592_v15 = vpop.f32.mrf.mxu3  ;;  %829 = vrot.lane.b32.xlu1 %v809_v10, %s2583_s13 }
  0xc5   : > { %v705_v16 = vmul.f32 %v2841_v51, %v579_v12  ;;  %vm692_vm13 = vcmp.ge.f32.partialorder %v567_v13, 0.0  ;;  %v714_v18 = vmul.f32 %v2841_v51, %v567_v13  ;;  %vm683_vm14 = vcmp.ge.f32.partialorder %v579_v12, 0.0 }
  0xc6   : > { %v593_v20 = vadd.f32 %v592_v15, %v2837_v49  ;;  %v733_v21 = vsel %vm691_vm12, %v553_v6, %v713_v11  ;;  %vm759_vm12 = vmand %vm756_vm10, %vm757_vm6  ;;  %vm859_vm10 = vcmask 7168  }
  0xc7   : > { %v734_v22 = vsel %vm692_vm13, %v567_v13, %v714_v18  ;;  %v799_v29 = vmul.f32 %v769_v59, %v733_v21  ;;  %v725_v31 = vsel %vm683_vm14, %v579_v12, %v705_v16  ;;  %v2882_v16 = vor.u32 %v2345_v4, %v2206_v2  ;;  %vm762_vm14 = vmand %vm759_vm12, %vm760_vm8 }
  0xc8   : > { %vm684_vm15 = vcmp.ge.f32.partialorder %v593_v20, 0.0  ;;  %v706_v27 = vmul.f32 %v2841_v51, %v593_v20  ;;  %v606_v28 = vpop.f32.mrf.mxu0  ;;  %v800_v30 = vmul.f32 %v770_v60, %v734_v22  ;;  %v791_v50 = vmul.f32 %v771_v23, %v725_v31 }
  0xc9   : > { %v607_v33 = vadd.f32 %v606_v28, %v2837_v49  ;;  %v2203_v48 = vsel %vm762_vm14, 1.0, %v2582_v53  ;;  %vm899_vm12 = vcmask 3072   ;;  %vm1277_vm14 = vcmask 130048  }
  0xca   : > { %v726_v35 = vsel %vm684_vm15, %v593_v20, %v706_v27  ;;  %v580_v36 = vpop.f32.mrf.mxu2  ;;  %v620_v38 = vpop.f32.mrf.mxu1  ;;  %v814_v40 = vpack.c.bf16 %v800_v30, %v799_v29 }
  0xcb   : > { %v707_v41 = vmul.f32 %v2841_v51, %v607_v33  ;;  %v581_v43 = vadd.f32 %v580_v36, %v2852_v1  ;;  %v621_v44 = vadd.f32 %v620_v38, %v2837_v49  ;;  %vm685_vm2 = vcmp.ge.f32.partialorder %v607_v33, 0.0 }
  0xcc   : > { %v594_v47 = vpop.f32.mrf.mxu3  ;;  %839 = vrot.lane.b32.xlu2 %v814_v40, %s2583_s13  ;;  %v792_v52 = vmul.f32 %v772_v26, %v726_v35  ;;  %v776_v38 = vperm.slane %v2845_v54, 7 }
  0xcd   : > { %v715_v55 = vmul.f32 %v2841_v51, %v581_v43  ;;  %vm686_vm3 = vcmp.ge.f32.partialorder %v621_v44, 0.0  ;;  %vm693_vm7 = vcmp.ge.f32.partialorder %v581_v43, 0.0  ;;  %v708_v56 = vmul.f32 %v2841_v51, %v621_v44 }
  0xce   : > { %v595_v58 = vadd.f32 %v594_v47, %v2852_v1  ;;  %v810_v59 = vpack.c.bf16 %v792_v52, %v791_v50  ;;  %v727_v60 = vsel %vm685_vm2, %v607_v33, %v707_v41  ;;  %v778_v52 = vperm.slane %v2203_v48, 1 }
  0xcf   : > { %v728_v62 = vsel %vm686_vm3, %v621_v44, %v708_v56  ;;  %v735_v5 = vsel %vm693_vm7, %v581_v43, %v715_v55  ;;  %v793_v12 = vmul.f32 %v773_v45, %v727_v60  ;;  %v777_v56 = vperm.slane %v2203_v48, 0 }
  0xd0   : > { %vm694_vm9 = vcmp.ge.f32.partialorder %v595_v58, 0.0  ;;  %v716_v63 = vmul.f32 %v2841_v51, %v595_v58  ;;  %831 = vrot.lane.b32.xlu1 %v810_v59, %s2583_s13  ;;  %v608_v0 = vpop.f32.mrf.mxu0  ;;  %v794_v8 = vmul.f32 %v774_v46, %v728_v62  ;;  %v801_v20 = vmul.f32 %v771_v23, %v735_v5 }
  0xd1   : > { %v609_v6 = vadd.f32 %v608_v0, %v2852_v1 }
  0xd2   : > { %v736_v9 = vsel %vm694_vm9, %v595_v58, %v716_v63  ;;  %v634_v10 = vpop.f32.mrf.mxu2  ;;  %v622_v11 = vpop.f32.mrf.mxu1  ;;  %v811_v19 = vpack.c.bf16 %v794_v8, %v793_v12  ;;  %vm891_vm9 = vcmask 1043464  }
  0xd3   : > { %v717_v13 = vmul.f32 %v2841_v51, %v609_v6  ;;  %v623_v15 = vadd.f32 %v622_v11, %v2852_v1  ;;  %vm695_vm11 = vcmp.ge.f32.partialorder %v609_v6, 0.0  ;;  %v802_v21 = vmul.f32 %v772_v26, %v736_v9 }
  0xd4   : > { %v648_v18 = vpop.f32.mrf.mxu3  ;;  %833 = vrot.lane.b32.xlu0 %v811_v19, %s2583_s13  ;;  %v635_v26 = vadd.f32 %v634_v10, %v2837_v49 }
  0xd5   : > { %vm696_vm13 = vcmp.ge.f32.partialorder %v623_v15, 0.0  ;;  %v718_v22 = vmul.f32 %v2841_v51, %v623_v15  ;;  %v815_v27 = vpack.c.bf16 %v802_v21, %v801_v20  ;;  %v737_v28 = vsel %vm695_vm11, %v609_v6, %v717_v13  ;;  %vm893_vm11 = vmor %vm355_vm0, %vm891_vm9 }
  0xd6   : > { %v649_v29 = vadd.f32 %v648_v18, %v2837_v49  ;;  %v803_v36 = vmul.f32 %v773_v45, %v737_v28  ;;  %vm687_vm3 = vcmp.ge.f32.partialorder %v635_v26, 0.0 }
  0xd7   : > { %v738_v30 = vsel %vm696_vm13, %v623_v15, %v718_v22  ;;  %841 = vrot.lane.b32.xlu2 %v815_v27, %s2583_s13  ;;  %vm1055_vm13 = vcmask 1031168  }
  0xd8   : > { %990 = vrot.lane.b32.xlu1 %v2882_v16, %s2584_s22  ;;  %v662_v23 = vpop.f32.mrf.mxu0  ;;  %v804_v33 = vmul.f32 %v774_v46, %v738_v30  ;;  %v710_v40 = vmul.f32 %v2841_v51, %v649_v29  ;;  %vm688_vm6 = vcmp.ge.f32.partialorder %v649_v29, 0.0  ;;  %v709_v46 = vmul.f32 %v2841_v51, %v635_v26 }
  0xd9   : > { %v663_v31 = vadd.f32 %v662_v23, %v2837_v49 }
  0xda   : > { %v636_v34 = vpop.f32.mrf.mxu2  ;;  %v676_v35 = vpop.f32.mrf.mxu1  ;;  %v816_v50 = vpack.c.bf16 %v804_v33, %v803_v36  ;;  %v730_v58 = vsel %vm688_vm6, %v649_v29, %v710_v40  ;;  %v729_v2 = vsel %vm687_vm3, %v635_v26, %v709_v46 }
  0xdb   : > { %v711_v41 = vmul.f32 %v2841_v51, %v663_v31  ;;  %v637_v43 = vadd.f32 %v636_v34, %v2852_v1  ;;  %v677_v44 = vadd.f32 %v676_v35, %v2837_v49  ;;  %vm689_vm8 = vcmp.ge.f32.partialorder %v663_v31, 0.0 }
  0xdc   : > { %v650_v47 = vpop.f32.mrf.mxu3  ;;  %v775_v49 = vperm.slane %v2845_v54, 6  ;;  %v796_v9 = vmul.f32 %v776_v38, %v730_v58 }
  0xdd   : > { %vm697_vm15 = vcmp.ge.f32.partialorder %v637_v43, 0.0  ;;  %v719_v45 = vmul.f32 %v2841_v51, %v637_v43  ;;  %vm690_vm2 = vcmp.ge.f32.partialorder %v677_v44, 0.0  ;;  %v712_v53 = vmul.f32 %v2841_v51, %v677_v44 }
  0xde   : > { %v651_v55 = vadd.f32 %v650_v47, %v2852_v1  ;;  %v731_v59 = vsel %vm689_vm8, %v663_v31, %v711_v41  ;;  %v795_v15 = vmul.f32 %v775_v49, %v729_v2 }
  0xdf   : > { %v739_v60 = vsel %vm697_vm15, %v637_v43, %v719_v45  ;;  %v732_v62 = vsel %vm690_vm2, %v677_v44, %v712_v53  ;;  %1033 = vrot.lane.b32.xlu2 %v2882_v16, %s2585_s23  ;;  %v797_v54 = vmul.f32 %v777_v56, %v731_v59 }
  0xe0   : > { %vm698_vm4 = vcmp.ge.f32.partialorder %v651_v55, 0.0  ;;  %v720_v63 = vmul.f32 %v2841_v51, %v651_v55  ;;  %843 = vrot.lane.b32.xlu1 %v816_v50, %s2583_s13  ;;  %v664_v0 = vpop.f32.mrf.mxu0  ;;  %v798_v5 = vmul.f32 %v778_v52, %v732_v62  ;;  %v805_v12 = vmul.f32 %v775_v49, %v739_v60 }
  0xe1   : > { %v665_v4 = vadd.f32 %v664_v0, %v2852_v1  ;;  %v812_v21 = vpack.c.bf16 %v796_v9, %v795_v15 }
  0xe2   : > { %v740_v6 = vsel %vm698_vm4, %v651_v55, %v720_v63  ;;  %v678_v8 = vpop.f32.mrf.mxu1  ;;  %v813_v18 = vpack.c.bf16 %v798_v5, %v797_v54 }
  0xe3   : > { %v721_v10 = vmul.f32 %v2841_v51, %v665_v4  ;;  %v679_v11 = vadd.f32 %v678_v8, %v2852_v1  ;;  %v806_v13 = vmul.f32 %v776_v38, %v740_v6  ;;  %vm699_vm5 = vcmp.ge.f32.partialorder %v665_v4, 0.0 }
  0xe5   : > { %vm700_vm7 = vcmp.ge.f32.partialorder %v679_v11, 0.0  ;;  %v722_v19 = vmul.f32 %v2841_v51, %v679_v11  ;;  %v817_v20 = vpack.c.bf16 %v806_v13, %v805_v12  ;;  %v741_v22 = vsel %vm699_vm5, %v665_v4, %v721_v10 }
  0xe6   : > { %v807_v1 = vmul.f32 %v777_v56, %v741_v22 }
  0xe7   : > { %v742_v27 = vsel %vm700_vm7, %v679_v11, %v722_v19  ;;  %845 = vrot.lane.b32.xlu0 %v817_v20, %s2583_s13  ;;  %835 = vrot.lane.b32.xlu2 %v812_v21, %s2583_s13 }
  0xe8   : > { %837 = vrot.lane.b32.xlu1 %v813_v18, %s2583_s13  ;;  %v808_v28 = vmul.f32 %v778_v52, %v742_v27 }
  0xea   : > { %v818_v29 = vpack.c.bf16 %v808_v28, %v807_v1 }
  0xef   : > { %847 = vrot.lane.b32.xlu2 %v818_v29, %s2583_s13  ;;  %s324_s13 = sand.u32 1, %s2552_s28  }
 0x126   : > { %v840_v30 = vpop.permute.xlu2 %839 }
 0x127   : > { %v854_v51 = vrot.slane %v840_v30, 4 }
 0x129   : > { %v870_v23 = vsel %vm859_vm10, %v854_v51, %v840_v30 }
 0x12a   : > { %901 = vst.msk [vmem:[#allocation2 + $0x38] sm:$0xff] %vm893_vm11, %v870_v23 }
 0x131   : > { %v842_v26 = vpop.permute.xlu2 %841  ;;  %v2346_v40 = vld [vmem:[#allocation2 + $0x38] sm:$0xf0]  ;;  %v2356_v41 = vld [vmem:[#allocation2 + $0x34] sm:$0xf0] }
 0x132   : > { %v855_v31 = vrot.slane %v842_v26, 4  ;;  %v2252_v43 = vld [vmem:[#allocation2 + $0x38] sm:$0xf0]  ;;  %v2208_v0 = vld [vmem:[#allocation2 + $0x34] sm:$0xf0] }
 0x134   : > { %v871_v33 = vsel %vm510_vm1, %v854_v51, %v855_v31 }
 0x135   : > { %v872_v34 = vsel %vm859_vm10, %v871_v33, %v842_v26 }
 0x136   : > { %v830_v35 = vpop.permute.xlu1 %829  ;;  %902 = vst [vmem:[#allocation2 + $0x40] sm:$0xff] %v872_v34 }
 0x137   : > { %v849_v36 = vrot.slane %v830_v35, 4 }
 0x139   : > { %v860_v38 = vsel %vm859_vm10, %v849_v36, %v830_v35  ;;  %v2924_v48 = vpop.permute.xlu2 %1033 }
 0x13a   : > { %894 = vst.msk [vmem:[#allocation2 + $0x4] sm:$0xff] %vm893_vm11, %v860_v38 }
 0x13d   : > { %v2216_v12 = vld [vmem:[#allocation2 + $0x3c] sm:$0xf0]  ;;  %v2347_v18 = vld [vmem:[#allocation2 + $0x40] sm:$0xf0] }
 0x13e   : > { %v2357_v1 = vld [vmem:[#allocation2 + $0x3c] sm:$0xf0] }
 0x141   : > { %v2214_v44 = vld [vmem:[#allocation2 + $0x8] sm:$0xf]  ;;  %v2250_v47 = vld [vmem:[#allocation2 + $0x4] sm:$0xf]  ;;  %v836_v52 = vpop.permute.xlu2 %835 }
 0x142   : > { %v2351_v50 = vld [vmem:[#allocation2 + $0x8] sm:$0xf]  ;;  %v832_v46 = vpop.permute.xlu1 %831  ;;  %v2926_v45 = vor.u32 %v2346_v40, %v2214_v44  ;;  %v2928_v53 = vor.u32 %v2356_v41, %v2250_v47  ;;  %v2340_v49 = vld [vmem:[#allocation2 + $0x4] sm:$0xf]  ;;  %v852_v62 = vrot.slane %v836_v52, 4 }
 0x143   : > { %v2930_v55 = vor.u32 %v2351_v50, %v2252_v43  ;;  %v850_v56 = vrot.slane %v832_v46, 4  ;;  %v2942_v5 = vor.u32 %v2340_v49, %v2208_v0  ;;  %v2260_v50 = vld [vmem:[#allocation2 + $0x40] sm:$0xf0] }
 0x144   : > { %994 = vrot.lane.b32.xlu0 %v2926_v45, %s2584_s22  ;;  %1131 = vrot.lane.b32.xlu2 %v2928_v53, %s2584_s22 }
 0x145   : > { %v862_v58 = vsel %vm510_vm1, %v849_v36, %v850_v56  ;;  %1175 = vrot.lane.b32.xlu1 %v2930_v55, %s2585_s23 }
 0x146   : > { %v863_v59 = vsel %vm859_vm10, %v862_v58, %v832_v46  ;;  %v834_v60 = vpop.permute.xlu0 %833 }
 0x147   : > { %895 = vst [vmem:[#allocation2 + $0xc] sm:$0xff] %v863_v59  ;;  %v851_v63 = vrot.slane %v834_v60, 4 }
 0x149   : > { %v848_v2 = vpop.permute.xlu2 %847  ;;  %v864_v6 = vsel %vm510_vm1, %v850_v56, %v851_v63  ;;  %v866_v8 = vsel %vm510_vm1, %v851_v63, %v852_v62 }
 0x14a   : > { %v2940_v4 = vpop.permute.xlu1 %990  ;;  %v858_v9 = vrot.slane %v848_v2, 4  ;;  %v865_v54 = vsel %vm859_vm10, %v864_v6, %v834_v60  ;;  %v867_v10 = vsel %vm859_vm10, %v866_v8, %v836_v52 }
 0x14b   : > { %896 = vst [vmem:[#allocation2 + $0x14] sm:$0xff] %v865_v54 }
 0x14c   : > { %1173 = vrot.lane.b32.xlu0 %v2928_v53, %s2585_s23  ;;  %992 = vrot.lane.b32.xlu2 %v2942_v5, %s2584_s22  ;;  %897 = vst [vmem:[#allocation2 + $0x1c] sm:$0xff] %v867_v10 }
 0x14d   : > { %906 = vst.msk [vmem:[#allocation2 + $0x60] sm:$0xf] %vm899_vm12, %v858_v9 }
 0x14e   : > { %v2341_v11 = vld [vmem:[#allocation2 + $0xc] sm:$0xf]  ;;  %v2222_v15 = vld [vmem:[#allocation2 + $0x10] sm:$0xf] }
 0x14f   : > { %v2953_v13 = vor.u32 %v2341_v11, %v2216_v12  ;;  %v2957_v20 = vor.u32 %v2347_v18, %v2222_v15  ;;  %v2258_v22 = vld [vmem:[#allocation2 + $0xc] sm:$0xf]  ;;  %v2352_v44 = vld [vmem:[#allocation2 + $0x10] sm:$0xf] }
 0x150   : > { %v2965_v29 = vor.u32 %v2357_v1, %v2258_v22  ;;  %v2986_v46 = vor.u32 %v2352_v44, %v2260_v50 }
 0x151   : > { %996 = vrot.lane.b32.xlu1 %v2953_v13, %s2584_s22 }
 0x152   : > { %v844_v19 = vpop.permute.xlu1 %843  ;;  %v2342_v40 = vld [vmem:[#allocation2 + $0x14] sm:$0xf]  ;;  %v2230_v49 = vld [vmem:[#allocation2 + $0x18] sm:$0xf] }
 0x153   : > { %v856_v21 = vrot.slane %v844_v19, 4  ;;  %v2266_v52 = vld [vmem:[#allocation2 + $0x14] sm:$0xf]  ;;  %v2353_v60 = vld [vmem:[#allocation2 + $0x18] sm:$0xf] }
 0x154   : > { %1133 = vrot.lane.b32.xlu0 %v2930_v55, %s2584_s22  ;;  %998 = vrot.lane.b32.xlu2 %v2957_v20, %s2584_s22  ;;  %v2343_v6 = vld [vmem:[#allocation2 + $0x1c] sm:$0xf]  ;;  %v2238_v8 = vld [vmem:[#allocation2 + $0x20] sm:$0xf] }
 0x155   : > { %v873_v27 = vsel %vm510_vm1, %v855_v31, %v856_v21  ;;  %v2274_v12 = vld [vmem:[#allocation2 + $0x1c] sm:$0xf]  ;;  %v2354_v15 = vld [vmem:[#allocation2 + $0x20] sm:$0xf] }
 0x156   : > { %v874_v28 = vsel %vm859_vm10, %v873_v27, %v844_v19  ;;  %v2361_v44 = vld [vmem:[#allocation2 + $0x5c] sm:$0xf0] }
 0x157   : > { %903 = vst [vmem:[#allocation2 + $0x48] sm:$0xff] %v874_v28 }
 0x159   : > { %1177 = vrot.lane.b32.xlu1 %v2965_v29, %s2585_s23  ;;  %v846_v30 = vpop.permute.xlu0 %845 }
 0x15a   : > { %v857_v51 = vrot.slane %v846_v30, 4  ;;  %v838_v23 = vpop.permute.xlu1 %837 }
 0x15b   : > { %v853_v26 = vrot.slane %v838_v23, 4 }
 0x15c   : > { %v875_v33 = vsel %vm510_vm1, %v856_v21, %v857_v51  ;;  %v877_v34 = vsel %vm510_vm1, %v857_v51, %v858_v9  ;;  %1035 = vrot.lane.b32.xlu0 %v2942_v5, %s2585_s23 }
 0x15d   : > { %v876_v31 = vsel %vm859_vm10, %v875_v33, %v846_v30  ;;  %v878_v35 = vsel %vm859_vm10, %v877_v34, %v848_v2  ;;  %v868_v36 = vsel %vm510_vm1, %v852_v62, %v853_v26  ;;  %900 = vst.msk [vmem:[#allocation2 + $0x2c] sm:$0xf] %vm899_vm12, %v853_v26  ;;  %v2296_v33 = vld [vmem:[#allocation2 + $0x5c] sm:$0xf0]  ;;  %vm1012_vm1 = vcmask 1039360  }
 0x15e   : > { %904 = vst [vmem:[#allocation2 + $0x50] sm:$0xff] %v876_v31  ;;  %v869_v38 = vsel %vm859_vm10, %v868_v36, %v838_v23  ;;  %v2224_v41 = vld [vmem:[#allocation2 + $0x44] sm:$0xf0]  ;;  %v2348_v58 = vld [vmem:[#allocation2 + $0x48] sm:$0xf0] }
 0x15f   : > { %905 = vst [vmem:[#allocation2 + $0x58] sm:$0xff] %v878_v35  ;;  %v2978_v43 = vor.u32 %v2342_v40, %v2224_v41  ;;  %v2358_v47 = vld [vmem:[#allocation2 + $0x44] sm:$0xf0]  ;;  %v2268_v59 = vld [vmem:[#allocation2 + $0x48] sm:$0xf0]  ;;  %v3002_v62 = vor.u32 %v2348_v58, %v2230_v49 }
 0x160   : > { %898 = vst [vmem:[#allocation2 + $0x24] sm:$0xff] %v869_v38  ;;  %v2988_v56 = vor.u32 %v2358_v47, %v2266_v52  ;;  %v3004_v63 = vor.u32 %v2353_v60, %v2268_v59  ;;  %v2302_v40 = vld [vmem:[#allocation2 + $0x30] sm:$0xf]  ;;  %v2364_v41 = vld [vmem:[#allocation2 + $0x60] sm:$0xf0] }
 0x161   : > { %1135 = vrot.lane.b32.xlu1 %v2965_v29, %s2584_s22  ;;  %1000 = vrot.lane.b32.xlu2 %v2978_v43, %s2584_s22  ;;  %v2303_v52 = vor.u32 %v2364_v41, %v2302_v40 }
 0x164   : > { %1037 = vrot.lane.b32.xlu0 %v2926_v45, %s2585_s23  ;;  %v2362_v26 = vld [vmem:[#allocation2 + $0x2c] sm:$0xf] }
 0x165   : > { %v2232_v0 = vld [vmem:[#allocation2 + $0x4c] sm:$0xf0]  ;;  %v2349_v2 = vld [vmem:[#allocation2 + $0x50] sm:$0xf0]  ;;  %v3050_v31 = vor.u32 %v2362_v26, %v2296_v33  ;;  %v2290_v38 = vld [vmem:[#allocation2 + $0x2c] sm:$0xf] }
 0x166   : > { %v3012_v9 = vor.u32 %v2343_v6, %v2232_v0  ;;  %v3014_v54 = vor.u32 %v2349_v2, %v2238_v8  ;;  %v2359_v10 = vld [vmem:[#allocation2 + $0x4c] sm:$0xf0]  ;;  %v2276_v11 = vld [vmem:[#allocation2 + $0x50] sm:$0xf0]  ;;  %v2363_v21 = vld [vmem:[#allocation2 + $0x58] sm:$0xf0]  ;;  %v2291_v50 = vor.u32 %v2361_v44, %v2290_v38 }
 0x167   : > { %v3022_v18 = vor.u32 %v2359_v10, %v2274_v12  ;;  %v3024_v19 = vor.u32 %v2354_v15, %v2276_v11  ;;  %v2294_v22 = vld [vmem:[#allocation2 + $0x28] sm:$0xf]  ;;  %v2344_v27 = vld [vmem:[#allocation2 + $0x24] sm:$0xf]  ;;  %v2240_v28 = vld [vmem:[#allocation2 + $0x54] sm:$0xf0] }
 0x168   : > { %v3032_v1 = vor.u32 %v2363_v21, %v2294_v22  ;;  %v3034_v30 = vor.u32 %v2344_v27, %v2240_v28  ;;  %v2282_v51 = vld [vmem:[#allocation2 + $0x24] sm:$0xf]  ;;  %v2360_v23 = vld [vmem:[#allocation2 + $0x54] sm:$0xf0]  ;;  %v2355_v35 = vld [vmem:[#allocation2 + $0x28] sm:$0xf] }
 0x169   : > { %1179 = vrot.lane.b32.xlu1 %v2986_v46, %s2585_s23  ;;  %1181 = vrot.lane.b32.xlu2 %v2988_v56, %s2585_s23  ;;  %v3048_v34 = vor.u32 %v2360_v23, %v2282_v51  ;;  %v2284_v36 = vld [vmem:[#allocation2 + $0x58] sm:$0xf0]  ;;  %v2246_v49 = vld [vmem:[#allocation2 + $0x28] sm:$0xf] }
 0x16a   : > { %v3058_v47 = vor.u32 %v2355_v35, %v2284_v36  ;;  %v2350_v60 = vld [vmem:[#allocation2 + $0x58] sm:$0xf0]  ;;  %v1257_v27 = vld [vmem:[%s3535_s4 + $0x8] sm:$0xff] }
 0x16b   : > { %v2247_v2 = vor.u32 %v2350_v60, %v2246_v49  ;;  %v2308_v49 = vld [vmem:[%s3534_s3 + $0x8] sm:$0xf0] }
 0x16c   : > { %1039 = vrot.lane.b32.xlu0 %v2953_v13, %s2585_s23 }
 0x171   : > { %1137 = vrot.lane.b32.xlu1 %v2986_v46, %s2584_s22  ;;  %1139 = vrot.lane.b32.xlu2 %v2988_v56, %s2584_s22 }
 0x174   : > { %1041 = vrot.lane.b32.xlu0 %v2957_v20, %s2585_s23 }
 0x179   : > { %1045 = vrot.lane.b32.xlu1 %v3002_v62, %s2585_s23  ;;  %1141 = vrot.lane.b32.xlu2 %v3004_v63, %s2584_s22 }
 0x17c   : > { %1002 = vrot.lane.b32.xlu0 %v3002_v62, %s2584_s22 }
 0x181   : > { %1004 = vrot.lane.b32.xlu1 %v3012_v9, %s2584_s22  ;;  %1006 = vrot.lane.b32.xlu2 %v3014_v54, %s2584_s22 }
 0x184   : > { %1183 = vrot.lane.b32.xlu0 %v3004_v63, %s2585_s23 }
 0x189   : > { %1185 = vrot.lane.b32.xlu1 %v3022_v18, %s2585_s23  ;;  %1187 = vrot.lane.b32.xlu2 %v3024_v19, %s2585_s23 }
 0x18c   : > { %1043 = vrot.lane.b32.xlu0 %v2978_v43, %s2585_s23 }
 0x191   : > { %1230 = vrot.lane.b32.xlu1 %v3032_v1, %s2584_s22  ;;  %1008 = vrot.lane.b32.xlu2 %v3034_v30, %s2584_s22 }
 0x194   : > { %1143 = vrot.lane.b32.xlu0 %v3022_v18, %s2584_s22 }
 0x199   : > { %1047 = vrot.lane.b32.xlu1 %v3012_v9, %s2585_s23  ;;  %1049 = vrot.lane.b32.xlu2 %v3014_v54, %s2585_s23 }
 0x19c   : > { %1145 = vrot.lane.b32.xlu0 %v3024_v19, %s2584_s22 }
 0x19e   : > { %v1132_v58 = vpop.permute.xlu2 %1131 }
 0x1a1   : > { %1147 = vrot.lane.b32.xlu1 %v3048_v34, %s2584_s22  ;;  %1232 = vrot.lane.b32.xlu2 %v3050_v31, %s2584_s22 }
 0x1a4   : > { %1189 = vrot.lane.b32.xlu0 %v3048_v34, %s2585_s23 }
 0x1a6   : > { %v993_v59 = vpop.permute.xlu2 %992 }
 0x1a9   : > { %1191 = vrot.lane.b32.xlu1 %v3058_v47, %s2585_s23  ;;  %1193 = vrot.lane.b32.xlu2 %v2291_v50, %s2585_s23 }
 0x1ac   : > { %1234 = vrot.lane.b32.xlu0 %v2303_v52, %s2584_s22 }
 0x1ae   : > { %v999_v8 = vpop.permute.xlu2 %998 }
 0x1b1   : > { %1149 = vrot.lane.b32.xlu1 %v3058_v47, %s2584_s22  ;;  %1151 = vrot.lane.b32.xlu2 %v2291_v50, %s2584_s22 }
 0x1b4   : > { %1051 = vrot.lane.b32.xlu0 %v3034_v30, %s2585_s23 }
 0x1b6   : > { %v995_v0 = vpop.permute.xlu0 %994 }
 0x1b7   : > { %v1176_v6 = vpop.permute.xlu1 %1175 }
 0x1b9   : > { %1053 = vrot.lane.b32.xlu1 %v2247_v2, %s2585_s23  ;;  %1010 = vrot.lane.b32.xlu2 %v2247_v2, %s2584_s22 }
 0x1bb   : > { %v3082_v21 = vpop.permute.xlu2 %1000 }
 0x1bc   : > { %1242 = vrot.lane.b32.xlu0 %v3032_v1, %s2585_s23 }
 0x1be   : > { %v1174_v10 = vpop.permute.xlu0 %1173 }
 0x1bf   : > { %v1195_v51 = vsel %vm1055_vm13, %v1174_v10, %v1176_v6 }
 0x1c1   : > { %1246 = vrot.lane.b32.xlu1 %v2303_v52, %s2585_s23  ;;  %v1013_v52 = vsel %vm1012_vm1, %v2940_v4, %v993_v59 }
 0x1c3   : > { %v997_v11 = vpop.permute.xlu1 %996  ;;  %v3093_v33 = vpop.permute.xlu2 %1181 }
 0x1c4   : > { %v3075_v12 = vsel %vm1012_vm1, %v995_v0, %v997_v11  ;;  %v3078_v15 = vsel %vm1012_vm1, %v997_v11, %v999_v8  ;;  %1244 = vrot.lane.b32.xlu0 %v3050_v31, %s2585_s23  ;;  %v3126_v11 = vsel %vm1012_vm1, %v999_v8, %v3082_v21  ;;  %s2184_s23 = sshll.u32 %s324_s13, 6 }
 0x1c5   : > { %1281 = vmatpush.bf16.msra.mxu2 %v3075_v12  ;;  %1309 = vmatpush.bf16.msrb.mxu0 %v3078_v15  ;;  %s3451_s24 = scalar_lea.vmem [#allocation6], %s2184_s23 }
 0x1c6   : > { %v1134_v22 = vpop.permute.xlu0 %1133  ;;  %s2085_s18 = sshll.u32 %s3451_s24, 4  ;;  %s2086_s18 = int_to_ptr.vmem [resolvable:$true] %s2085_s18 }
 0x1c7   : > { %v1153_v35 = vsel %vm1012_vm1, %v1132_v58, %v1134_v22 }
 0x1c9   : > { %1282 = vmatpush.bf16.msra.mxu2 %v2926_v45  ;;  %1310 = vmatpush.bf16.msrb.mxu0 %v2953_v13 }
 0x1cb   : > { %v1178_v28 = vpop.permute.xlu1 %1177  ;;  %v3100_v44 = vpop.permute.xlu2 %1139 }
 0x1cc   : > { %v1196_v23 = vsel %vm1055_vm13, %v1176_v6, %v1178_v28  ;;  %1265 = vperm.xlu0 %2460, %v1257_v27   ;;  %v1014_v6 = vsel %vm1012_vm1, %v993_v59, %v995_v0 }
 0x1cd   : > { %1283 = vmatpush.bf16.msra.mxu2 %v1195_v51  ;;  %1311 = vmatpush.bf16.msrb.mxu0 %v1196_v23 }
 0x1ce   : > { %v1036_v26 = vpop.permute.xlu0 %1035 }
 0x1cf   : > { %v1056_v41 = vsel %vm1055_vm13, %v2924_v48, %v1036_v26  ;;  %v2306_v48 = vld [vmem:[%s3534_s3] sm:$0xf] }
 0x1d1   : > { %1284 = vmatpush.bf16.msra.mxu2 %v1153_v35 }
 0x1d3   : > { %v1136_v36 = vpop.permute.xlu1 %1135 }
 0x1d4   : > { %v1154_v38 = vsel %vm1012_vm1, %v1134_v22, %v1136_v36  ;;  %v3130_v22 = vpop.permute.xlu2 %1141 }
 0x1d5   : > { %1285 = vmatpush.bf16.msra.mxu2 %v2928_v53  ;;  %1312 = vmatpush.bf16.msrb.mxu0 %v1154_v38  ;;  %v2365_v53 = vld [vmem:[%s3534_s3 + $0x4] sm:$0xf] }
 0x1d6   : > { %v1038_v40 = vpop.permute.xlu0 %1037  ;;  %v3119_v2 = vor.u32 %v2365_v53, %v2308_v49 }
 0x1d7   : > { %v1057_v58 = vsel %vm1055_vm13, %v1036_v26, %v1038_v40 }
 0x1d9   : > { %1286 = vmatpush.bf16.msra.mxu2 %v1056_v41  ;;  %1313 = vmatpush.bf16.msrb.mxu0 %v2930_v55  ;;  %v2366_v55 = vld [vmem:[%s3534_s3 + $0x4] sm:$0xf0] }
 0x1da   : > { %v3122_v10 = vor.u32 %v2366_v55, %v2306_v48 }
 0x1db   : > { %v1180_v50 = vpop.permute.xlu1 %1179 }
 0x1dc   : > { %v1007_v51 = vpop.permute.xlu2 %1006 }
 0x1dd   : > { %1287 = vmatpush.bf16.msra.mxu2 %v1013_v52  ;;  %1314 = vmatpush.bf16.msrb.mxu0 %v1057_v58 }
 0x1de   : > { %v1040_v4 = vpop.permute.xlu0 %1039 }
 0x1df   : > { %v1058_v60 = vsel %vm1055_vm13, %v1038_v40, %v1040_v4  ;;  %v1198_v40 = vsel %vm1055_vm13, %v1180_v50, %v3093_v33 }
 0x1e0   : > { %1302 = vmatpush.bf16.msra.mxu3 %v1058_v60 }
 0x1e1   : > { %1288 = vmatpush.bf16.msra.mxu2 %v2882_v16  ;;  %1315 = vmatpush.bf16.msrb.mxu0 %v1014_v6  ;;  %v1197_v16 = vsel %vm1055_vm13, %v1178_v28, %v1180_v50  ;;  %v1256_v28 = vld [vmem:[%s3535_s4] sm:$0xff] }
 0x1e2   : > { %1260 = vperm.xlu2 %2461, %v1256_v28  }
 0x1e3   : > { %v1138_v27 = vpop.permute.xlu1 %1137  ;;  %2312 = vmatmul.msk.bf16.vlgmr.msra.gmra.mxu3 %vm1277_vm14, %v3119_v2 }
 0x1e4   : > { %1337 = vmatpush.bf16.msrb.mxu3 %v3126_v11  ;;  %1289 = vmatmul.bf16.vlgmr.msra.gmra.mxu2 %v3122_v10  ;;  %v1155_v23 = vsel %vm1012_vm1, %v1136_v36, %v1138_v27  ;;  %v1188_v38 = vpop.permute.xlu2 %1187 }
 0x1e5   : > { %1316 = vmatpush.bf16.msrb.mxu0 %v2942_v5 }
 0x1e6   : > { %v1042_v59 = vpop.permute.xlu0 %1041 }
 0x1e7   : > { %v1059_v0 = vsel %vm1055_vm13, %v1040_v4, %v1042_v59 }
 0x1e8   : > { %1338 = vmatpush.bf16.msrb.mxu3 %v2957_v20  ;;  %1317 = vmatmul.bf16.vlgmr.msrb.gmra.mxu0 %v3122_v10 }
 0x1e9   : > { %1330 = vmatpush.bf16.msrb.mxu1 %v1059_v0 }
 0x1eb   : > { %v1046_v8 = vpop.permute.xlu1 %1045 }
 0x1ec   : > { %1339 = vmatpush.bf16.msrb.mxu3 %v1197_v16  ;;  %2313 = vmatmul.msk.bf16.vlgmr.msrb.gmra.mxu1 %vm1277_vm14, %v3119_v2  ;;  %v3162_v53 = vpop.permute.xlu2 %1008 }
 0x1ee   : > { %v1003_v5 = vpop.permute.xlu0 %1002 }
 0x1ef   : > { %v3145_v26 = vsel %vm1012_vm1, %v3082_v21, %v1003_v5 }
 0x1f0   : > { %1340 = vmatpush.bf16.msrb.mxu3 %v1155_v23  ;;  %1365 = vmatpush.bf16.msrb.mxu2 %v3145_v26 }
 0x1f3   : > { %v1005_v35 = vpop.permute.xlu1 %1004 }
 0x1f4   : > { %1341 = vmatpush.bf16.msrb.mxu3 %v2965_v29  ;;  %1366 = vmatpush.bf16.msrb.mxu2 %v2978_v43  ;;  %v1156_v29 = vsel %vm1012_vm1, %v1138_v27, %v3100_v44  ;;  %v3165_v50 = vsel %vm1012_vm1, %v1003_v5, %v1005_v35  ;;  %v1050_v55 = vpop.permute.xlu2 %1049  ;;  %v3190_v27 = vsel %vm1012_vm1, %v1007_v51, %v3162_v53 }
 0x1f6   : > { %v1184_v36 = vpop.permute.xlu0 %1183 }
 0x1f7   : > { %v1199_v49 = vsel %vm1055_vm13, %v3093_v33, %v1184_v36 }
 0x1f8   : > { %1342 = vmatpush.bf16.msrb.mxu3 %v1058_v60  ;;  %1367 = vmatpush.bf16.msrb.mxu2 %v1198_v40 }
 0x1fb   : > { %v1186_v21 = vpop.permute.xlu1 %1185 }
 0x1fc   : > { %1343 = vmatpush.bf16.msrb.mxu3 %v3075_v12  ;;  %1368 = vmatpush.bf16.msrb.mxu2 %v1156_v29  ;;  %v3168_v12 = vsel %vm1012_vm1, %v1005_v35, %v1007_v51  ;;  %v1200_v48 = vsel %vm1055_vm13, %v1184_v36, %v1186_v21  ;;  %v1233_v23 = vpop.permute.xlu2 %1232 }
 0x1fe   : > { %v1044_v41 = vpop.permute.xlu0 %1043 }
 0x1ff   : > { %v1060_v52 = vsel %vm1055_vm13, %v1042_v59, %v1044_v41  ;;  %v1061_v58 = vsel %vm1055_vm13, %v1044_v41, %v1046_v8 }
 0x200   : > { %1344 = vmatpush.bf16.msrb.mxu3 %v2926_v45  ;;  %1358 = vmatpush.bf16.msra.mxu1 %v1060_v52 }
 0x201   : > { %1369 = vmatpush.bf16.msrb.mxu2 %v2986_v46  ;;  %1386 = vmatpush.bf16.msra.mxu0 %v1061_v58 }
 0x203   : > { %1345 = vmatmul.bf16.vlgmr.msrb.gmra.mxu3 %v3122_v10  ;;  %v3173_v45 = vpop.permute.xlu1 %1230  ;;  %2314 = vmatmul.msk.bf16.vlgmr.msra.gmra.mxu1 %vm1277_vm14, %v3119_v2 }
 0x204   : > { %1393 = vmatpush.bf16.msrb.mxu1 %v3165_v50  ;;  %2315 = vmatmul.msk.bf16.vlgmr.msra.gmra.mxu0 %vm1277_vm14, %v3119_v2  ;;  %v1194_v36 = vpop.permute.xlu2 %1193 }
 0x205   : > { %1421 = vmatpush.bf16.msrb.mxu0 %v3168_v12  ;;  %1370 = vmatpush.bf16.msrb.mxu2 %v1059_v0 }
 0x206   : > { %v1144_v46 = vpop.permute.xlu0 %1143 }
 0x207   : > { %v1158_v33 = vsel %vm1012_vm1, %v3130_v22, %v1144_v46 }
 0x208   : > { %1394 = vmatpush.bf16.msrb.mxu1 %v3002_v62 }
 0x209   : > { %1422 = vmatpush.bf16.msrb.mxu0 %v3012_v9  ;;  %1371 = vmatpush.bf16.msrb.mxu2 %v3078_v15  ;;  %v1157_v15 = vsel %vm1012_vm1, %v3100_v44, %v3130_v22  ;;  %v1201_v22 = vsel %vm1055_vm13, %v1186_v21, %v1188_v38 }
 0x20b   : > { %v1048_v4 = vpop.permute.xlu1 %1047 }
 0x20c   : > { %1395 = vmatpush.bf16.msrb.mxu1 %v1199_v49  ;;  %v1062_v60 = vsel %vm1055_vm13, %v1046_v8, %v1048_v4  ;;  %v1063_v6 = vsel %vm1055_vm13, %v1048_v4, %v1050_v55  ;;  %v1152_v29 = vpop.permute.xlu2 %1151 }
 0x20d   : > { %1423 = vmatpush.bf16.msrb.mxu0 %v1200_v48  ;;  %1372 = vmatpush.bf16.msrb.mxu2 %v2953_v13  ;;  %v1236_v13 = vsel %vm1012_vm1, %v3162_v53, %v3173_v45 }
 0x20e   : > { %1414 = vmatpush.bf16.msra.mxu3 %v1062_v60  ;;  %v1146_v59 = vpop.permute.xlu0 %1145 }
 0x20f   : > { %v1159_v8 = vsel %vm1012_vm1, %v1144_v46, %v1146_v59 }
 0x210   : > { %1396 = vmatpush.bf16.msrb.mxu1 %v1157_v15  ;;  %1373 = vmatmul.bf16.vlgmr.msrb.gmra.mxu2 %v3122_v10 }
 0x211   : > { %1442 = vmatpush.bf16.msra.mxu2 %v1063_v6  ;;  %1424 = vmatpush.bf16.msrb.mxu0 %v1158_v33 }
 0x212   : > { %1449 = vmatpush.bf16.msrb.mxu3 %v3190_v27 }
 0x213   : > { %2316 = vmatmul.msk.bf16.vlgmr.msra.gmra.mxu3 %vm1277_vm14, %v3119_v2  ;;  %v1148_v44 = vpop.permute.xlu1 %1147 }
 0x214   : > { %1397 = vmatpush.bf16.msrb.mxu1 %v2988_v56 }
 0x215   : > { %1477 = vmatpush.bf16.msrb.mxu2 %v1236_v13  ;;  %1425 = vmatpush.bf16.msrb.mxu0 %v3004_v63  ;;  %v1160_v63 = vsel %vm1012_vm1, %v1146_v59, %v1148_v44 }
 0x216   : > { %1450 = vmatpush.bf16.msrb.mxu3 %v3014_v54  ;;  %v1190_v0 = vpop.permute.xlu0 %1189 }
 0x217   : > { %v1202_v16 = vsel %vm1055_vm13, %v1188_v38, %v1190_v0 }
 0x218   : > { %1398 = vmatpush.bf16.msrb.mxu1 %v1060_v52  ;;  %v1011_v52 = vpop.permute.xlu2 %1010 }
 0x219   : > { %1478 = vmatpush.bf16.msrb.mxu2 %v3034_v30  ;;  %1426 = vmatpush.bf16.msrb.mxu0 %v1061_v58 }
 0x21a   : > { %1451 = vmatpush.bf16.msrb.mxu3 %v1201_v22 }
 0x21b   : > { %v1192_v56 = vpop.permute.xlu1 %1191 }
 0x21c   : > { %1399 = vmatpush.bf16.msrb.mxu1 %v3126_v11  ;;  %v1203_v28 = vsel %vm1055_vm13, %v1190_v0, %v1192_v56  ;;  %v1204_v21 = vsel %vm1055_vm13, %v1192_v56, %v1194_v36 }
 0x21d   : > { %1479 = vmatpush.bf16.msrb.mxu2 %v1202_v16  ;;  %1427 = vmatpush.bf16.msrb.mxu0 %v3145_v26 }
 0x21e   : > { %1452 = vmatpush.bf16.msrb.mxu3 %v1159_v8  ;;  %v1235_v51 = vpop.permute.xlu0 %1234 }
 0x21f   : > { %v1238_v35 = vsel %vm1012_vm1, %v1233_v23, %v1235_v51  ;;  %v3276_v51 = vld [vmem:[%s3536_s5] sm:$0xf] }
 0x220   : > { %1400 = vmatpush.bf16.msrb.mxu1 %v2957_v20  ;;  %2317 = vmatmul.msk.bf16.vlgmr.msra.gmra.mxu2 %vm1277_vm14, %v3119_v2 }
 0x221   : > { %1480 = vmatpush.bf16.msrb.mxu2 %v1160_v63  ;;  %1428 = vmatpush.bf16.msrb.mxu0 %v2978_v43  ;;  %v1237_v43 = vsel %vm1012_vm1, %v3173_v45, %v1233_v23 }
 0x222   : > { %1453 = vmatpush.bf16.msrb.mxu3 %v3022_v18 }
 0x223   : > { %1401 = vmatmul.bf16.vlgmr.msrb.gmra.mxu1 %v3122_v10  ;;  %v1150_v11 = vpop.permute.xlu1 %1149 }
 0x224   : > { %1429 = vmatmul.bf16.vlgmr.msrb.gmra.mxu0 %v3122_v10  ;;  %v1162_v41 = vsel %vm1012_vm1, %v1150_v11, %v1152_v29 }
 0x225   : > { %1481 = vmatpush.bf16.msrb.mxu2 %v3024_v19 }
 0x226   : > { %1454 = vmatpush.bf16.msrb.mxu3 %v1062_v60  ;;  %v1052_v18 = vpop.permute.xlu0 %1051 }
 0x227   : > { %v1064_v20 = vsel %vm1055_vm13, %v1050_v55, %v1052_v18 }
 0x228   : > { %1470 = vmatpush.bf16.msra.mxu1 %v1064_v20 }
 0x229   : > { %1482 = vmatpush.bf16.msrb.mxu2 %v1063_v6 }
 0x22a   : > { %1455 = vmatpush.bf16.msrb.mxu3 %v3165_v50 }
 0x22b   : > { %v1054_v19 = vpop.permute.xlu1 %1053 }
 0x22c   : > { %1505 = vmatpush.bf16.msrb.mxu1 %v1237_v43 }
 0x22d   : > { %1483 = vmatpush.bf16.msrb.mxu2 %v3168_v12 }
 0x22e   : > { %1456 = vmatpush.bf16.msrb.mxu3 %v3002_v62  ;;  %v1243_v5 = vpop.permute.xlu0 %1242  ;;  %v1161_v62 = vsel %vm1012_vm1, %v1148_v44, %v1150_v11 }
 0x22f   : > { %v1248_v26 = vsel %vm1055_vm13, %v1052_v18, %v1243_v5 }
 0x230   : > { %1506 = vmatpush.bf16.msrb.mxu1 %v3032_v1  ;;  %1498 = vmatpush.bf16.msra.mxu0 %v1248_v26 }
 0x231   : > { %1484 = vmatpush.bf16.msrb.mxu2 %v3012_v9  ;;  %1457 = vmatmul.bf16.vlgmr.msrb.gmra.mxu3 %v3122_v10 }
 0x233   : > { %2318 = vmatmul.msk.bf16.vlgmr.msra.gmra.mxu1 %vm1277_vm14, %v3119_v2  ;;  %v1247_v9 = vpop.permute.xlu1 %1246 }
 0x234   : > { %1485 = vmatmul.bf16.vlgmr.msrb.gmra.mxu2 %v3122_v10  ;;  %1507 = vmatpush.bf16.msrb.mxu1 %v1203_v28 }
 0x235   : > { %1533 = vmatpush.bf16.msrb.mxu0 %v1238_v35 }
 0x236   : > { %2319 = vmatmul.msk.bf16.vlgmr.msra.gmra.mxu0 %vm1277_vm14, %v3119_v2  ;;  %v1245_v1 = vpop.permute.xlu0 %1244 }
 0x237   : > { %v1249_v38 = vsel %vm1055_vm13, %v1243_v5, %v1245_v1  ;;  %v1250_v40 = vsel %vm1055_vm13, %v1245_v1, %v1247_v9 }
 0x238   : > { %1508 = vmatpush.bf16.msrb.mxu1 %v1161_v62  ;;  %1526 = vmatpush.bf16.msra.mxu3 %v1249_v38 }
 0x239   : > { %1534 = vmatpush.bf16.msrb.mxu0 %v3050_v31  ;;  %1554 = vmatpush.bf16.msra.mxu2 %v1250_v40  ;;  %v1065_v31 = vsel %vm1055_vm13, %v1052_v18, %v1054_v19 }
 0x23c   : > { %1509 = vmatpush.bf16.msrb.mxu1 %v3048_v34  ;;  %v1022_v34 = vsel %vm1012_vm1, %v3162_v53, %v1011_v52  ;;  %v3259_v58 = vpop.permute.xlu2 %1260  ;;  %v3263_v53 = vstv %s2322_s14 }
 0x23d   : > { %1535 = vmatpush.bf16.msrb.mxu0 %v1204_v21 }
 0x23e   : > { %v3265_v55 = vpop.permute.xlu0 %1265 }
 0x240   : > { %1510 = vmatpush.bf16.msrb.mxu1 %v1064_v20 }
 0x241   : > { %1536 = vmatpush.bf16.msrb.mxu0 %v1162_v41  ;;  %2320 = vmatmul.msk.bf16.vlgmr.msra.gmra.mxu3 %vm1277_vm14, %v3119_v2 }
 0x244   : > { %2321 = vmatmul.msk.bf16.vlgmr.msra.gmra.mxu2 %vm1277_vm14, %v3119_v2  ;;  %1511 = vmatpush.bf16.msrb.mxu1 %v3190_v27 }
 0x245   : > { %1537 = vmatpush.bf16.msrb.mxu0 %v3058_v47 }
 0x248   : > { %1512 = vmatpush.bf16.msrb.mxu1 %v3014_v54 }
 0x249   : > { %1538 = vmatpush.bf16.msrb.mxu0 %v1065_v31  ;;  %v1634_v31 = vld [vmem:[%s3537_s6] sm:$0xff] }
 0x24a   : > { %1637 = vperm.xlu1 %2462, %v1634_v31  }
 0x24b   : > { %1513 = vmatmul.bf16.vlgmr.msrb.gmra.mxu1 %v3122_v10 }
 0x24d   : > { %1539 = vmatpush.bf16.msrb.mxu0 %v1022_v34 }
 0x251   : > { %1540 = vmatpush.bf16.msrb.mxu0 %v3034_v30 }
 0x254   : > { %1541 = vmatmul.bf16.vlgmr.msrb.gmra.mxu0 %v3122_v10 }
 0x265   : > { %v1318_v2 = vpop.f32.mrf.mxu0 }
 0x266   : > { %v1304_v47 = vpop.f32.mrf.mxu3  ;;  %v1319_v12 = vadd.f32 %v1318_v2, %v3259_v58 }
 0x267   : > { %v1290_v50 = vpop.f32.mrf.mxu2 }
 0x268   : > { %v1291_v45 = vadd.f32 %v1290_v50, %v3259_v58 }
 0x269   : > { %v1332_v54 = vpop.f32.mrf.mxu1 }
 0x26a   : > { %v1333_v46 = vadd.f32 %v1332_v54, %v1319_v12  ;;  %v1305_v49 = vadd.f32 %v1304_v47, %v1291_v45 }
 0x26c   : > { %v1584_v60 = vmul.f32 %v3263_v53, %v1333_v46  ;;  %v1583_v27 = vmul.f32 %v3263_v53, %v1305_v49  ;;  %vm1562_vm6 = vcmp.ge.f32.partialorder %v1333_v46, 0.0  ;;  %vm1561_vm8 = vcmp.ge.f32.partialorder %v1305_v49, 0.0 }
 0x26d   : > { %v1320_v48 = vpop.f32.mrf.mxu0 }
 0x26e   : > { %v1321_v30 = vadd.f32 %v1320_v48, %v3265_v55  ;;  %v1306_v4 = vpop.f32.mrf.mxu3  ;;  %v1604_v44 = vsel %vm1562_vm6, %v1333_v46, %v1584_v60  ;;  %v1603_v0 = vsel %vm1561_vm8, %v1305_v49, %v1583_v27 }
 0x26f   : > { %v1292_v10 = vpop.f32.mrf.mxu2 }
 0x270   : > { %v1293_v6 = vadd.f32 %v1292_v10, %v3265_v55 }
 0x271   : > { %v1334_v15 = vpop.f32.mrf.mxu1 }
 0x272   : > { %v1335_v33 = vadd.f32 %v1334_v15, %v1321_v30  ;;  %v1307_v59 = vadd.f32 %v1306_v4, %v1293_v6 }
 0x274   : > { %vm1572_vm15 = vcmp.ge.f32.partialorder %v1335_v33, 0.0  ;;  %v1594_v13 = vmul.f32 %v3263_v53, %v1335_v33  ;;  %vm1571_vm2 = vcmp.ge.f32.partialorder %v1307_v59, 0.0  ;;  %v1593_v22 = vmul.f32 %v3263_v53, %v1307_v59 }
 0x276   : > { %v1614_v16 = vsel %vm1572_vm15, %v1335_v33, %v1594_v13  ;;  %v1613_v8 = vsel %vm1571_vm2, %v1307_v59, %v1593_v22 }
 0x277   : > { %v1625_v56 = vpack.c.bf16 %v1614_v16, %v1604_v44  ;;  %v1624_v63 = vpack.c.bf16 %v1613_v8, %v1603_v0 }
 0x279   : > { %1663 = vmatpush.bf16.msra.mxu1 %v1625_v56  ;;  %1650 = vmatpush.bf16.msrb.mxu3 %v1624_v63 }
 0x27c   : > { %2323 = vmatmul.msk.bf16.vlgmr.msrb.gmra.mxu3 %vm1277_vm14, %v3276_v51  ;;  %2324 = vmatmul.msk.bf16.vlgmr.msra.gmra.mxu1 %vm1277_vm14, %v3276_v51 }
 0x280   : > { %v1360_v11 = vpop.f32.mrf.mxu1 }
 0x281   : > { %v1388_v43 = vpop.f32.mrf.mxu0 }
 0x286   : > { %v1346_v18 = vpop.f32.mrf.mxu3 }
 0x287   : > { %v1347_v23 = vadd.f32 %v1346_v18, %v3259_v58 }
 0x288   : > { %v1362_v5 = vpop.f32.mrf.mxu1 }
 0x289   : > { %v1361_v20 = vadd.f32 %v1360_v11, %v1347_v23  ;;  %v1390_v21 = vpop.f32.mrf.mxu0 }
 0x28b   : > { %v1585_v26 = vmul.f32 %v3263_v53, %v1361_v20  ;;  %vm1563_vm3 = vcmp.ge.f32.partialorder %v1361_v20, 0.0 }
 0x28d   : > { %v1605_v36 = vsel %vm1563_vm3, %v1361_v20, %v1585_v26 }
 0x28e   : > { %v1348_v19 = vpop.f32.mrf.mxu3 }
 0x28f   : > { %v1349_v35 = vadd.f32 %v1348_v19, %v3265_v55 }
 0x291   : > { %v1363_v28 = vadd.f32 %v1362_v5, %v1349_v35 }
 0x293   : > { %vm1573_vm4 = vcmp.ge.f32.partialorder %v1363_v28, 0.0  ;;  %v1595_v62 = vmul.f32 %v3263_v53, %v1363_v28  ;;  %v1374_v9 = vpop.f32.mrf.mxu2 }
 0x294   : > { %v1375_v40 = vadd.f32 %v1374_v9, %v3259_v58 }
 0x295   : > { %v1615_v1 = vsel %vm1573_vm4, %v1363_v28, %v1595_v62 }
 0x296   : > { %v1626_v38 = vpack.c.bf16 %v1615_v1, %v1605_v36  ;;  %v1389_v29 = vadd.f32 %v1388_v43, %v1375_v40  ;;  %v1416_v34 = vpop.f32.mrf.mxu3 }
 0x298   : > { %1676 = vmatpush.bf16.msrb.mxu2 %v1626_v38  ;;  %v1586_v2 = vmul.f32 %v3263_v53, %v1389_v29  ;;  %vm1564_vm5 = vcmp.ge.f32.partialorder %v1389_v29, 0.0 }
 0x29a   : > { %v1606_v45 = vsel %vm1564_vm5, %v1389_v29, %v1586_v2 }
 0x29b   : > { %2325 = vmatmul.msk.bf16.vlgmr.msrb.gmra.mxu2 %vm1277_vm14, %v3276_v51  ;;  %v1376_v41 = vpop.f32.mrf.mxu2 }
 0x29c   : > { %v1377_v52 = vadd.f32 %v1376_v41, %v3265_v55 }
 0x29e   : > { %v1391_v47 = vadd.f32 %v1390_v21, %v1377_v52  ;;  %v1418_v6 = vpop.f32.mrf.mxu3 }
 0x2a0   : > { %v1402_v50 = vpop.f32.mrf.mxu1  ;;  %vm1574_vm7 = vcmp.ge.f32.partialorder %v1391_v47, 0.0  ;;  %v1596_v12 = vmul.f32 %v3263_v53, %v1391_v47 }
 0x2a1   : > { %v1430_v54 = vpop.f32.mrf.mxu0  ;;  %v1403_v49 = vadd.f32 %v1402_v50, %v3259_v58 }
 0x2a2   : > { %v1616_v46 = vsel %vm1574_vm7, %v1391_v47, %v1596_v12  ;;  %v1431_v4 = vadd.f32 %v1430_v54, %v3259_v58 }
 0x2a3   : > { %v1444_v48 = vpop.f32.mrf.mxu2  ;;  %v1627_v30 = vpack.c.bf16 %v1616_v46, %v1606_v45  ;;  %v1417_v10 = vadd.f32 %v1416_v34, %v1403_v49 }
 0x2a4   : > { %v1445_v27 = vadd.f32 %v1444_v48, %v1431_v4 }
 0x2a5   : > { %1689 = vmatpush.bf16.msra.mxu3 %v1627_v30  ;;  %v1587_v59 = vmul.f32 %v3263_v53, %v1417_v10  ;;  %vm1565_vm9 = vcmp.ge.f32.partialorder %v1417_v10, 0.0 }
 0x2a6   : > { %v1588_v0 = vmul.f32 %v3263_v53, %v1445_v27  ;;  %vm1566_vm11 = vcmp.ge.f32.partialorder %v1445_v27, 0.0 }
 0x2a7   : > { %v1607_v56 = vsel %vm1565_vm9, %v1417_v10, %v1587_v59 }
 0x2a8   : > { %v1404_v60 = vpop.f32.mrf.mxu1  ;;  %2326 = vmatmul.msk.bf16.vlgmr.msra.gmra.mxu3 %vm1277_vm14, %v3276_v51  ;;  %v1608_v23 = vsel %vm1566_vm11, %v1445_v27, %v1588_v0 }
 0x2a9   : > { %v1405_v15 = vadd.f32 %v1404_v60, %v3265_v55  ;;  %v1432_v33 = vpop.f32.mrf.mxu0 }
 0x2aa   : > { %v1433_v44 = vadd.f32 %v1432_v33, %v3265_v55 }
 0x2ab   : > { %v1419_v13 = vadd.f32 %v1418_v6, %v1405_v15  ;;  %v1446_v22 = vpop.f32.mrf.mxu2 }
 0x2ac   : > { %v1447_v8 = vadd.f32 %v1446_v22, %v1433_v44 }
 0x2ad   : > { %vm1575_vm10 = vcmp.ge.f32.partialorder %v1419_v13, 0.0  ;;  %v1597_v16 = vmul.f32 %v3263_v53, %v1419_v13 }
 0x2ae   : > { %vm1576_vm12 = vcmp.ge.f32.partialorder %v1447_v8, 0.0  ;;  %v1598_v11 = vmul.f32 %v3263_v53, %v1447_v8 }
 0x2af   : > { %v1617_v63 = vsel %vm1575_vm10, %v1419_v13, %v1597_v16 }
 0x2b0   : > { %v1628_v18 = vpack.c.bf16 %v1617_v63, %v1607_v56  ;;  %v1618_v20 = vsel %vm1576_vm12, %v1447_v8, %v1598_v11  ;;  %v1472_v43 = vpop.f32.mrf.mxu1 }
 0x2b1   : > { %v1629_v19 = vpack.c.bf16 %v1618_v20, %v1608_v23 }
 0x2b2   : > { %1702 = vmatpush.bf16.msra.mxu0 %v1628_v18 }
 0x2b3   : > { %v1500_v26 = vpop.f32.mrf.mxu0  ;;  %1715 = vmatpush.bf16.msrb.mxu1 %v1629_v19 }
 0x2b4   : > { %v1458_v5 = vpop.f32.mrf.mxu3 }
 0x2b5   : > { %v1459_v28 = vadd.f32 %v1458_v5, %v3259_v58  ;;  %2327 = vmatmul.msk.bf16.vlgmr.msra.gmra.mxu0 %vm1277_vm14, %v3276_v51 }
 0x2b6   : > { %2328 = vmatmul.msk.bf16.vlgmr.msrb.gmra.mxu1 %vm1277_vm14, %v3276_v51 }
 0x2b7   : > { %v1486_v35 = vpop.f32.mrf.mxu2  ;;  %v1473_v62 = vadd.f32 %v1472_v43, %v1459_v28 }
 0x2b8   : > { %v1487_v36 = vadd.f32 %v1486_v35, %v3259_v58  ;;  %v1474_v1 = vpop.f32.mrf.mxu1 }
 0x2b9   : > { %v1589_v29 = vmul.f32 %v3263_v53, %v1473_v62  ;;  %vm1567_vm1 = vcmp.ge.f32.partialorder %v1473_v62, 0.0 }
 0x2ba   : > { %v1501_v38 = vadd.f32 %v1500_v26, %v1487_v36  ;;  %v1773_v36 = vunpack.c.l.bf16 %v2766_v61  ;;  %v1774_v61 = vunpack.c.l.bf16 %v2775_v7  ;;  %v1776_v7 = vunpack.c.l.bf16 %v2795_v24 }
 0x2bb   : > { %v1502_v52 = vpop.f32.mrf.mxu0  ;;  %v1609_v50 = vsel %vm1567_vm1, %v1473_v62, %v1589_v29 }
 0x2bc   : > { %v1460_v9 = vpop.f32.mrf.mxu3  ;;  %v1590_v34 = vmul.f32 %v3263_v53, %v1501_v38  ;;  %vm1568_vm6 = vcmp.ge.f32.partialorder %v1501_v38, 0.0  ;;  %v3334_v62 = vpop.permute.xlu1 %1637 }
 0x2bd   : > { %v1461_v40 = vadd.f32 %v1460_v9, %v3265_v55 }
 0x2be   : > { %v1610_v46 = vsel %vm1568_vm6, %v1501_v38, %v1590_v34  ;;  %v3337_v38 = vstv %s2333_s16 }
 0x2bf   : > { %v1488_v21 = vpop.f32.mrf.mxu2  ;;  %v1475_v41 = vadd.f32 %v1474_v1, %v1461_v40 }
 0x2c0   : > { %v1489_v31 = vadd.f32 %v1488_v21, %v3265_v55  ;;  %v1775_v21 = vunpack.c.l.bf16 %v2787_v17 }
 0x2c1   : > { %vm1577_vm13 = vcmp.ge.f32.partialorder %v1475_v41, 0.0  ;;  %v1599_v2 = vmul.f32 %v3263_v53, %v1475_v41 }
 0x2c2   : > { %v1503_v47 = vadd.f32 %v1502_v52, %v1489_v31 }
 0x2c3   : > { %v1619_v12 = vsel %vm1577_vm13, %v1475_v41, %v1599_v2 }
 0x2c4   : > { %vm1578_vm8 = vcmp.ge.f32.partialorder %v1503_v47, 0.0  ;;  %v1600_v54 = vmul.f32 %v3263_v53, %v1503_v47  ;;  %v1630_v45 = vpack.c.bf16 %v1619_v12, %v1609_v50  ;;  %v1528_v30 = vpop.f32.mrf.mxu3 }
 0x2c6   : > { %v1620_v49 = vsel %vm1578_vm8, %v1503_v47, %v1600_v54  ;;  %1728 = vmatpush.bf16.msra.mxu2 %v1630_v45  ;;  %vm2053_vm8 = vcmask 130049  }
 0x2c7   : > { %v1631_v48 = vpack.c.bf16 %v1620_v49, %v1610_v46  ;;  %v1556_v6 = vpop.f32.mrf.mxu2 }
 0x2c8   : > { %v1514_v10 = vpop.f32.mrf.mxu1 }
 0x2c9   : > { %1741 = vmatpush.bf16.msrb.mxu3 %v1631_v48  ;;  %2329 = vmatmul.msk.bf16.vlgmr.msra.gmra.mxu2 %vm1277_vm14, %v3276_v51  ;;  %v1515_v4 = vadd.f32 %v1514_v10, %v3259_v58 }
 0x2cb   : > { %v1529_v60 = vadd.f32 %v1528_v30, %v1515_v4 }
 0x2cc   : > { %2330 = vmatmul.msk.bf16.vlgmr.msrb.gmra.mxu3 %vm1277_vm14, %v3276_v51  ;;  %v1530_v27 = vpop.f32.mrf.mxu3 }
 0x2cd   : > { %v1591_v13 = vmul.f32 %v3263_v53, %v1529_v60  ;;  %vm1569_vm15 = vcmp.ge.f32.partialorder %v1529_v60, 0.0 }
 0x2cf   : > { %v1611_v16 = vsel %vm1569_vm15, %v1529_v60, %v1591_v13  ;;  %v1558_v23 = vpop.f32.mrf.mxu2 }
 0x2d0   : > { %v1516_v15 = vpop.f32.mrf.mxu1 }
 0x2d1   : > { %v1542_v33 = vpop.f32.mrf.mxu0  ;;  %v1517_v59 = vadd.f32 %v1516_v15, %v3265_v55 }
 0x2d2   : > { %v1543_v44 = vadd.f32 %v1542_v33, %v3259_v58 }
 0x2d3   : > { %v1531_v22 = vadd.f32 %v1530_v27, %v1517_v59 }
 0x2d4   : > { %v1557_v8 = vadd.f32 %v1556_v6, %v1543_v44 }
 0x2d5   : > { %vm1579_vm2 = vcmp.ge.f32.partialorder %v1531_v22, 0.0  ;;  %v1601_v0 = vmul.f32 %v3263_v53, %v1531_v22 }
 0x2d6   : > { %v1592_v20 = vmul.f32 %v3263_v53, %v1557_v8  ;;  %vm1570_vm3 = vcmp.ge.f32.partialorder %v1557_v8, 0.0 }
 0x2d7   : > { %v1621_v56 = vsel %vm1579_vm2, %v1531_v22, %v1601_v0 }
 0x2d8   : > { %v1632_v63 = vpack.c.bf16 %v1621_v56, %v1611_v16  ;;  %v1612_v19 = vsel %vm1570_vm3, %v1557_v8, %v1592_v20 }
 0x2d9   : > { %v1544_v11 = vpop.f32.mrf.mxu0 }
 0x2da   : > { %v1545_v18 = vadd.f32 %v1544_v11, %v3265_v55  ;;  %1754 = vmatpush.bf16.msrb.mxu0 %v1632_v63 }
 0x2dc   : > { %v1559_v43 = vadd.f32 %v1558_v23, %v1545_v18 }
 0x2dd   : > { %2331 = vmatmul.msk.bf16.vlgmr.msrb.gmra.mxu0 %vm1277_vm14, %v3276_v51 }
 0x2de   : > { %vm1580_vm4 = vcmp.ge.f32.partialorder %v1559_v43, 0.0  ;;  %v1602_v58 = vmul.f32 %v3263_v53, %v1559_v43 }
 0x2e0   : > { %v1622_v5 = vsel %vm1580_vm4, %v1559_v43, %v1602_v58 }
 0x2e1   : > { %v1633_v26 = vpack.c.bf16 %v1622_v5, %v1612_v19 }
 0x2e3   : > { %1767 = vmatpush.bf16.msra.mxu1 %v1633_v26  ;;  %v1777_v26 = vunpack.c.l.bf16 %v2764_v57  ;;  %v1780_v57 = vunpack.c.l.bf16 %v2807_v32 }
 0x2e6   : > { %2332 = vmatmul.msk.bf16.vlgmr.msra.gmra.mxu1 %vm1277_vm14, %v3276_v51 }
 0x2f9   : > { %v1665_v28 = vpop.f32.mrf.mxu1 }
 0x2fa   : > { %v1666_v31 = vadd.f32 %v1665_v28, %v3334_v62 }
 0x2fc   : > { %v1784_v47 = vadd.f32 %v1774_v61, %v1666_v31 }
 0x2fe   : > { %v1806_v46 = vmul.f32 %v3337_v38, %v1784_v47  ;;  %vm1794_vm7 = vcmp.ge.f32.partialorder %v1784_v47, 0.0 }
 0x2ff   : > { %v1652_v55 = vpop.f32.mrf.mxu3 }
 0x300   : > { %v1653_v53 = vadd.f32 %v1652_v55, %v3334_v62  ;;  %v1816_v30 = vsel %vm1794_vm7, %v1784_v47, %v1806_v46 }
 0x301   : > { %v1667_v1 = vpop.f32.mrf.mxu1  ;;  %v1839_v4 = vrot.slane %v1816_v30, 4 }
 0x302   : > { %v1783_v9 = vadd.f32 %v1773_v36, %v1653_v53  ;;  %v1779_v1 = vunpack.c.l.bf16 %v2797_v25 }
 0x304   : > { %v1805_v40 = vmul.f32 %v3337_v38, %v1783_v9  ;;  %vm1793_vm5 = vcmp.ge.f32.partialorder %v1783_v9, 0.0 }
 0x306   : > { %v1815_v41 = vsel %vm1793_vm5, %v1783_v9, %v1805_v40 }
 0x307   : > { %v1654_v35 = vpop.f32.mrf.mxu3  ;;  %v1827_v34 = vrot.slane %v1815_v41, 4 }
 0x308   : > { %v1778_v35 = vunpack.c.l.bf16 %v2770_v3 }
 0x31e   : > { %v1678_v51 = vpop.f32.mrf.mxu2 }
 0x31f   : > { %v1679_v29 = vadd.f32 %v1678_v51, %v3334_v62 }
 0x321   : > { %v1785_v52 = vadd.f32 %v1775_v21, %v1679_v29 }
 0x323   : > { %vm1795_vm14 = vcmp.ge.f32.partialorder %v1785_v52, 0.0  ;;  %v1807_v2 = vmul.f32 %v3337_v38, %v1785_v52 }
 0x325   : > { %v1817_v50 = vsel %vm1795_vm14, %v1785_v52, %v1807_v2 }
 0x326   : > { %v1825_v12 = vrot.slane %v1817_v50, 4  ;;  %v1828_v54 = vsel %vm355_vm0, %v1817_v50, %v1827_v34  ;;  %v1680_v45 = vpop.f32.mrf.mxu2 }
 0x327   : > { %v1836_v60 = vperm.slane %v1828_v54, %v2732_v14 }
 0x328   : > { %v1826_v17 = vsel %vm355_vm0, %v1825_v12, %v1815_v41 }
 0x329   : > { %v1832_v27 = vperm.slane %v1826_v17, %v2732_v14  ;;  %v1887_v22 = vrot.slane %v1836_v60, 4 }
 0x32b   : > { %v1691_v49 = vpop.f32.mrf.mxu3  ;;  %v1875_v8 = vrot.slane %v1832_v27, 4 }
 0x32c   : > { %v1692_v48 = vadd.f32 %v1691_v49, %v3334_v62 }
 0x32e   : > { %v1786_v10 = vadd.f32 %v1776_v7, %v1692_v48 }
 0x330   : > { %vm1796_vm9 = vcmp.ge.f32.partialorder %v1786_v10, 0.0  ;;  %v1808_v6 = vmul.f32 %v3337_v38, %v1786_v10 }
 0x332   : > { %v1704_v15 = vpop.f32.mrf.mxu0  ;;  %v1818_v33 = vsel %vm1796_vm9, %v1786_v10, %v1808_v6 }
 0x333   : > { %v1837_v59 = vrot.slane %v1818_v33, 4  ;;  %v1840_v13 = vsel %vm355_vm0, %v1818_v33, %v1839_v4  ;;  %v1693_v44 = vpop.f32.mrf.mxu3  ;;  %v1717_v24 = vpop.f32.mrf.mxu1  ;;  %v1705_v5 = vadd.f32 %v1704_v15, %v3334_v62 }
 0x334   : > { %v1848_v0 = vperm.slane %v1840_v13, %v2732_v14  ;;  %v1718_v55 = vadd.f32 %v1717_v24, %v3334_v62  ;;  %v1781_v13 = vunpack.c.l.bf16 %v2815_v39 }
 0x335   : > { %v1838_v16 = vsel %vm355_vm0, %v1837_v59, %v1816_v30  ;;  %v1787_v28 = vadd.f32 %v1777_v26, %v1705_v5 }
 0x336   : > { %v1844_v56 = vperm.slane %v1838_v16, %v2732_v14  ;;  %v1885_v63 = vrot.slane %v1848_v0, 4  ;;  %v3358_v11 = vsel %vm355_vm0, %v1848_v0, %v1887_v22  ;;  %v1788_v36 = vadd.f32 %v1778_v35, %v1718_v55 }
 0x337   : > { %v1809_v53 = vmul.f32 %v3337_v38, %v1787_v28  ;;  %vm1797_vm10 = vcmp.ge.f32.partialorder %v1787_v28, 0.0 }
 0x338   : > { %v1873_v18 = vrot.slane %v1844_v56, 4  ;;  %v1886_v20 = vsel %vm355_vm0, %v1885_v63, %v1836_v60  ;;  %v1876_v43 = vsel %vm355_vm0, %v1844_v56, %v1875_v8  ;;  %v1810_v9 = vmul.f32 %v3337_v38, %v1788_v36 }
 0x339   : > { %vm1798_vm11 = vcmp.ge.f32.partialorder %v1788_v36, 0.0  ;;  %v1819_v21 = vsel %vm1797_vm10, %v1787_v28, %v1809_v53  ;;  %v1892_v4 = vperm.slane %v1886_v20, %v2748_v37  ;;  %v1884_v6 = vperm.slane %v1876_v43, %v2748_v37 }
 0x33a   : > { %v1706_v23 = vpop.f32.mrf.mxu0  ;;  %v1874_v58 = vsel %vm355_vm0, %v1873_v18, %v1832_v27  ;;  %v1820_v41 = vsel %vm1798_vm11, %v1788_v36, %v1810_v9  ;;  %v1851_v31 = vrot.slane %v1819_v21, 4  ;;  %v1782_v28 = vunpack.c.l.bf16 %v2819_v42 }
 0x33b   : > { %v1719_v19 = vpop.f32.mrf.mxu1  ;;  %v1863_v2 = vrot.slane %v1820_v41, 4  ;;  %v1880_v59 = vperm.slane %v1874_v58, %v2748_v37  ;;  %v1931_v0 = vrot.slane %v1892_v4, 4  ;;  %v1927_v23 = vrot.slane %v1884_v6, 4 }
 0x33d   : > { %v1923_v43 = vrot.slane %v1880_v59, 4 }
 0x34c   : > { %v1730_v40 = vpop.f32.mrf.mxu2 }
 0x34d   : > { %v1731_v51 = vadd.f32 %v1730_v40, %v3334_v62 }
 0x34f   : > { %v1743_v29 = vpop.f32.mrf.mxu3  ;;  %v1789_v61 = vadd.f32 %v1779_v1, %v1731_v51  ;;  %v1896_v51 = vperm.slane %v3358_v11, %v2748_v37 }
 0x350   : > { %v1744_v3 = vadd.f32 %v1743_v29, %v3334_v62 }
 0x351   : > { %vm1799_vm12 = vcmp.ge.f32.partialorder %v1789_v61, 0.0  ;;  %v1811_v52 = vmul.f32 %v3337_v38, %v1789_v61 }
 0x352   : > { %v1790_v34 = vadd.f32 %v1780_v57, %v1744_v3 }
 0x353   : > { %v1821_v47 = vsel %vm1799_vm12, %v1789_v61, %v1811_v52 }
 0x354   : > { %vm1800_vm1 = vcmp.ge.f32.partialorder %v1790_v34, 0.0  ;;  %v1812_v25 = vmul.f32 %v3337_v38, %v1790_v34  ;;  %v1849_v50 = vrot.slane %v1821_v47, 4  ;;  %v1852_v12 = vsel %vm355_vm0, %v1821_v47, %v1851_v31  ;;  %v1732_v54 = vpop.f32.mrf.mxu2 }
 0x355   : > { %v1860_v32 = vperm.slane %v1852_v12, %v2732_v14 }
 0x356   : > { %v1822_v45 = vsel %vm1800_vm1, %v1790_v34, %v1812_v25  ;;  %v1850_v17 = vsel %vm355_vm0, %v1849_v50, %v1819_v21 }
 0x357   : > { %v1861_v46 = vrot.slane %v1822_v45, 4  ;;  %v1864_v7 = vsel %vm355_vm0, %v1822_v45, %v1863_v2  ;;  %v1745_v49 = vpop.f32.mrf.mxu3  ;;  %v1856_v48 = vperm.slane %v1850_v17, %v2732_v14  ;;  %v1911_v30 = vrot.slane %v1860_v32, 4 }
 0x358   : > { %v1872_v10 = vperm.slane %v1864_v7, %v2732_v14 }
 0x359   : > { %v1862_v60 = vsel %vm355_vm0, %v1861_v46, %v1820_v41  ;;  %v1899_v33 = vrot.slane %v1856_v48, 4 }
 0x35a   : > { %v1909_v27 = vrot.slane %v1872_v10, 4  ;;  %v1868_v15 = vperm.slane %v1862_v60, %v2732_v14  ;;  %v1912_v44 = vsel %vm355_vm0, %v1872_v10, %v1911_v30  ;;  %v1756_v24 = vpop.f32.mrf.mxu0 }
 0x35b   : > { %v1757_v56 = vadd.f32 %v1756_v24, %v3334_v62  ;;  %v3395_v39 = vperm.slane %v1912_v44, %v2748_v37 }
 0x35c   : > { %v1910_v22 = vsel %vm355_vm0, %v1909_v27, %v1860_v32  ;;  %v1900_v16 = vsel %vm355_vm0, %v1868_v15, %v1899_v33  ;;  %v1897_v8 = vrot.slane %v1868_v15, 4 }
 0x35d   : > { %v1916_v63 = vperm.slane %v1910_v22, %v2748_v37  ;;  %v1908_v18 = vperm.slane %v1900_v16, %v2748_v37  ;;  %v1791_v58 = vadd.f32 %v1781_v13, %v1757_v56  ;;  %v1933_v36 = vrot.slane %v3395_v39, 4 }
 0x35e   : > { %v1898_v20 = vsel %vm355_vm0, %v1897_v8, %v1856_v48  ;;  %v1935_v13 = vrot.slane %v1896_v51, 4 }
 0x35f   : > { %v1932_v19 = vsel %vm355_vm0, %v1916_v63, %v1931_v0  ;;  %v1928_v5 = vsel %vm355_vm0, %v1908_v18, %v1927_v23  ;;  %v1904_v26 = vperm.slane %v1898_v20, %v2748_v37  ;;  %v1813_v55 = vmul.f32 %v3337_v38, %v1791_v58 }
 0x360   : > { %2025 = vrot.lane.b32.xlu0 %v1932_v19, %s2584_s22  ;;  %2017 = vrot.lane.b32.xlu2 %v1928_v5, %s2584_s22  ;;  %vm1801_vm13 = vcmp.ge.f32.partialorder %v1791_v58, 0.0  ;;  %v1925_v53 = vrot.slane %v1908_v18, 4  ;;  %v1929_v57 = vrot.slane %v1916_v63, 4  ;;  %v1934_v41 = vsel %vm355_vm0, %v1933_v36, %v1896_v51 }
 0x361   : > { %v1924_v35 = vsel %vm355_vm0, %v1904_v26, %v1923_v43  ;;  %v1823_v40 = vsel %vm1801_vm13, %v1791_v58, %v1813_v55  ;;  %v1921_v52 = vrot.slane %v1904_v26, 4  ;;  %v1936_v24 = vsel %vm355_vm0, %v3395_v39, %v1935_v13 }
 0x362   : > { %2009 = vrot.lane.b32.xlu1 %v1924_v35, %s2584_s22  ;;  %v1758_v1 = vpop.f32.mrf.mxu0  ;;  %v1926_v61 = vsel %vm355_vm0, %v1925_v53, %v1884_v6  ;;  %v1942_v3 = vperm.slane %v1823_v40, %v2732_v14  ;;  %v1937_v31 = vrot.slane %v1823_v40, 4 }
 0x363   : > { %v1769_v9 = vpop.f32.mrf.mxu1  ;;  %v1922_v45 = vsel %vm355_vm0, %v1921_v52, %v1880_v59 }
 0x364   : > { %v1770_v21 = vadd.f32 %v1769_v9, %v3334_v62  ;;  %v1930_v62 = vsel %vm355_vm0, %v1929_v57, %v1892_v4  ;;  %v1959_v25 = vrot.slane %v1942_v3, 4  ;;  %v1938_v50 = vsel %vm355_vm0, 0.0, %v1937_v31 }
 0x365   : > { %v1946_v7 = vperm.slane %v1938_v50, %v2732_v14 }
 0x366   : > { %v1792_v29 = vadd.f32 %v1782_v28, %v1770_v21 }
 0x367   : > { %v1971_v33 = vrot.slane %v1946_v7, 4 }
 0x368   : > { %2029 = vrot.lane.b32.xlu2 %v1934_v41, %s2584_s22  ;;  %2013 = vrot.lane.b32.xlu0 %v1926_v61, %s2584_s22  ;;  %vm1802_vm6 = vcmp.ge.f32.partialorder %v1792_v29, 0.0  ;;  %v1814_v42 = vmul.f32 %v3337_v38, %v1792_v29 }
 0x36a   : > { %2021 = vrot.lane.b32.xlu1 %v1930_v62, %s2584_s22  ;;  %v1824_v11 = vsel %vm1802_vm6, %v1792_v29, %v1814_v42 }
 0x36b   : > { %v1947_v34 = vrot.slane %v1824_v11, 4  ;;  %v1952_v2 = vperm.slane %v1824_v11, %v2732_v14  ;;  %v1771_v47 = vpop.f32.mrf.mxu1 }
 0x36d   : > { %v1948_v12 = vsel %vm355_vm0, 0.0, %v1947_v34  ;;  %v1960_v54 = vsel %vm355_vm0, %v1952_v2, %v1959_v25  ;;  %v1957_v32 = vrot.slane %v1952_v2, 4 }
 0x36e   : > { %v1956_v38 = vperm.slane %v1948_v12, %v2732_v14  ;;  %v1968_v17 = vperm.slane %v1960_v54, %v2748_v37 }
 0x36f   : > { %v1958_v46 = vsel %vm355_vm0, %v1957_v32, %v1942_v3 }
 0x370   : > { %2005 = vrot.lane.b32.xlu2 %v1922_v45, %s2584_s22  ;;  %v1964_v49 = vperm.slane %v1958_v46, %v2748_v37  ;;  %v1969_v48 = vrot.slane %v1956_v38, 4  ;;  %v1983_v6 = vrot.slane %v1968_v17, 4  ;;  %v1972_v59 = vsel %vm355_vm0, %v1956_v38, %v1971_v33 }
 0x371   : > { %v1980_v44 = vperm.slane %v1972_v59, %v2748_v37 }
 0x372   : > { %2015 = vrot.lane.b32.xlu1 %v1968_v17, %s2584_s22  ;;  %2007 = vrot.lane.b32.xlu0 %v1964_v49, %s2584_s22  ;;  %v1981_v30 = vrot.slane %v1964_v49, 4  ;;  %v1970_v10 = vsel %vm355_vm0, %v1969_v48, %v1946_v7  ;;  %v1984_v15 = vsel %vm355_vm0, 0.0, %v1983_v6 }
 0x373   : > { %v1976_v4 = vperm.slane %v1970_v10, %v2748_v37  ;;  %v1987_v22 = vrot.slane %v1980_v44, 4 }
 0x374   : > { %v1982_v27 = vsel %vm355_vm0, 0.0, %v1981_v30 }
 0x375   : > { %v1985_v60 = vrot.slane %v1976_v4, 4  ;;  %v1988_v0 = vsel %vm355_vm0, 0.0, %v1987_v22 }
 0x377   : > { %v1986_v14 = vsel %vm355_vm0, 0.0, %v1985_v60  ;;  %vm2055_vm0 = vcmask 122880  }
 0x378   : > { %2011 = vrot.lane.b32.xlu2 %v1982_v27, %s2584_s22 }
 0x37a   : > { %2027 = vrot.lane.b32.xlu1 %v1986_v14, %s2584_s22  ;;  %2019 = vrot.lane.b32.xlu0 %v1984_v15, %s2584_s22 }
 0x380   : > { %2023 = vrot.lane.b32.xlu2 %v1976_v4, %s2584_s22 }
 0x382   : > { %2033 = vrot.lane.b32.xlu1 %v1936_v24, %s2584_s22  ;;  %2031 = vrot.lane.b32.xlu0 %v1980_v44, %s2584_s22 }
 0x388   : > { %2035 = vrot.lane.b32.xlu2 %v1988_v0, %s2584_s22  ;;  %s2335_s22 = sshll.u32 %s2564_s9, 4 }
 0x389   : > { %s2082_s25 = sadd.s32 %s2560_s30, %s2335_s22  ;;  %s2072_s30 = scalar_lea.sflag [#allocation4], %s324_s13 }
 0x38a   : > { %s2336_s14 = sshll.u32 %s2082_s25, 3 }
 0x38b   : > { %s2084_s7 = scalar_lea.hbm %s3539_s8, %s2336_s14  ;;  %s2498_s14 = scalar_lea.hbm %s3539_s8, 256 }
 0x38c   : > { %s2087_s16 = sshll.u32 %s2084_s7, 4  ;;  %s2088_s16 = int_to_ptr.hbm [resolvable:$true] %s2087_s16 }
 0x38d   : > { %s2492_s9 = sshra.s32 %s2088_s16, 4  ;;  %s2493_s9 = int_to_ptr.hbm [resolvable:$true] %s2492_s9 }
 0x38e   : > { %s2494_s23 = scalar_lea.hbm %s2493_s9, 64  ;;  %p2499_p6 = scmp.lt.s32.totalorder %s2493_s9, %s3539_s8 }
 0x38f   : > { %p2495_p2 = scmp.ne.s32.totalorder %s2493_s9, %s2494_s23  ;;  %p2500_p7 = scmp.lt.s32.totalorder %s2498_s14, %s2494_s23 }
 0x391   : > { %p2496_p4 = pnand %p2495_p2, %p2686_p3  ;;  %p2501_p9 = por %p2500_p7, %p2499_p6 }
 0x393   : > { %p2497_p5 = pneg %p2496_p4 }
 0x395   : > { %p2502_p10 = pnand %p2501_p9, %p2497_p5 }
 0x3ba   : > { %v2018_v16 = vpop.permute.xlu2 %2017 }
 0x3bb   : > { %2061 = vst.msk [vmem:[%s3451_s24 + $0x17] sm:$0xfe] %vm2053_vm8, %v2018_v16 }
 0x3c2   : > { %v2030_v37 = vpop.permute.xlu2 %2029 }
 0x3c3   : > { %2067 = vst.msk [vmem:[%s3451_s24 + $0x2f] sm:$0xfe] %vm2053_vm8, %v2030_v37 }
 0x3ca   : > { %v2006_v8 = vpop.permute.xlu2 %2005 }
 0x3cb   : > { %2054 = vst.msk [vmem:[%s3451_s24 - $0x1] sm:$0xfe] %vm2053_vm8, %v2006_v8 }
 0x3d2   : > { %v2026_v56 = vpop.permute.xlu0 %2025  ;;  %v2012_v63 = vpop.permute.xlu2 %2011 }
 0x3d3   : > { %2065 = vst.msk [vmem:[%s3451_s24 + $0x27] sm:$0xfe] %vm2053_vm8, %v2026_v56 }
 0x3d4   : > { %2058 = vst.msk [vmem:[%s3451_s24 + $0xf] sm:$0x1] %vm2055_vm0, %v2012_v63  ;;  %v2010_v18 = vpop.permute.xlu1 %2009 }
 0x3d5   : > { %2057 = vst.msk [vmem:[%s3451_s24 + $0x7] sm:$0xfe] %vm2053_vm8, %v2010_v18 }
 0x3da   : > { %v2014_v23 = vpop.permute.xlu0 %2013  ;;  %v2024_v20 = vpop.permute.xlu2 %2023 }
 0x3db   : > { %2059 = vst.msk [vmem:[%s3451_s24 + $0xf] sm:$0xfe] %vm2053_vm8, %v2014_v23 }
 0x3dc   : > { %2064 = vst.msk [vmem:[%s3451_s24 + $0x27] sm:$0x1] %vm2055_vm0, %v2024_v20  ;;  %v2022_v43 = vpop.permute.xlu1 %2021 }
 0x3dd   : > { %2063 = vst.msk [vmem:[%s3451_s24 + $0x1f] sm:$0xfe] %vm2053_vm8, %v2022_v43 }
 0x3e2   : > { %v2036_v39 = vpop.permute.xlu2 %2035 }
 0x3e3   : > { %2070 = vst.msk [vmem:[%s3451_s24 + $0x3f] sm:$0x1] %vm2055_vm0, %v2036_v39 }
 0x3e4   : > { %v2016_v58 = vpop.permute.xlu1 %2015  ;;  %v2008_v19 = vpop.permute.xlu0 %2007 }
 0x3e5   : > { %2060 = vst.msk [vmem:[%s3451_s24 + $0x17] sm:$0x1] %vm2055_vm0, %v2016_v58 }
 0x3e6   : > { %2056 = vst.msk [vmem:[%s3451_s24 + $0x7] sm:$0x1] %vm2055_vm0, %v2008_v19 }
 0x3ec   : > { %v2028_v5 = vpop.permute.xlu1 %2027  ;;  %v2020_v26 = vpop.permute.xlu0 %2019 }
 0x3ed   : > { %2066 = vst.msk [vmem:[%s3451_s24 + $0x2f] sm:$0x1] %vm2055_vm0, %v2028_v5 }
 0x3ee   : > { %2062 = vst.msk [vmem:[%s3451_s24 + $0x1f] sm:$0x1] %vm2055_vm0, %v2020_v26 }
 0x3f4   : > { %v2034_v55 = vpop.permute.xlu1 %2033  ;;  %v2032_v35 = vpop.permute.xlu0 %2031 }
 0x3f5   : > { %2069 = vst.msk [vmem:[%s3451_s24 + $0x37] sm:$0xfe] %vm2053_vm8, %v2034_v55 }
 0x3f6   : > { %2068 = vst.msk [vmem:[%s3451_s24 + $0x37] sm:$0x1] %vm2055_vm0, %v2032_v35 }
 0x3f7   : > { %2505 = shalt.err (!%p2502_p10)
}
 0x3f8   : > { %s2586_s13 = smov 128   ;;  %s2587_s24 = smov 256  }
 0x3f9   : > { %s2588_s7 = smov 8  }
 0x3fa   : > { %2372 = dma.vmem_to_hbm [thread:$0]  (%p2686_p3), %s2086_s18, 1024, %s2088_s16, %s2072_s30, %s2586_s13, %s2587_s24, %s2588_s7  }
 0x3fb PF: > { %p2384_p11 = scmp.ge.s32.totalorder %s2576_s12, 2  ;;  %s2102_s22 = sand.u32 1, %s2548_s27  }
 0x3fc   : > { %s2103_s9 = scalar_lea.sflag [#allocation4], %s2102_s22 }
 0x3fd   : > { %p2379_p12 = pnand %p2384_p11, %p2695_p8 }
 0x3ff   : > { %p2380_p13 = pneg %p2379_p12 }
 0x401   : > { %2543 = dma.done.wait (%p2380_p13), %s2103_s9, 1024  }
 0x402   : > { %2545 = vsyncadd (%p2380_p13), %s2103_s9, 4294966272  ;;  %s22_s12 = sadd.s32 1, %s2576_s12   ;;  %s3546_s19 = sld [smem:[#allocation9_spill]] }
 0x403   : > { %p19_p0 = scmp.ge.s32.totalorder %s22_s12, 6   ;;  %s3547_s27 = smov %s2552_s28 }
 0x404   : > { %s3548_s28 = smov %s2556_s29  ;;  %s3549_s29 = smov %s2706_s26 }
 0x405   : > { %s3550_s30 = smov %s2568_s10  ;;  %s3551_s9 = smov %s2572_s11 }
 0x406   : > { %s3552_s10 = smov %s3555_s15  ;;  %21 = sbr.rel (!%p19_p0) target bundleno = 8 (0x8), region = 93 }
 0x408   : > { %s3553_s11 = smov %s3546_s19 }
 0x40b   :  { %2109 = vsyncpa [#allocation4], 1 }
 0x40c   :  { %2111 = vsyncpa [#allocation4 + $0x1], 1 }
 0x40d   :  { %2112 = vsyncpa [#allocation5], 1 }
 0x40e   :  { %2114 = vsyncpa [#allocation5 + $0x1], 1 }

// kernel: tpu_custom_call.1
= control target key start
LH: loop header
LB: loop body
LE: loop exit
PB: predicated region body
PF: predicated region fallthrough
CT: control target
= control target key end

     0   :  { %s3531_s0 = inlined_call_operand.vmem [shape: bf16[2,8,18,128], index: 0, kind: input, shape index: {}]   ;;  %s3532_s1 = inlined_call_operand.vmem [shape: bf16[16,8], index: 1, kind: input, shape index: {}]   ;;  %s3533_s2 = inlined_call_operand.vmem [shape: f32[16,1], index: 2, kind: input, shape index: {}]   ;;  %s3534_s3 = inlined_call_operand.vmem [shape: bf16[16,144], index: 3, kind: input, shape index: {}]   ;;  %s3535_s4 = inlined_call_operand.vmem [shape: f32[16,1], index: 4, kind: input, shape index: {}]   ;;  %s3536_s5 = inlined_call_operand.vmem [shape: bf16[8,16], index: 5, kind: input, shape index: {}]   ;;  %s3537_s6 = inlined_call_operand.vmem [shape: f32[8,1], index: 6, kind: input, shape index: {}]   ;;  %s3538_s7 = inlined_call_operand.vmem [shape: f32[3], index: 7, kind: input, shape index: {}]   ;;  %s3539_s8 = inlined_call_operand.hbm [shape: f32[2,8,16,16], index: 8, kind: output, shape index: {}]  }
   0x1   :  { %3541 = sst [smem:[#allocation10_spill]] %s3538_s7 }
   0x2   :  { %13 = vsyncpa [#allocation5], 0 }
   0x3   :  { %14 = vsyncpa [#allocation4], 0 }
   0x4   :  { %16 = vsyncpa [#allocation4 + $0x1], 0  ;;  %s2634_s27 = smov 0   ;;  %s2636_s28 = smov 0  }
   0x5   :  { %s2638_s29 = smov 0   ;;  %s2640_s30 = smov 0  }
   0x6   :  { %s2642_s9 = smov 0   ;;  %s2644_s10 = smov 0  }
   0x7   :  { %s2646_s11 = smov 0   ;;  %s2648_s12 = smov 0  }
   0x8 LB: > { %s2177_s13 = sadd.s32 4294967295, %s2576_s12   ;;  %s2178_s14 = sadd.s32 4294967294, %s2576_s12   ;;  %s2576_s12 = sphi %s2648_s12, %s22_s12   ;;  %s2572_s11 = sphi %s2646_s11, %s3553_s11   ;;  %s2568_s10 = sphi %s2644_s10, %s3552_s10   ;;  %s2564_s9 = sphi %s2642_s9, %s3551_s9   ;;  %s2560_s30 = sphi %s2640_s30, %s3550_s30   ;;  %s2556_s29 = sphi %s2638_s29, %s3549_s29   ;;  %s2552_s28 = sphi %s2636_s28, %s3548_s28   ;;  %s2548_s27 = sphi %s2634_s27, %s3547_s27  }
   0x9   : > { %s31_s15 = sadd.s32 1, %s2568_s10  ;;  %s34_s16 = sadd.s32 1, %s2572_s11 }
   0xa   : > { %p32_p0 = scmp.ge.s32.totalorder %s31_s15, 2  ;;  %s216_s17 = sadd.s32 1, %s2556_s29 }
   0xb   : > { %p226_p1 = scmp.ne.s32.totalorder %s2556_s29, %s2552_s28  ;;  %p227_p2 = scmp.eq.s32.totalorder %s2177_s13, 3 }
   0xc   : > { %s3555_s15 = smov (%p32_p0, %s31_s15), 0  ;;  %s3557_s16 = smov (!%p32_p0, %s34_s16), %s2572_s11 }
   0xd   : > { %s212_s18 = ssub.s32 %s2568_s10, %s3555_s15  ;;  %p2686_p3 = por %p227_p2, %p226_p1 }
   0xe   : > { %p36_p4 = scmp.ge.s32.totalorder %s3557_s16, 2  ;;  %p232_p5 = scmp.ne.s32.totalorder %s2552_s28, %s2548_s27 }
   0xf   : > { %p233_p6 = scmp.eq.s32.totalorder %s2178_s14, 3  ;;  %p2179_p7 = scmp.ge.s32.totalorder %s2576_s12, 1 }
  0x10   : > { %s3559_s16 = smov (%p36_p4, %s3557_s16), 0  ;;  %p240_p9 = scmp.lt.s32.totalorder %s2576_s12, 5 }
  0x11   : > { %3543 = sst [smem:[#allocation9_spill]] %s3559_s16  ;;  %p2695_p8 = por %p233_p6, %p232_p5 }
  0x12   : > { %s211_s21 = ssub.s32 %s2572_s11, %s3559_s16  ;;  %p241_p10 = pnand %p2179_p7, %p240_p9 }
  0x13   : > { %s213_s22 = sor.u32 %s212_s18, %s211_s21  ;;  %p2382_p12 = scmp.eq.s32.totalorder %s2177_s13, 0 }
  0x14   : > { %p214_p11 = scmp.eq.s32.totalorder %s213_s22, 0  ;;  %p2374_p13 = pneg %p241_p10 }
  0x15   : > { %s3545_s7 = sld [smem:[#allocation10_spill]]  ;;  %s2578_s14 = smov [#allocation3]  }
  0x16   : > { %s2706_s26 = scalar_select %p214_p11, %s2556_s29, %s216_s17  }
  0x17   : > { %p2375_p0 = pnand %p2382_p12, %p2374_p13 }
  0x18   : > { %291 = sbr.rel (%p241_p10) target bundleno = 1019 (0x3fb), region = 52 }
  0x1b   : > { %s270_s25 = sshll.u32 %s3545_s7, 4  ;;  %s271_s25 = int_to_ptr.vmem [resolvable:$true] %s270_s25 }
  0x1c   : > { %2377 = dma.vmem_to_smem (!%p2375_p0), %s271_s25, 16, %s2578_s14, [#allocation5]  }
  0x1d   : > { %2539 = dma.done.wait (%p2382_p12), [#allocation5], 16  }
  0x1e   : > { %2541 = vsyncadd (%p2382_p12), [#allocation5], 4294967280 }
  0x1f   : > { %298 = sfence }
  0x20   : > { %p327_p1 = scmp.lt.s32.totalorder %s2564_s9, 1  ;;  %s2186_s13 = sshll.u32 %s2560_s30, 3  ;;  %v2579_v0 = vmov 0   ;;  %v489_v1 = vld [vmem:[%s3533_s2] sm:$0xff]  ;;  %v2580_v2 = vmov 1983009808  }
  0x21   : > { %s334_s18 = sshra.s32 %s2186_s13, 3  ;;  %2460 = vset.pattern.permute.xlu0 %v2579_v0  ;;  %2461 = vset.pattern.permute.xlu2 %v2579_v0  ;;  %v358_v3 = vunpack.c.l.s4 %v2580_v2  ;;  %vm355_vm0 = vcmask 1047556   ;;  %v490_v4 = vld [vmem:[%s3533_s2 + $0x8] sm:$0xff]  ;;  %v2581_v17 = vmov 1934713408   ;;  %vm510_vm1 = vcmask 1043456  }
  0x22   : > { %s328_s21 = scalar_select %p327_p1, %s2564_s9, 1  ;;  %493 = vperm.xlu0 %2460, %v489_v1   ;;  %2462 = vset.pattern.permute.xlu1 %v2579_v0  ;;  %v372_v18 = vunpack.c.l.s4 %v2581_v17  ;;  %vm506_vm2 = vcmask 64512  }
  0x23   : > { %s2187_s24 = sshll.u32 %s334_s18, 2  ;;  %v2732_v14 = vunpack.c.0.s8 %v358_v3  ;;  %s2584_s22 = smov 127  }
  0x24   : > { %s2367_s23 = smul.u32 96, %s328_s21  ;;  %v2748_v37 = vunpack.c.0.s8 %v372_v18  ;;  %s2322_s14 = sld [smem:[#allocation3 + $0x1]] }
  0x26   : > { %s331_s7 = scalar_lea.vmem %s3531_s0, %s2367_s23  ;;  %s2585_s23 = smov 126  }
  0x27   : > { %s2719_s16 = scalar_lea.vmem %s331_s7, %s2187_s24 }
  0x28   : > { %v338_v5 = vld [vmem:[%s2719_s16] sm:$0xf]  ;;  %v340_v6 = vld [vmem:[%s2719_s16 + $0xc] sm:$0xf]  ;;  %v342_v7 = vld [vmem:[%s2719_s16 + $0x18] sm:$0xf] }
  0x29   : > { %v344_v8 = vld [vmem:[%s2719_s16 + $0x24] sm:$0xf]  ;;  %v346_v9 = vld [vmem:[%s2719_s16 + $0x30] sm:$0xf]  ;;  %v348_v10 = vld [vmem:[%s2719_s16 + $0x3c] sm:$0xf] }
  0x2a   : > { %v350_v11 = vld [vmem:[%s2719_s16 + $0x48] sm:$0xf]  ;;  %v352_v12 = vld [vmem:[%s2719_s16 + $0x54] sm:$0xf]  ;;  %v354_v13 = vrot.slane %v346_v9, 4  ;;  %v383_v15 = vrot.slane %v348_v10, 4  ;;  %498 = vperm.xlu0 %2460, %v490_v4  }
  0x2b   : > { %v361_v16 = vrot.slane %v350_v11, 4  ;;  %v389_v19 = vrot.slane %v352_v12, 4  ;;  %v351_v20 = vld [vmem:[%s2719_s16 + $0x4c] sm:$0x1]  ;;  %v353_v21 = vld [vmem:[%s2719_s16 + $0x58] sm:$0x1] }
  0x2c   : > { %v356_v22 = vsel %vm355_vm0, %v354_v13, %v338_v5  ;;  %v384_v23 = vsel %vm355_vm0, %v383_v15, %v340_v6  ;;  %v417_v24 = vrot.slane %v351_v20, 4  ;;  %v435_v25 = vrot.slane %v353_v21, 4  ;;  %v343_v30 = vld [vmem:[%s2719_s16 + $0x1c] sm:$0x1]  ;;  %v347_v31 = vld [vmem:[%s2719_s16 + $0x34] sm:$0x1] }
  0x2d   : > { %v360_v26 = vperm.slane %v356_v22, %v2732_v14  ;;  %v362_v27 = vsel %vm355_vm0, %v361_v16, %v342_v7  ;;  %v388_v28 = vperm.slane %v384_v23, %v2732_v14  ;;  %v390_v29 = vsel %vm355_vm0, %v389_v19, %v344_v8  ;;  %v345_v34 = vld [vmem:[%s2719_s16 + $0x28] sm:$0x1]  ;;  %v339_v40 = vld [vmem:[%s2719_s16 + $0x4] sm:$0x1]  ;;  %v349_v43 = vld [vmem:[%s2719_s16 + $0x40] sm:$0x1] }
  0x2e   : > { %v366_v32 = vperm.slane %v362_v27, %v2732_v14  ;;  %v394_v33 = vperm.slane %v390_v29, %v2732_v14  ;;  %v411_v35 = vrot.slane %v347_v31, 4  ;;  %v418_v36 = vsel %vm355_vm0, %v417_v24, %v343_v30  ;;  %v341_v4 = vld [vmem:[%s2719_s16 + $0x10] sm:$0x1]  ;;  %v2339_v8 = vld [vmem:[%s3532_s1] sm:$0xff]  ;;  %s701_s16 = sld [smem:[#allocation3]] }
  0x2f   : > { %v369_v38 = vrot.slane %v360_v26, 4  ;;  %v397_v39 = vrot.slane %v388_v28, 4  ;;  %v422_v47 = vperm.slane %v418_v36, %v2732_v14  ;;  %v436_v48 = vsel %vm355_vm0, %v435_v25, %v345_v34 }
  0x30   : > { %v367_v41 = vrot.slane %v366_v32, 4  ;;  %v395_v42 = vrot.slane %v394_v33, 4  ;;  %v412_v44 = vsel %vm355_vm0, %v411_v35, %v339_v40  ;;  %v429_v56 = vrot.slane %v349_v43, 4 }
  0x31   : > { %v370_v45 = vsel %vm355_vm0, %v366_v32, %v369_v38  ;;  %v398_v46 = vsel %vm355_vm0, %v394_v33, %v397_v39  ;;  %v416_v55 = vperm.slane %v412_v44, %v2732_v14  ;;  %v423_v5 = vrot.slane %v422_v47, 4 }
  0x32   : > { %v368_v49 = vsel %vm355_vm0, %v367_v41, %v360_v26  ;;  %v396_v50 = vsel %vm355_vm0, %v395_v42, %v388_v28  ;;  %v378_v51 = vperm.slane %v370_v45, %v2748_v37  ;;  %v406_v52 = vperm.slane %v398_v46, %v2748_v37 }
  0x33   : > { %v374_v53 = vperm.slane %v368_v49, %v2748_v37  ;;  %v402_v54 = vperm.slane %v396_v50, %v2748_v37  ;;  %v430_v19 = vsel %vm355_vm0, %v429_v56, %v341_v4  ;;  %v424_v22 = vsel %vm355_vm0, %v423_v5, %v416_v55 }
  0x34   : > { %v2764_v57 = vpack.i.b16 %v406_v52, %v378_v51  ;;  %v467_v58 = vshrl.u32 %v378_v51, 16  ;;  %v468_v59 = vshrl.u32 %v406_v52, 16  ;;  %v381_v60 = vrot.slane %v378_v51, 4 }
  0x35   : > { %v2766_v61 = vpack.i.b16 %v402_v54, %v374_v53  ;;  %v451_v62 = vshrl.u32 %v374_v53, 16  ;;  %v452_v63 = vshrl.u32 %v402_v54, 16  ;;  %v379_v0 = vrot.slane %v374_v53, 4 }
  0x36   : > { %v407_v1 = vrot.slane %v402_v54, 4  ;;  %v524_v2 = vsel %vm510_vm1, %v2764_v57, 0  ;;  %v2770_v3 = vpack.i.b16 %v468_v59, %v467_v58  ;;  %v382_v10 = vsel %vm355_vm0, 0, %v381_v60 }
  0x37   : > { %v512_v6 = vsel %vm510_vm1, %v2766_v61, 0  ;;  %v2775_v7 = vpack.i.b16 %v452_v63, %v451_v62  ;;  %v380_v9 = vsel %vm355_vm0, 0, %v379_v0  ;;  %v409_v15 = vrot.slane %v406_v52, 4 }
  0x38   : > { %548 = vmatpush.bf16.msra.mxu0 %v512_v6  ;;  %v408_v11 = vsel %vm355_vm0, 0, %v407_v1  ;;  %v459_v12 = vshrl.u32 %v380_v9, 16  ;;  %v527_v13 = vsel %vm510_vm1, %v2770_v3, 0  ;;  %v475_v21 = vshrl.u32 %v382_v10, 16 }
  0x39   : > { %v515_v16 = vsel %vm510_vm1, %v2775_v7, 0  ;;  %v2787_v17 = vpack.i.b16 %v408_v11, %v380_v9  ;;  %v460_v18 = vshrl.u32 %v408_v11, 16  ;;  %v410_v20 = vsel %vm355_vm0, 0, %v409_v15 }
  0x3a   : > { %562 = vmatpush.bf16.msra.mxu1 %v515_v16  ;;  %v2797_v25 = vpack.i.b16 %v410_v20, %v382_v10  ;;  %v476_v26 = vshrl.u32 %v410_v20, 16  ;;  %v434_v27 = vperm.slane %v430_v19, %v2732_v14  ;;  %v440_v28 = vperm.slane %v436_v48, %v2732_v14 }
  0x3b   : > { %2192 = vmatmul.msk.bf16.vlgmr.msra.gmra.mxu0 %vm506_vm2, %v2339_v8  ;;  %v518_v23 = vsel %vm510_vm1, %v2787_v17, 0  ;;  %v2795_v24 = vpack.i.b16 %v460_v18, %v459_v12  ;;  %v428_v31 = vperm.slane %v424_v22, %v2748_v37  ;;  %v743_v44 = vlaneseq }
  0x3c   : > { %604 = vmatpush.bf16.msrb.mxu0 %v524_v2  ;;  %576 = vmatpush.bf16.msra.mxu2 %v518_v23  ;;  %v530_v30 = vsel %vm510_vm1, %v2797_v25, 0  ;;  %v2807_v32 = vpack.i.b16 %v476_v26, %v475_v21  ;;  %v441_v33 = vrot.slane %v440_v28, 4  ;;  %v746_v46 = vstv %s2186_s13  ;;  %s2583_s13 = smov 1  }
  0x3d   : > { %2193 = vmatmul.msk.bf16.vlgmr.msra.gmra.mxu1 %vm506_vm2, %v2339_v8  ;;  %v521_v29 = vsel %vm510_vm1, %v2795_v24, 0  ;;  %v483_v38 = vshrl.u32 %v428_v31, 16  ;;  %v744_v45 = vshrl.u32 %v743_v44, 7  ;;  %v2831_v48 = vand.u32 127, %v743_v44 }
  0x3e   : > { %618 = vmatpush.bf16.msrb.mxu1 %v527_v13  ;;  %590 = vmatpush.bf16.msra.mxu3 %v521_v29  ;;  %v533_v34 = vsel %vm510_vm1, %v2807_v32, 0  ;;  %v442_v35 = vsel %vm355_vm0, %v441_v33, %v434_v27  ;;  %v2841_v51 = vstv %s701_s16  ;;  %v2582_v53 = vmov 0.0   ;;  %s2333_s16 = sld [smem:[#allocation3 + $0x2]] }
  0x3f   : > { %2194 = vmatmul.msk.bf16.vlgmr.msra.gmra.mxu2 %vm506_vm2, %v2339_v8  ;;  %v446_v36 = vperm.slane %v442_v35, %v2748_v37  ;;  %v747_v47 = vadd.s32 %v746_v46, %v744_v45  ;;  %vm757_vm6 = vcmp.ge.s32.totalorder %v2831_v48, 1  ;;  %vm760_vm8 = vcmp.lt.s32.totalorder %v2831_v48, 17 }
  0x40   : > { %632 = vmatpush.bf16.msrb.mxu2 %v530_v30  ;;  %v745_v19 = vadd.s32 8, %v744_v45 }
  0x41   : > { %2195 = vmatmul.msk.bf16.vlgmr.msra.gmra.mxu3 %vm506_vm2, %v2339_v8  ;;  %v2815_v39 = vpack.i.b16 %v446_v36, %v428_v31  ;;  %v484_v40 = vshrl.u32 %v446_v36, 16  ;;  %vm751_vm3 = vcmp.ge.s32.totalorder %v747_v47, 1  ;;  %vm753_vm4 = vcmp.lt.s32.totalorder %v747_v47, 17 }
  0x42   : > { %646 = vmatpush.bf16.msrb.mxu3 %v533_v34  ;;  %vm755_vm5 = vmand %vm751_vm3, %vm753_vm4  ;;  %v748_v34 = vadd.s32 %v746_v46, %v745_v19 }
  0x43   : > { %v536_v41 = vsel %vm510_vm1, %v2815_v39, 0  ;;  %v2819_v42 = vpack.i.b16 %v484_v40, %v483_v38  ;;  %vm758_vm7 = vmand %vm755_vm5, %vm757_vm6 }
  0x44   : > { %660 = vmatpush.bf16.msra.mxu0 %v536_v41  ;;  %vm761_vm9 = vmand %vm758_vm7, %vm760_vm8  ;;  %vm752_vm4 = vcmp.ge.s32.totalorder %v748_v34, 1  ;;  %vm754_vm5 = vcmp.lt.s32.totalorder %v748_v34, 17 }
  0x45   : > { %v539_v43 = vsel %vm510_vm1, %v2819_v42, 0  ;;  %v2845_v54 = vsel %vm761_vm9, 1.0, %v2582_v53 }
  0x46   : > { %674 = vmatpush.bf16.msra.mxu1 %v539_v43  ;;  %v769_v59 = vperm.slane %v2845_v54, 0  ;;  %v770_v60 = vperm.slane %v2845_v54, 1  ;;  %v771_v23 = vperm.slane %v2845_v54, 2  ;;  %v772_v26 = vperm.slane %v2845_v54, 3 }
  0x47   : > { %v773_v45 = vperm.slane %v2845_v54, 4  ;;  %v774_v46 = vperm.slane %v2845_v54, 5 }
  0x4b   : > { %2196 = vmatmul.msk.bf16.vlgmr.msrb.gmra.mxu0 %vm506_vm2, %v2339_v8 }
  0x4d   : > { %2197 = vmatmul.msk.bf16.vlgmr.msrb.gmra.mxu1 %vm506_vm2, %v2339_v8 }
  0x4f   : > { %2198 = vmatmul.msk.bf16.vlgmr.msrb.gmra.mxu2 %vm506_vm2, %v2339_v8 }
  0x51   : > { %2199 = vmatmul.msk.bf16.vlgmr.msrb.gmra.mxu3 %vm506_vm2, %v2339_v8 }
  0x5b   : > { %2200 = vmatmul.msk.bf16.vlgmr.msra.gmra.mxu0 %vm506_vm2, %v2339_v8 }
  0x5d   : > { %2201 = vmatmul.msk.bf16.vlgmr.msra.gmra.mxu1 %vm506_vm2, %v2339_v8 }
  0x94   : > { %v2837_v49 = vpop.permute.xlu0 %493 }
  0x9c   : > { %v2852_v1 = vpop.permute.xlu0 %498 }
  0xb8   : > { %v550_v50 = vpop.f32.mrf.mxu0 }
  0xb9   : > { %v551_v52 = vadd.f32 %v550_v50, %v2837_v49 }
  0xba   : > { %v564_v55 = vpop.f32.mrf.mxu1 }
  0xbb   : > { %vm681_vm10 = vcmp.ge.f32.partialorder %v551_v52, 0.0  ;;  %v703_v56 = vmul.f32 %v2841_v51, %v551_v52  ;;  %v565_v58 = vadd.f32 %v564_v55, %v2837_v49 }
  0xbd   : > { %vm682_vm11 = vcmp.ge.f32.partialorder %v565_v58, 0.0  ;;  %v704_v62 = vmul.f32 %v2841_v51, %v565_v58  ;;  %v723_v63 = vsel %vm681_vm10, %v551_v52, %v703_v56  ;;  %vm756_vm10 = vmand %vm752_vm4, %vm754_vm5 }
  0xbe   : > { %v789_v4 = vmul.f32 %v769_v59, %v723_v63 }
  0xbf   : > { %v724_v0 = vsel %vm682_vm11, %v565_v58, %v704_v62 }
  0xc0   : > { %v552_v2 = vpop.f32.mrf.mxu0  ;;  %v790_v5 = vmul.f32 %v770_v60, %v724_v0 }
  0xc1   : > { %v553_v6 = vadd.f32 %v552_v2, %v2852_v1  ;;  %v2206_v2 = vld [vmem:[#allocation2] sm:$0xf] }
  0xc2   : > { %v578_v8 = vpop.f32.mrf.mxu2  ;;  %v566_v9 = vpop.f32.mrf.mxu1  ;;  %v809_v10 = vpack.c.bf16 %v790_v5, %v789_v4  ;;  %v2345_v4 = vld [vmem:[#allocation2 + $0x30] sm:$0xf0] }
  0xc3   : > { %vm691_vm12 = vcmp.ge.f32.partialorder %v553_v6, 0.0  ;;  %v713_v11 = vmul.f32 %v2841_v51, %v553_v6  ;;  %v579_v12 = vadd.f32 %v578_v8, %v2837_v49  ;;  %v567_v13 = vadd.f32 %v566_v9, %v2852_v1 }
  0xc4   : > { %v592_v15 = vpop.f32.mrf.mxu3  ;;  %829 = vrot.lane.b32.xlu1 %v809_v10, %s2583_s13 }
  0xc5   : > { %v705_v16 = vmul.f32 %v2841_v51, %v579_v12  ;;  %vm692_vm13 = vcmp.ge.f32.partialorder %v567_v13, 0.0  ;;  %v714_v18 = vmul.f32 %v2841_v51, %v567_v13  ;;  %vm683_vm14 = vcmp.ge.f32.partialorder %v579_v12, 0.0 }
  0xc6   : > { %v593_v20 = vadd.f32 %v592_v15, %v2837_v49  ;;  %v733_v21 = vsel %vm691_vm12, %v553_v6, %v713_v11  ;;  %vm759_vm12 = vmand %vm756_vm10, %vm757_vm6  ;;  %vm859_vm10 = vcmask 7168  }
  0xc7   : > { %v734_v22 = vsel %vm692_vm13, %v567_v13, %v714_v18  ;;  %v799_v29 = vmul.f32 %v769_v59, %v733_v21  ;;  %v725_v31 = vsel %vm683_vm14, %v579_v12, %v705_v16  ;;  %v2882_v16 = vor.u32 %v2345_v4, %v2206_v2  ;;  %vm762_vm14 = vmand %vm759_vm12, %vm760_vm8 }
  0xc8   : > { %vm684_vm15 = vcmp.ge.f32.partialorder %v593_v20, 0.0  ;;  %v706_v27 = vmul.f32 %v2841_v51, %v593_v20  ;;  %v606_v28 = vpop.f32.mrf.mxu0  ;;  %v800_v30 = vmul.f32 %v770_v60, %v734_v22  ;;  %v791_v50 = vmul.f32 %v771_v23, %v725_v31 }
  0xc9   : > { %v607_v33 = vadd.f32 %v606_v28, %v2837_v49  ;;  %v2203_v48 = vsel %vm762_vm14, 1.0, %v2582_v53  ;;  %vm899_vm12 = vcmask 3072   ;;  %vm1277_vm14 = vcmask 130048  }
  0xca   : > { %v726_v35 = vsel %vm684_vm15, %v593_v20, %v706_v27  ;;  %v580_v36 = vpop.f32.mrf.mxu2  ;;  %v620_v38 = vpop.f32.mrf.mxu1  ;;  %v814_v40 = vpack.c.bf16 %v800_v30, %v799_v29 }
  0xcb   : > { %v707_v41 = vmul.f32 %v2841_v51, %v607_v33  ;;  %v581_v43 = vadd.f32 %v580_v36, %v2852_v1  ;;  %v621_v44 = vadd.f32 %v620_v38, %v2837_v49  ;;  %vm685_vm2 = vcmp.ge.f32.partialorder %v607_v33, 0.0 }
  0xcc   : > { %v594_v47 = vpop.f32.mrf.mxu3  ;;  %839 = vrot.lane.b32.xlu2 %v814_v40, %s2583_s13  ;;  %v792_v52 = vmul.f32 %v772_v26, %v726_v35  ;;  %v776_v38 = vperm.slane %v2845_v54, 7 }
  0xcd   : > { %v715_v55 = vmul.f32 %v2841_v51, %v581_v43  ;;  %vm686_vm3 = vcmp.ge.f32.partialorder %v621_v44, 0.0  ;;  %vm693_vm7 = vcmp.ge.f32.partialorder %v581_v43, 0.0  ;;  %v708_v56 = vmul.f32 %v2841_v51, %v621_v44 }
  0xce   : > { %v595_v58 = vadd.f32 %v594_v47, %v2852_v1  ;;  %v810_v59 = vpack.c.bf16 %v792_v52, %v791_v50  ;;  %v727_v60 = vsel %vm685_vm2, %v607_v33, %v707_v41  ;;  %v778_v52 = vperm.slane %v2203_v48, 1 }
  0xcf   : > { %v728_v62 = vsel %vm686_vm3, %v621_v44, %v708_v56  ;;  %v735_v5 = vsel %vm693_vm7, %v581_v43, %v715_v55  ;;  %v793_v12 = vmul.f32 %v773_v45, %v727_v60  ;;  %v777_v56 = vperm.slane %v2203_v48, 0 }
  0xd0   : > { %vm694_vm9 = vcmp.ge.f32.partialorder %v595_v58, 0.0  ;;  %v716_v63 = vmul.f32 %v2841_v51, %v595_v58  ;;  %831 = vrot.lane.b32.xlu1 %v810_v59, %s2583_s13  ;;  %v608_v0 = vpop.f32.mrf.mxu0  ;;  %v794_v8 = vmul.f32 %v774_v46, %v728_v62  ;;  %v801_v20 = vmul.f32 %v771_v23, %v735_v5 }
  0xd1   : > { %v609_v6 = vadd.f32 %v608_v0, %v2852_v1 }
  0xd2   : > { %v736_v9 = vsel %vm694_vm9, %v595_v58, %v716_v63  ;;  %v634_v10 = vpop.f32.mrf.mxu2  ;;  %v622_v11 = vpop.f32.mrf.mxu1  ;;  %v811_v19 = vpack.c.bf16 %v794_v8, %v793_v12  ;;  %vm891_vm9 = vcmask 1043464  }
  0xd3   : > { %v717_v13 = vmul.f32 %v2841_v51, %v609_v6  ;;  %v623_v15 = vadd.f32 %v622_v11, %v2852_v1  ;;  %vm695_vm11 = vcmp.ge.f32.partialorder %v609_v6, 0.0  ;;  %v802_v21 = vmul.f32 %v772_v26, %v736_v9 }
  0xd4   : > { %v648_v18 = vpop.f32.mrf.mxu3  ;;  %833 = vrot.lane.b32.xlu0 %v811_v19, %s2583_s13  ;;  %v635_v26 = vadd.f32 %v634_v10, %v2837_v49 }
  0xd5   : > { %vm696_vm13 = vcmp.ge.f32.partialorder %v623_v15, 0.0  ;;  %v718_v22 = vmul.f32 %v2841_v51, %v623_v15  ;;  %v815_v27 = vpack.c.bf16 %v802_v21, %v801_v20  ;;  %v737_v28 = vsel %vm695_vm11, %v609_v6, %v717_v13  ;;  %vm893_vm11 = vmor %vm355_vm0, %vm891_vm9 }
  0xd6   : > { %v649_v29 = vadd.f32 %v648_v18, %v2837_v49  ;;  %v803_v36 = vmul.f32 %v773_v45, %v737_v28  ;;  %vm687_vm3 = vcmp.ge.f32.partialorder %v635_v26, 0.0 }
  0xd7   : > { %v738_v30 = vsel %vm696_vm13, %v623_v15, %v718_v22  ;;  %841 = vrot.lane.b32.xlu2 %v815_v27, %s2583_s13  ;;  %vm1055_vm13 = vcmask 1031168  }
  0xd8   : > { %990 = vrot.lane.b32.xlu1 %v2882_v16, %s2584_s22  ;;  %v662_v23 = vpop.f32.mrf.mxu0  ;;  %v804_v33 = vmul.f32 %v774_v46, %v738_v30  ;;  %v710_v40 = vmul.f32 %v2841_v51, %v649_v29  ;;  %vm688_vm6 = vcmp.ge.f32.partialorder %v649_v29, 0.0  ;;  %v709_v46 = vmul.f32 %v2841_v51, %v635_v26 }
  0xd9   : > { %v663_v31 = vadd.f32 %v662_v23, %v2837_v49 }
  0xda   : > { %v636_v34 = vpop.f32.mrf.mxu2  ;;  %v676_v35 = vpop.f32.mrf.mxu1  ;;  %v816_v50 = vpack.c.bf16 %v804_v33, %v803_v36  ;;  %v730_v58 = vsel %vm688_vm6, %v649_v29, %v710_v40  ;;  %v729_v2 = vsel %vm687_vm3, %v635_v26, %v709_v46 }
  0xdb   : > { %v711_v41 = vmul.f32 %v2841_v51, %v663_v31  ;;  %v637_v43 = vadd.f32 %v636_v34, %v2852_v1  ;;  %v677_v44 = vadd.f32 %v676_v35, %v2837_v49  ;;  %vm689_vm8 = vcmp.ge.f32.partialorder %v663_v31, 0.0 }
  0xdc   : > { %v650_v47 = vpop.f32.mrf.mxu3  ;;  %v775_v49 = vperm.slane %v2845_v54, 6  ;;  %v796_v9 = vmul.f32 %v776_v38, %v730_v58 }
  0xdd   : > { %vm697_vm15 = vcmp.ge.f32.partialorder %v637_v43, 0.0  ;;  %v719_v45 = vmul.f32 %v2841_v51, %v637_v43  ;;  %vm690_vm2 = vcmp.ge.f32.partialorder %v677_v44, 0.0  ;;  %v712_v53 = vmul.f32 %v2841_v51, %v677_v44 }
  0xde   : > { %v651_v55 = vadd.f32 %v650_v47, %v2852_v1  ;;  %v731_v59 = vsel %vm689_vm8, %v663_v31, %v711_v41  ;;  %v795_v15 = vmul.f32 %v775_v49, %v729_v2 }
  0xdf   : > { %v739_v60 = vsel %vm697_vm15, %v637_v43, %v719_v45  ;;  %v732_v62 = vsel %vm690_vm2, %v677_v44, %v712_v53  ;;  %1033 = vrot.lane.b32.xlu2 %v2882_v16, %s2585_s23  ;;  %v797_v54 = vmul.f32 %v777_v56, %v731_v59 }
  0xe0   : > { %vm698_vm4 = vcmp.ge.f32.partialorder %v651_v55, 0.0  ;;  %v720_v63 = vmul.f32 %v2841_v51, %v651_v55  ;;  %843 = vrot.lane.b32.xlu1 %v816_v50, %s2583_s13  ;;  %v664_v0 = vpop.f32.mrf.mxu0  ;;  %v798_v5 = vmul.f32 %v778_v52, %v732_v62  ;;  %v805_v12 = vmul.f32 %v775_v49, %v739_v60 }
  0xe1   : > { %v665_v4 = vadd.f32 %v664_v0, %v2852_v1  ;;  %v812_v21 = vpack.c.bf16 %v796_v9, %v795_v15 }
  0xe2   : > { %v740_v6 = vsel %vm698_vm4, %v651_v55, %v720_v63  ;;  %v678_v8 = vpop.f32.mrf.mxu1  ;;  %v813_v18 = vpack.c.bf16 %v798_v5, %v797_v54 }
  0xe3   : > { %v721_v10 = vmul.f32 %v2841_v51, %v665_v4  ;;  %v679_v11 = vadd.f32 %v678_v8, %v2852_v1  ;;  %v806_v13 = vmul.f32 %v776_v38, %v740_v6  ;;  %vm699_vm5 = vcmp.ge.f32.partialorder %v665_v4, 0.0 }
  0xe5   : > { %vm700_vm7 = vcmp.ge.f32.partialorder %v679_v11, 0.0  ;;  %v722_v19 = vmul.f32 %v2841_v51, %v679_v11  ;;  %v817_v20 = vpack.c.bf16 %v806_v13, %v805_v12  ;;  %v741_v22 = vsel %vm699_vm5, %v665_v4, %v721_v10 }
  0xe6   : > { %v807_v1 = vmul.f32 %v777_v56, %v741_v22 }
  0xe7   : > { %v742_v27 = vsel %vm700_vm7, %v679_v11, %v722_v19  ;;  %845 = vrot.lane.b32.xlu0 %v817_v20, %s2583_s13  ;;  %835 = vrot.lane.b32.xlu2 %v812_v21, %s2583_s13 }
  0xe8   : > { %837 = vrot.lane.b32.xlu1 %v813_v18, %s2583_s13  ;;  %v808_v28 = vmul.f32 %v778_v52, %v742_v27 }
  0xea   : > { %v818_v29 = vpack.c.bf16 %v808_v28, %v807_v1 }
  0xef   : > { %847 = vrot.lane.b32.xlu2 %v818_v29, %s2583_s13  ;;  %s324_s13 = sand.u32 1, %s2552_s28  }
 0x126   : > { %v840_v30 = vpop.permute.xlu2 %839 }
 0x127   : > { %v854_v51 = vrot.slane %v840_v30, 4 }
 0x129   : > { %v870_v23 = vsel %vm859_vm10, %v854_v51, %v840_v30 }
 0x12a   : > { %901 = vst.msk [vmem:[#allocation2 + $0x38] sm:$0xff] %vm893_vm11, %v870_v23 }
 0x131   : > { %v842_v26 = vpop.permute.xlu2 %841  ;;  %v2346_v40 = vld [vmem:[#allocation2 + $0x38] sm:$0xf0]  ;;  %v2356_v41 = vld [vmem:[#allocation2 + $0x34] sm:$0xf0] }
 0x132   : > { %v855_v31 = vrot.slane %v842_v26, 4  ;;  %v2252_v43 = vld [vmem:[#allocation2 + $0x38] sm:$0xf0]  ;;  %v2208_v0 = vld [vmem:[#allocation2 + $0x34] sm:$0xf0] }
 0x134   : > { %v871_v33 = vsel %vm510_vm1, %v854_v51, %v855_v31 }
 0x135   : > { %v872_v34 = vsel %vm859_vm10, %v871_v33, %v842_v26 }
 0x136   : > { %v830_v35 = vpop.permute.xlu1 %829  ;;  %902 = vst [vmem:[#allocation2 + $0x40] sm:$0xff] %v872_v34 }
 0x137   : > { %v849_v36 = vrot.slane %v830_v35, 4 }
 0x139   : > { %v860_v38 = vsel %vm859_vm10, %v849_v36, %v830_v35  ;;  %v2924_v48 = vpop.permute.xlu2 %1033 }
 0x13a   : > { %894 = vst.msk [vmem:[#allocation2 + $0x4] sm:$0xff] %vm893_vm11, %v860_v38 }
 0x13d   : > { %v2216_v12 = vld [vmem:[#allocation2 + $0x3c] sm:$0xf0]  ;;  %v2347_v18 = vld [vmem:[#allocation2 + $0x40] sm:$0xf0] }
 0x13e   : > { %v2357_v1 = vld [vmem:[#allocation2 + $0x3c] sm:$0xf0] }
 0x141   : > { %v2214_v44 = vld [vmem:[#allocation2 + $0x8] sm:$0xf]  ;;  %v2250_v47 = vld [vmem:[#allocation2 + $0x4] sm:$0xf]  ;;  %v836_v52 = vpop.permute.xlu2 %835 }
 0x142   : > { %v2351_v50 = vld [vmem:[#allocation2 + $0x8] sm:$0xf]  ;;  %v832_v46 = vpop.permute.xlu1 %831  ;;  %v2926_v45 = vor.u32 %v2346_v40, %v2214_v44  ;;  %v2928_v53 = vor.u32 %v2356_v41, %v2250_v47  ;;  %v2340_v49 = vld [vmem:[#allocation2 + $0x4] sm:$0xf]  ;;  %v852_v62 = vrot.slane %v836_v52, 4 }
 0x143   : > { %v2930_v55 = vor.u32 %v2351_v50, %v2252_v43  ;;  %v850_v56 = vrot.slane %v832_v46, 4  ;;  %v2942_v5 = vor.u32 %v2340_v49, %v2208_v0  ;;  %v2260_v50 = vld [vmem:[#allocation2 + $0x40] sm:$0xf0] }
 0x144   : > { %994 = vrot.lane.b32.xlu0 %v2926_v45, %s2584_s22  ;;  %1131 = vrot.lane.b32.xlu2 %v2928_v53, %s2584_s22 }
 0x145   : > { %v862_v58 = vsel %vm510_vm1, %v849_v36, %v850_v56  ;;  %1175 = vrot.lane.b32.xlu1 %v2930_v55, %s2585_s23 }
 0x146   : > { %v863_v59 = vsel %vm859_vm10, %v862_v58, %v832_v46  ;;  %v834_v60 = vpop.permute.xlu0 %833 }
 0x147   : > { %895 = vst [vmem:[#allocation2 + $0xc] sm:$0xff] %v863_v59  ;;  %v851_v63 = vrot.slane %v834_v60, 4 }
 0x149   : > { %v848_v2 = vpop.permute.xlu2 %847  ;;  %v864_v6 = vsel %vm510_vm1, %v850_v56, %v851_v63  ;;  %v866_v8 = vsel %vm510_vm1, %v851_v63, %v852_v62 }
 0x14a   : > { %v2940_v4 = vpop.permute.xlu1 %990  ;;  %v858_v9 = vrot.slane %v848_v2, 4  ;;  %v865_v54 = vsel %vm859_vm10, %v864_v6, %v834_v60  ;;  %v867_v10 = vsel %vm859_vm10, %v866_v8, %v836_v52 }
 0x14b   : > { %896 = vst [vmem:[#allocation2 + $0x14] sm:$0xff] %v865_v54 }
 0x14c   : > { %1173 = vrot.lane.b32.xlu0 %v2928_v53, %s2585_s23  ;;  %992 = vrot.lane.b32.xlu2 %v2942_v5, %s2584_s22  ;;  %897 = vst [vmem:[#allocation2 + $0x1c] sm:$0xff] %v867_v10 }
 0x14d   : > { %906 = vst.msk [vmem:[#allocation2 + $0x60] sm:$0xf] %vm899_vm12, %v858_v9 }
 0x14e   : > { %v2341_v11 = vld [vmem:[#allocation2 + $0xc] sm:$0xf]  ;;  %v2222_v15 = vld [vmem:[#allocation2 + $0x10] sm:$0xf] }
 0x14f   : > { %v2953_v13 = vor.u32 %v2341_v11, %v2216_v12  ;;  %v2957_v20 = vor.u32 %v2347_v18, %v2222_v15  ;;  %v2258_v22 = vld [vmem:[#allocation2 + $0xc] sm:$0xf]  ;;  %v2352_v44 = vld [vmem:[#allocation2 + $0x10] sm:$0xf] }
 0x150   : > { %v2965_v29 = vor.u32 %v2357_v1, %v2258_v22  ;;  %v2986_v46 = vor.u32 %v2352_v44, %v2260_v50 }
 0x151   : > { %996 = vrot.lane.b32.xlu1 %v2953_v13, %s2584_s22 }
 0x152   : > { %v844_v19 = vpop.permute.xlu1 %843  ;;  %v2342_v40 = vld [vmem:[#allocation2 + $0x14] sm:$0xf]  ;;  %v2230_v49 = vld [vmem:[#allocation2 + $0x18] sm:$0xf] }
 0x153   : > { %v856_v21 = vrot.slane %v844_v19, 4  ;;  %v2266_v52 = vld [vmem:[#allocation2 + $0x14] sm:$0xf]  ;;  %v2353_v60 = vld [vmem:[#allocation2 + $0x18] sm:$0xf] }
 0x154   : > { %1133 = vrot.lane.b32.xlu0 %v2930_v55, %s2584_s22  ;;  %998 = vrot.lane.b32.xlu2 %v2957_v20, %s2584_s22  ;;  %v2343_v6 = vld [vmem:[#allocation2 + $0x1c] sm:$0xf]  ;;  %v2238_v8 = vld [vmem:[#allocation2 + $0x20] sm:$0xf] }
 0x155   : > { %v873_v27 = vsel %vm510_vm1, %v855_v31, %v856_v21  ;;  %v2274_v12 = vld [vmem:[#allocation2 + $0x1c] sm:$0xf]  ;;  %v2354_v15 = vld [vmem:[#allocation2 + $0x20] sm:$0xf] }
 0x156   : > { %v874_v28 = vsel %vm859_vm10, %v873_v27, %v844_v19  ;;  %v2361_v44 = vld [vmem:[#allocation2 + $0x5c] sm:$0xf0] }
 0x157   : > { %903 = vst [vmem:[#allocation2 + $0x48] sm:$0xff] %v874_v28 }
 0x159   : > { %1177 = vrot.lane.b32.xlu1 %v2965_v29, %s2585_s23  ;;  %v846_v30 = vpop.permute.xlu0 %845 }
 0x15a   : > { %v857_v51 = vrot.slane %v846_v30, 4  ;;  %v838_v23 = vpop.permute.xlu1 %837 }
 0x15b   : > { %v853_v26 = vrot.slane %v838_v23, 4 }
 0x15c   : > { %v875_v33 = vsel %vm510_vm1, %v856_v21, %v857_v51  ;;  %v877_v34 = vsel %vm510_vm1, %v857_v51, %v858_v9  ;;  %1035 = vrot.lane.b32.xlu0 %v2942_v5, %s2585_s23 }
 0x15d   : > { %v876_v31 = vsel %vm859_vm10, %v875_v33, %v846_v30  ;;  %v878_v35 = vsel %vm859_vm10, %v877_v34, %v848_v2  ;;  %v868_v36 = vsel %vm510_vm1, %v852_v62, %v853_v26  ;;  %900 = vst.msk [vmem:[#allocation2 + $0x2c] sm:$0xf] %vm899_vm12, %v853_v26  ;;  %v2296_v33 = vld [vmem:[#allocation2 + $0x5c] sm:$0xf0]  ;;  %vm1012_vm1 = vcmask 1039360  }
 0x15e   : > { %904 = vst [vmem:[#allocation2 + $0x50] sm:$0xff] %v876_v31  ;;  %v869_v38 = vsel %vm859_vm10, %v868_v36, %v838_v23  ;;  %v2224_v41 = vld [vmem:[#allocation2 + $0x44] sm:$0xf0]  ;;  %v2348_v58 = vld [vmem:[#allocation2 + $0x48] sm:$0xf0] }
 0x15f   : > { %905 = vst [vmem:[#allocation2 + $0x58] sm:$0xff] %v878_v35  ;;  %v2978_v43 = vor.u32 %v2342_v40, %v2224_v41  ;;  %v2358_v47 = vld [vmem:[#allocation2 + $0x44] sm:$0xf0]  ;;  %v2268_v59 = vld [vmem:[#allocation2 + $0x48] sm:$0xf0]  ;;  %v3002_v62 = vor.u32 %v2348_v58, %v2230_v49 }
 0x160   : > { %898 = vst [vmem:[#allocation2 + $0x24] sm:$0xff] %v869_v38  ;;  %v2988_v56 = vor.u32 %v2358_v47, %v2266_v52  ;;  %v3004_v63 = vor.u32 %v2353_v60, %v2268_v59  ;;  %v2302_v40 = vld [vmem:[#allocation2 + $0x30] sm:$0xf]  ;;  %v2364_v41 = vld [vmem:[#allocation2 + $0x60] sm:$0xf0] }
 0x161   : > { %1135 = vrot.lane.b32.xlu1 %v2965_v29, %s2584_s22  ;;  %1000 = vrot.lane.b32.xlu2 %v2978_v43, %s2584_s22  ;;  %v2303_v52 = vor.u32 %v2364_v41, %v2302_v40 }
 0x164   : > { %1037 = vrot.lane.b32.xlu0 %v2926_v45, %s2585_s23  ;;  %v2362_v26 = vld [vmem:[#allocation2 + $0x2c] sm:$0xf] }
 0x165   : > { %v2232_v0 = vld [vmem:[#allocation2 + $0x4c] sm:$0xf0]  ;;  %v2349_v2 = vld [vmem:[#allocation2 + $0x50] sm:$0xf0]  ;;  %v3050_v31 = vor.u32 %v2362_v26, %v2296_v33  ;;  %v2290_v38 = vld [vmem:[#allocation2 + $0x2c] sm:$0xf] }
 0x166   : > { %v3012_v9 = vor.u32 %v2343_v6, %v2232_v0  ;;  %v3014_v54 = vor.u32 %v2349_v2, %v2238_v8  ;;  %v2359_v10 = vld [vmem:[#allocation2 + $0x4c] sm:$0xf0]  ;;  %v2276_v11 = vld [vmem:[#allocation2 + $0x50] sm:$0xf0]  ;;  %v2363_v21 = vld [vmem:[#allocation2 + $0x58] sm:$0xf0]  ;;  %v2291_v50 = vor.u32 %v2361_v44, %v2290_v38 }
 0x167   : > { %v3022_v18 = vor.u32 %v2359_v10, %v2274_v12  ;;  %v3024_v19 = vor.u32 %v2354_v15, %v2276_v11  ;;  %v2294_v22 = vld [vmem:[#allocation2 + $0x28] sm:$0xf]  ;;  %v2344_v27 = vld [vmem:[#allocation2 + $0x24] sm:$0xf]  ;;  %v2240_v28 = vld [vmem:[#allocation2 + $0x54] sm:$0xf0] }
 0x168   : > { %v3032_v1 = vor.u32 %v2363_v21, %v2294_v22  ;;  %v3034_v30 = vor.u32 %v2344_v27, %v2240_v28  ;;  %v2282_v51 = vld [vmem:[#allocation2 + $0x24] sm:$0xf]  ;;  %v2360_v23 = vld [vmem:[#allocation2 + $0x54] sm:$0xf0]  ;;  %v2355_v35 = vld [vmem:[#allocation2 + $0x28] sm:$0xf] }
 0x169   : > { %1179 = vrot.lane.b32.xlu1 %v2986_v46, %s2585_s23  ;;  %1181 = vrot.lane.b32.xlu2 %v2988_v56, %s2585_s23  ;;  %v3048_v34 = vor.u32 %v2360_v23, %v2282_v51  ;;  %v2284_v36 = vld [vmem:[#allocation2 + $0x58] sm:$0xf0]  ;;  %v2246_v49 = vld [vmem:[#allocation2 + $0x28] sm:$0xf] }
 0x16a   : > { %v3058_v47 = vor.u32 %v2355_v35, %v2284_v36  ;;  %v2350_v60 = vld [vmem:[#allocation2 + $0x58] sm:$0xf0]  ;;  %v1257_v27 = vld [vmem:[%s3535_s4 + $0x8] sm:$0xff] }
 0x16b   : > { %v2247_v2 = vor.u32 %v2350_v60, %v2246_v49  ;;  %v2308_v49 = vld [vmem:[%s3534_s3 + $0x8] sm:$0xf0] }
 0x16c   : > { %1039 = vrot.lane.b32.xlu0 %v2953_v13, %s2585_s23 }
 0x171   : > { %1137 = vrot.lane.b32.xlu1 %v2986_v46, %s2584_s22  ;;  %1139 = vrot.lane.b32.xlu2 %v2988_v56, %s2584_s22 }
 0x174   : > { %1041 = vrot.lane.b32.xlu0 %v2957_v20, %s2585_s23 }
 0x179   : > { %1045 = vrot.lane.b32.xlu1 %v3002_v62, %s2585_s23  ;;  %1141 = vrot.lane.b32.xlu2 %v3004_v63, %s2584_s22 }
 0x17c   : > { %1002 = vrot.lane.b32.xlu0 %v3002_v62, %s2584_s22 }
 0x181   : > { %1004 = vrot.lane.b32.xlu1 %v3012_v9, %s2584_s22  ;;  %1006 = vrot.lane.b32.xlu2 %v3014_v54, %s2584_s22 }
 0x184   : > { %1183 = vrot.lane.b32.xlu0 %v3004_v63, %s2585_s23 }
 0x189   : > { %1185 = vrot.lane.b32.xlu1 %v3022_v18, %s2585_s23  ;;  %1187 = vrot.lane.b32.xlu2 %v3024_v19, %s2585_s23 }
 0x18c   : > { %1043 = vrot.lane.b32.xlu0 %v2978_v43, %s2585_s23 }
 0x191   : > { %1230 = vrot.lane.b32.xlu1 %v3032_v1, %s2584_s22  ;;  %1008 = vrot.lane.b32.xlu2 %v3034_v30, %s2584_s22 }
 0x194   : > { %1143 = vrot.lane.b32.xlu0 %v3022_v18, %s2584_s22 }
 0x199   : > { %1047 = vrot.lane.b32.xlu1 %v3012_v9, %s2585_s23  ;;  %1049 = vrot.lane.b32.xlu2 %v3014_v54, %s2585_s23 }
 0x19c   : > { %1145 = vrot.lane.b32.xlu0 %v3024_v19, %s2584_s22 }
 0x19e   : > { %v1132_v58 = vpop.permute.xlu2 %1131 }
 0x1a1   : > { %1147 = vrot.lane.b32.xlu1 %v3048_v34, %s2584_s22  ;;  %1232 = vrot.lane.b32.xlu2 %v3050_v31, %s2584_s22 }
 0x1a4   : > { %1189 = vrot.lane.b32.xlu0 %v3048_v34, %s2585_s23 }
 0x1a6   : > { %v993_v59 = vpop.permute.xlu2 %992 }
 0x1a9   : > { %1191 = vrot.lane.b32.xlu1 %v3058_v47, %s2585_s23  ;;  %1193 = vrot.lane.b32.xlu2 %v2291_v50, %s2585_s23 }
 0x1ac   : > { %1234 = vrot.lane.b32.xlu0 %v2303_v52, %s2584_s22 }
 0x1ae   : > { %v999_v8 = vpop.permute.xlu2 %998 }
 0x1b1   : > { %1149 = vrot.lane.b32.xlu1 %v3058_v47, %s2584_s22  ;;  %1151 = vrot.lane.b32.xlu2 %v2291_v50, %s2584_s22 }
 0x1b4   : > { %1051 = vrot.lane.b32.xlu0 %v3034_v30, %s2585_s23 }
 0x1b6   : > { %v995_v0 = vpop.permute.xlu0 %994 }
 0x1b7   : > { %v1176_v6 = vpop.permute.xlu1 %1175 }
 0x1b9   : > { %1053 = vrot.lane.b32.xlu1 %v2247_v2, %s2585_s23  ;;  %1010 = vrot.lane.b32.xlu2 %v2247_v2, %s2584_s22 }
 0x1bb   : > { %v3082_v21 = vpop.permute.xlu2 %1000 }
 0x1bc   : > { %1242 = vrot.lane.b32.xlu0 %v3032_v1, %s2585_s23 }
 0x1be   : > { %v1174_v10 = vpop.permute.xlu0 %1173 }
 0x1bf   : > { %v1195_v51 = vsel %vm1055_vm13, %v1174_v10, %v1176_v6 }
 0x1c1   : > { %1246 = vrot.lane.b32.xlu1 %v2303_v52, %s2585_s23  ;;  %v1013_v52 = vsel %vm1012_vm1, %v2940_v4, %v993_v59 }
 0x1c3   : > { %v997_v11 = vpop.permute.xlu1 %996  ;;  %v3093_v33 = vpop.permute.xlu2 %1181 }
 0x1c4   : > { %v3075_v12 = vsel %vm1012_vm1, %v995_v0, %v997_v11  ;;  %v3078_v15 = vsel %vm1012_vm1, %v997_v11, %v999_v8  ;;  %1244 = vrot.lane.b32.xlu0 %v3050_v31, %s2585_s23  ;;  %v3126_v11 = vsel %vm1012_vm1, %v999_v8, %v3082_v21  ;;  %s2184_s23 = sshll.u32 %s324_s13, 6 }
 0x1c5   : > { %1281 = vmatpush.bf16.msra.mxu2 %v3075_v12  ;;  %1309 = vmatpush.bf16.msrb.mxu0 %v3078_v15  ;;  %s3451_s24 = scalar_lea.vmem [#allocation6], %s2184_s23 }
 0x1c6   : > { %v1134_v22 = vpop.permute.xlu0 %1133  ;;  %s2085_s18 = sshll.u32 %s3451_s24, 4  ;;  %s2086_s18 = int_to_ptr.vmem [resolvable:$true] %s2085_s18 }
 0x1c7   : > { %v1153_v35 = vsel %vm1012_vm1, %v1132_v58, %v1134_v22 }
 0x1c9   : > { %1282 = vmatpush.bf16.msra.mxu2 %v2926_v45  ;;  %1310 = vmatpush.bf16.msrb.mxu0 %v2953_v13 }
 0x1cb   : > { %v1178_v28 = vpop.permute.xlu1 %1177  ;;  %v3100_v44 = vpop.permute.xlu2 %1139 }
 0x1cc   : > { %v1196_v23 = vsel %vm1055_vm13, %v1176_v6, %v1178_v28  ;;  %1265 = vperm.xlu0 %2460, %v1257_v27   ;;  %v1014_v6 = vsel %vm1012_vm1, %v993_v59, %v995_v0 }
 0x1cd   : > { %1283 = vmatpush.bf16.msra.mxu2 %v1195_v51  ;;  %1311 = vmatpush.bf16.msrb.mxu0 %v1196_v23 }
 0x1ce   : > { %v1036_v26 = vpop.permute.xlu0 %1035 }
 0x1cf   : > { %v1056_v41 = vsel %vm1055_vm13, %v2924_v48, %v1036_v26  ;;  %v2306_v48 = vld [vmem:[%s3534_s3] sm:$0xf] }
 0x1d1   : > { %1284 = vmatpush.bf16.msra.mxu2 %v1153_v35 }
 0x1d3   : > { %v1136_v36 = vpop.permute.xlu1 %1135 }
 0x1d4   : > { %v1154_v38 = vsel %vm1012_vm1, %v1134_v22, %v1136_v36  ;;  %v3130_v22 = vpop.permute.xlu2 %1141 }
 0x1d5   : > { %1285 = vmatpush.bf16.msra.mxu2 %v2928_v53  ;;  %1312 = vmatpush.bf16.msrb.mxu0 %v1154_v38  ;;  %v2365_v53 = vld [vmem:[%s3534_s3 + $0x4] sm:$0xf] }
 0x1d6   : > { %v1038_v40 = vpop.permute.xlu0 %1037  ;;  %v3119_v2 = vor.u32 %v2365_v53, %v2308_v49 }
 0x1d7   : > { %v1057_v58 = vsel %vm1055_vm13, %v1036_v26, %v1038_v40 }
 0x1d9   : > { %1286 = vmatpush.bf16.msra.mxu2 %v1056_v41  ;;  %1313 = vmatpush.bf16.msrb.mxu0 %v2930_v55  ;;  %v2366_v55 = vld [vmem:[%s3534_s3 + $0x4] sm:$0xf0] }
 0x1da   : > { %v3122_v10 = vor.u32 %v2366_v55, %v2306_v48 }
 0x1db   : > { %v1180_v50 = vpop.permute.xlu1 %1179 }
 0x1dc   : > { %v1007_v51 = vpop.permute.xlu2 %1006 }
 0x1dd   : > { %1287 = vmatpush.bf16.msra.mxu2 %v1013_v52  ;;  %1314 = vmatpush.bf16.msrb.mxu0 %v1057_v58 }
 0x1de   : > { %v1040_v4 = vpop.permute.xlu0 %1039 }
 0x1df   : > { %v1058_v60 = vsel %vm1055_vm13, %v1038_v40, %v1040_v4  ;;  %v1198_v40 = vsel %vm1055_vm13, %v1180_v50, %v3093_v33 }
 0x1e0   : > { %1302 = vmatpush.bf16.msra.mxu3 %v1058_v60 }
 0x1e1   : > { %1288 = vmatpush.bf16.msra.mxu2 %v2882_v16  ;;  %1315 = vmatpush.bf16.msrb.mxu0 %v1014_v6  ;;  %v1197_v16 = vsel %vm1055_vm13, %v1178_v28, %v1180_v50  ;;  %v1256_v28 = vld [vmem:[%s3535_s4] sm:$0xff] }
 0x1e2   : > { %1260 = vperm.xlu2 %2461, %v1256_v28  }
 0x1e3   : > { %v1138_v27 = vpop.permute.xlu1 %1137  ;;  %2312 = vmatmul.msk.bf16.vlgmr.msra.gmra.mxu3 %vm1277_vm14, %v3119_v2 }
 0x1e4   : > { %1337 = vmatpush.bf16.msrb.mxu3 %v3126_v11  ;;  %1289 = vmatmul.bf16.vlgmr.msra.gmra.mxu2 %v3122_v10  ;;  %v1155_v23 = vsel %vm1012_vm1, %v1136_v36, %v1138_v27  ;;  %v1188_v38 = vpop.permute.xlu2 %1187 }
 0x1e5   : > { %1316 = vmatpush.bf16.msrb.mxu0 %v2942_v5 }
 0x1e6   : > { %v1042_v59 = vpop.permute.xlu0 %1041 }
 0x1e7   : > { %v1059_v0 = vsel %vm1055_vm13, %v1040_v4, %v1042_v59 }
 0x1e8   : > { %1338 = vmatpush.bf16.msrb.mxu3 %v2957_v20  ;;  %1317 = vmatmul.bf16.vlgmr.msrb.gmra.mxu0 %v3122_v10 }
 0x1e9   : > { %1330 = vmatpush.bf16.msrb.mxu1 %v1059_v0 }
 0x1eb   : > { %v1046_v8 = vpop.permute.xlu1 %1045 }
 0x1ec   : > { %1339 = vmatpush.bf16.msrb.mxu3 %v1197_v16  ;;  %2313 = vmatmul.msk.bf16.vlgmr.msrb.gmra.mxu1 %vm1277_vm14, %v3119_v2  ;;  %v3162_v53 = vpop.permute.xlu2 %1008 }
 0x1ee   : > { %v1003_v5 = vpop.permute.xlu0 %1002 }
 0x1ef   : > { %v3145_v26 = vsel %vm1012_vm1, %v3082_v21, %v1003_v5 }
 0x1f0   : > { %1340 = vmatpush.bf16.msrb.mxu3 %v1155_v23  ;;  %1365 = vmatpush.bf16.msrb.mxu2 %v3145_v26 }
 0x1f3   : > { %v1005_v35 = vpop.permute.xlu1 %1004 }
 0x1f4   : > { %1341 = vmatpush.bf16.msrb.mxu3 %v2965_v29  ;;  %1366 = vmatpush.bf16.msrb.mxu2 %v2978_v43  ;;  %v1156_v29 = vsel %vm1012_vm1, %v1138_v27, %v3100_v44  ;;  %v3165_v50 = vsel %vm1012_vm1, %v1003_v5, %v1005_v35  ;;  %v1050_v55 = vpop.permute.xlu2 %1049  ;;  %v3190_v27 = vsel %vm1012_vm1, %v1007_v51, %v3162_v53 }
 0x1f6   : > { %v1184_v36 = vpop.permute.xlu0 %1183 }
 0x1f7   : > { %v1199_v49 = vsel %vm1055_vm13, %v3093_v33, %v1184_v36 }
 0x1f8   : > { %1342 = vmatpush.bf16.msrb.mxu3 %v1058_v60  ;;  %1367 = vmatpush.bf16.msrb.mxu2 %v1198_v40 }
 0x1fb   : > { %v1186_v21 = vpop.permute.xlu1 %1185 }
 0x1fc   : > { %1343 = vmatpush.bf16.msrb.mxu3 %v3075_v12  ;;  %1368 = vmatpush.bf16.msrb.mxu2 %v1156_v29  ;;  %v3168_v12 = vsel %vm1012_vm1, %v1005_v35, %v1007_v51  ;;  %v1200_v48 = vsel %vm1055_vm13, %v1184_v36, %v1186_v21  ;;  %v1233_v23 = vpop.permute.xlu2 %1232 }
 0x1fe   : > { %v1044_v41 = vpop.permute.xlu0 %1043 }
 0x1ff   : > { %v1060_v52 = vsel %vm1055_vm13, %v1042_v59, %v1044_v41  ;;  %v1061_v58 = vsel %vm1055_vm13, %v1044_v41, %v1046_v8 }
 0x200   : > { %1344 = vmatpush.bf16.msrb.mxu3 %v2926_v45  ;;  %1358 = vmatpush.bf16.msra.mxu1 %v1060_v52 }
 0x201   : > { %1369 = vmatpush.bf16.msrb.mxu2 %v2986_v46  ;;  %1386 = vmatpush.bf16.msra.mxu0 %v1061_v58 }
 0x203   : > { %1345 = vmatmul.bf16.vlgmr.msrb.gmra.mxu3 %v3122_v10  ;;  %v3173_v45 = vpop.permute.xlu1 %1230  ;;  %2314 = vmatmul.msk.bf16.vlgmr.msra.gmra.mxu1 %vm1277_vm14, %v3119_v2 }
 0x204   : > { %1393 = vmatpush.bf16.msrb.mxu1 %v3165_v50  ;;  %2315 = vmatmul.msk.bf16.vlgmr.msra.gmra.mxu0 %vm1277_vm14, %v3119_v2  ;;  %v1194_v36 = vpop.permute.xlu2 %1193 }
 0x205   : > { %1421 = vmatpush.bf16.msrb.mxu0 %v3168_v12  ;;  %1370 = vmatpush.bf16.msrb.mxu2 %v1059_v0 }
 0x206   : > { %v1144_v46 = vpop.permute.xlu0 %1143 }
 0x207   : > { %v1158_v33 = vsel %vm1012_vm1, %v3130_v22, %v1144_v46 }
 0x208   : > { %1394 = vmatpush.bf16.msrb.mxu1 %v3002_v62 }
 0x209   : > { %1422 = vmatpush.bf16.msrb.mxu0 %v3012_v9  ;;  %1371 = vmatpush.bf16.msrb.mxu2 %v3078_v15  ;;  %v1157_v15 = vsel %vm1012_vm1, %v3100_v44, %v3130_v22  ;;  %v1201_v22 = vsel %vm1055_vm13, %v1186_v21, %v1188_v38 }
 0x20b   : > { %v1048_v4 = vpop.permute.xlu1 %1047 }
 0x20c   : > { %1395 = vmatpush.bf16.msrb.mxu1 %v1199_v49  ;;  %v1062_v60 = vsel %vm1055_vm13, %v1046_v8, %v1048_v4  ;;  %v1063_v6 = vsel %vm1055_vm13, %v1048_v4, %v1050_v55  ;;  %v1152_v29 = vpop.permute.xlu2 %1151 }
 0x20d   : > { %1423 = vmatpush.bf16.msrb.mxu0 %v1200_v48  ;;  %1372 = vmatpush.bf16.msrb.mxu2 %v2953_v13  ;;  %v1236_v13 = vsel %vm1012_vm1, %v3162_v53, %v3173_v45 }
 0x20e   : > { %1414 = vmatpush.bf16.msra.mxu3 %v1062_v60  ;;  %v1146_v59 = vpop.permute.xlu0 %1145 }
 0x20f   : > { %v1159_v8 = vsel %vm1012_vm1, %v1144_v46, %v1146_v59 }
 0x210   : > { %1396 = vmatpush.bf16.msrb.mxu1 %v1157_v15  ;;  %1373 = vmatmul.bf16.vlgmr.msrb.gmra.mxu2 %v3122_v10 }
 0x211   : > { %1442 = vmatpush.bf16.msra.mxu2 %v1063_v6  ;;  %1424 = vmatpush.bf16.msrb.mxu0 %v1158_v33 }
 0x212   : > { %1449 = vmatpush.bf16.msrb.mxu3 %v3190_v27 }
 0x213   : > { %2316 = vmatmul.msk.bf16.vlgmr.msra.gmra.mxu3 %vm1277_vm14, %v3119_v2  ;;  %v1148_v44 = vpop.permute.xlu1 %1147 }
 0x214   : > { %1397 = vmatpush.bf16.msrb.mxu1 %v2988_v56 }
 0x215   : > { %1477 = vmatpush.bf16.msrb.mxu2 %v1236_v13  ;;  %1425 = vmatpush.bf16.msrb.mxu0 %v3004_v63  ;;  %v1160_v63 = vsel %vm1012_vm1, %v1146_v59, %v1148_v44 }
 0x216   : > { %1450 = vmatpush.bf16.msrb.mxu3 %v3014_v54  ;;  %v1190_v0 = vpop.permute.xlu0 %1189 }
 0x217   : > { %v1202_v16 = vsel %vm1055_vm13, %v1188_v38, %v1190_v0 }
 0x218   : > { %1398 = vmatpush.bf16.msrb.mxu1 %v1060_v52  ;;  %v1011_v52 = vpop.permute.xlu2 %1010 }
 0x219   : > { %1478 = vmatpush.bf16.msrb.mxu2 %v3034_v30  ;;  %1426 = vmatpush.bf16.msrb.mxu0 %v1061_v58 }
 0x21a   : > { %1451 = vmatpush.bf16.msrb.mxu3 %v1201_v22 }
 0x21b   : > { %v1192_v56 = vpop.permute.xlu1 %1191 }
 0x21c   : > { %1399 = vmatpush.bf16.msrb.mxu1 %v3126_v11  ;;  %v1203_v28 = vsel %vm1055_vm13, %v1190_v0, %v1192_v56  ;;  %v1204_v21 = vsel %vm1055_vm13, %v1192_v56, %v1194_v36 }
 0x21d   : > { %1479 = vmatpush.bf16.msrb.mxu2 %v1202_v16  ;;  %1427 = vmatpush.bf16.msrb.mxu0 %v3145_v26 }
 0x21e   : > { %1452 = vmatpush.bf16.msrb.mxu3 %v1159_v8  ;;  %v1235_v51 = vpop.permute.xlu0 %1234 }
 0x21f   : > { %v1238_v35 = vsel %vm1012_vm1, %v1233_v23, %v1235_v51  ;;  %v3276_v51 = vld [vmem:[%s3536_s5] sm:$0xf] }
 0x220   : > { %1400 = vmatpush.bf16.msrb.mxu1 %v2957_v20  ;;  %2317 = vmatmul.msk.bf16.vlgmr.msra.gmra.mxu2 %vm1277_vm14, %v3119_v2 }
 0x221   : > { %1480 = vmatpush.bf16.msrb.mxu2 %v1160_v63  ;;  %1428 = vmatpush.bf16.msrb.mxu0 %v2978_v43  ;;  %v1237_v43 = vsel %vm1012_vm1, %v3173_v45, %v1233_v23 }
 0x222   : > { %1453 = vmatpush.bf16.msrb.mxu3 %v3022_v18 }
 0x223   : > { %1401 = vmatmul.bf16.vlgmr.msrb.gmra.mxu1 %v3122_v10  ;;  %v1150_v11 = vpop.permute.xlu1 %1149 }
 0x224   : > { %1429 = vmatmul.bf16.vlgmr.msrb.gmra.mxu0 %v3122_v10  ;;  %v1162_v41 = vsel %vm1012_vm1, %v1150_v11, %v1152_v29 }
 0x225   : > { %1481 = vmatpush.bf16.msrb.mxu2 %v3024_v19 }
 0x226   : > { %1454 = vmatpush.bf16.msrb.mxu3 %v1062_v60  ;;  %v1052_v18 = vpop.permute.xlu0 %1051 }
 0x227   : > { %v1064_v20 = vsel %vm1055_vm13, %v1050_v55, %v1052_v18 }
 0x228   : > { %1470 = vmatpush.bf16.msra.mxu1 %v1064_v20 }
 0x229   : > { %1482 = vmatpush.bf16.msrb.mxu2 %v1063_v6 }
 0x22a   : > { %1455 = vmatpush.bf16.msrb.mxu3 %v3165_v50 }
 0x22b   : > { %v1054_v19 = vpop.permute.xlu1 %1053 }
 0x22c   : > { %1505 = vmatpush.bf16.msrb.mxu1 %v1237_v43 }
 0x22d   : > { %1483 = vmatpush.bf16.msrb.mxu2 %v3168_v12 }
 0x22e   : > { %1456 = vmatpush.bf16.msrb.mxu3 %v3002_v62  ;;  %v1243_v5 = vpop.permute.xlu0 %1242  ;;  %v1161_v62 = vsel %vm1012_vm1, %v1148_v44, %v1150_v11 }
 0x22f   : > { %v1248_v26 = vsel %vm1055_vm13, %v1052_v18, %v1243_v5 }
 0x230   : > { %1506 = vmatpush.bf16.msrb.mxu1 %v3032_v1  ;;  %1498 = vmatpush.bf16.msra.mxu0 %v1248_v26 }
 0x231   : > { %1484 = vmatpush.bf16.msrb.mxu2 %v3012_v9  ;;  %1457 = vmatmul.bf16.vlgmr.msrb.gmra.mxu3 %v3122_v10 }
 0x233   : > { %2318 = vmatmul.msk.bf16.vlgmr.msra.gmra.mxu1 %vm1277_vm14, %v3119_v2  ;;  %v1247_v9 = vpop.permute.xlu1 %1246 }
 0x234   : > { %1485 = vmatmul.bf16.vlgmr.msrb.gmra.mxu2 %v3122_v10  ;;  %1507 = vmatpush.bf16.msrb.mxu1 %v1203_v28 }
 0x235   : > { %1533 = vmatpush.bf16.msrb.mxu0 %v1238_v35 }
 0x236   : > { %2319 = vmatmul.msk.bf16.vlgmr.msra.gmra.mxu0 %vm1277_vm14, %v3119_v2  ;;  %v1245_v1 = vpop.permute.xlu0 %1244 }
 0x237   : > { %v1249_v38 = vsel %vm1055_vm13, %v1243_v5, %v1245_v1  ;;  %v1250_v40 = vsel %vm1055_vm13, %v1245_v1, %v1247_v9 }
 0x238   : > { %1508 = vmatpush.bf16.msrb.mxu1 %v1161_v62  ;;  %1526 = vmatpush.bf16.msra.mxu3 %v1249_v38 }
 0x239   : > { %1534 = vmatpush.bf16.msrb.mxu0 %v3050_v31  ;;  %1554 = vmatpush.bf16.msra.mxu2 %v1250_v40  ;;  %v1065_v31 = vsel %vm1055_vm13, %v1052_v18, %v1054_v19 }
 0x23c   : > { %1509 = vmatpush.bf16.msrb.mxu1 %v3048_v34  ;;  %v1022_v34 = vsel %vm1012_vm1, %v3162_v53, %v1011_v52  ;;  %v3259_v58 = vpop.permute.xlu2 %1260  ;;  %v3263_v53 = vstv %s2322_s14 }
 0x23d   : > { %1535 = vmatpush.bf16.msrb.mxu0 %v1204_v21 }
 0x23e   : > { %v3265_v55 = vpop.permute.xlu0 %1265 }
 0x240   : > { %1510 = vmatpush.bf16.msrb.mxu1 %v1064_v20 }
 0x241   : > { %1536 = vmatpush.bf16.msrb.mxu0 %v1162_v41  ;;  %2320 = vmatmul.msk.bf16.vlgmr.msra.gmra.mxu3 %vm1277_vm14, %v3119_v2 }
 0x244   : > { %2321 = vmatmul.msk.bf16.vlgmr.msra.gmra.mxu2 %vm1277_vm14, %v3119_v2  ;;  %1511 = vmatpush.bf16.msrb.mxu1 %v3190_v27 }
 0x245   : > { %1537 = vmatpush.bf16.msrb.mxu0 %v3058_v47 }
 0x248   : > { %1512 = vmatpush.bf16.msrb.mxu1 %v3014_v54 }
 0x249   : > { %1538 = vmatpush.bf16.msrb.mxu0 %v1065_v31  ;;  %v1634_v31 = vld [vmem:[%s3537_s6] sm:$0xff] }
 0x24a   : > { %1637 = vperm.xlu1 %2462, %v1634_v31  }
 0x24b   : > { %1513 = vmatmul.bf16.vlgmr.msrb.gmra.mxu1 %v3122_v10 }
 0x24d   : > { %1539 = vmatpush.bf16.msrb.mxu0 %v1022_v34 }
 0x251   : > { %1540 = vmatpush.bf16.msrb.mxu0 %v3034_v30 }
 0x254   : > { %1541 = vmatmul.bf16.vlgmr.msrb.gmra.mxu0 %v3122_v10 }
 0x265   : > { %v1318_v2 = vpop.f32.mrf.mxu0 }
 0x266   : > { %v1304_v47 = vpop.f32.mrf.mxu3  ;;  %v1319_v12 = vadd.f32 %v1318_v2, %v3259_v58 }
 0x267   : > { %v1290_v50 = vpop.f32.mrf.mxu2 }
 0x268   : > { %v1291_v45 = vadd.f32 %v1290_v50, %v3259_v58 }
 0x269   : > { %v1332_v54 = vpop.f32.mrf.mxu1 }
 0x26a   : > { %v1333_v46 = vadd.f32 %v1332_v54, %v1319_v12  ;;  %v1305_v49 = vadd.f32 %v1304_v47, %v1291_v45 }
 0x26c   : > { %v1584_v60 = vmul.f32 %v3263_v53, %v1333_v46  ;;  %v1583_v27 = vmul.f32 %v3263_v53, %v1305_v49  ;;  %vm1562_vm6 = vcmp.ge.f32.partialorder %v1333_v46, 0.0  ;;  %vm1561_vm8 = vcmp.ge.f32.partialorder %v1305_v49, 0.0 }
 0x26d   : > { %v1320_v48 = vpop.f32.mrf.mxu0 }
 0x26e   : > { %v1321_v30 = vadd.f32 %v1320_v48, %v3265_v55  ;;  %v1306_v4 = vpop.f32.mrf.mxu3  ;;  %v1604_v44 = vsel %vm1562_vm6, %v1333_v46, %v1584_v60  ;;  %v1603_v0 = vsel %vm1561_vm8, %v1305_v49, %v1583_v27 }
 0x26f   : > { %v1292_v10 = vpop.f32.mrf.mxu2 }
 0x270   : > { %v1293_v6 = vadd.f32 %v1292_v10, %v3265_v55 }
 0x271   : > { %v1334_v15 = vpop.f32.mrf.mxu1 }
 0x272   : > { %v1335_v33 = vadd.f32 %v1334_v15, %v1321_v30  ;;  %v1307_v59 = vadd.f32 %v1306_v4, %v1293_v6 }
 0x274   : > { %vm1572_vm15 = vcmp.ge.f32.partialorder %v1335_v33, 0.0  ;;  %v1594_v13 = vmul.f32 %v3263_v53, %v1335_v33  ;;  %vm1571_vm2 = vcmp.ge.f32.partialorder %v1307_v59, 0.0  ;;  %v1593_v22 = vmul.f32 %v3263_v53, %v1307_v59 }
 0x276   : > { %v1614_v16 = vsel %vm1572_vm15, %v1335_v33, %v1594_v13  ;;  %v1613_v8 = vsel %vm1571_vm2, %v1307_v59, %v1593_v22 }
 0x277   : > { %v1625_v56 = vpack.c.bf16 %v1614_v16, %v1604_v44  ;;  %v1624_v63 = vpack.c.bf16 %v1613_v8, %v1603_v0 }
 0x279   : > { %1663 = vmatpush.bf16.msra.mxu1 %v1625_v56  ;;  %1650 = vmatpush.bf16.msrb.mxu3 %v1624_v63 }
 0x27c   : > { %2323 = vmatmul.msk.bf16.vlgmr.msrb.gmra.mxu3 %vm1277_vm14, %v3276_v51  ;;  %2324 = vmatmul.msk.bf16.vlgmr.msra.gmra.mxu1 %vm1277_vm14, %v3276_v51 }
 0x280   : > { %v1360_v11 = vpop.f32.mrf.mxu1 }
 0x281   : > { %v1388_v43 = vpop.f32.mrf.mxu0 }
 0x286   : > { %v1346_v18 = vpop.f32.mrf.mxu3 }
 0x287   : > { %v1347_v23 = vadd.f32 %v1346_v18, %v3259_v58 }
 0x288   : > { %v1362_v5 = vpop.f32.mrf.mxu1 }
 0x289   : > { %v1361_v20 = vadd.f32 %v1360_v11, %v1347_v23  ;;  %v1390_v21 = vpop.f32.mrf.mxu0 }
 0x28b   : > { %v1585_v26 = vmul.f32 %v3263_v53, %v1361_v20  ;;  %vm1563_vm3 = vcmp.ge.f32.partialorder %v1361_v20, 0.0 }
 0x28d   : > { %v1605_v36 = vsel %vm1563_vm3, %v1361_v20, %v1585_v26 }
 0x28e   : > { %v1348_v19 = vpop.f32.mrf.mxu3 }
 0x28f   : > { %v1349_v35 = vadd.f32 %v1348_v19, %v3265_v55 }
 0x291   : > { %v1363_v28 = vadd.f32 %v1362_v5, %v1349_v35 }
 0x293   : > { %vm1573_vm4 = vcmp.ge.f32.partialorder %v1363_v28, 0.0  ;;  %v1595_v62 = vmul.f32 %v3263_v53, %v1363_v28  ;;  %v1374_v9 = vpop.f32.mrf.mxu2 }
 0x294   : > { %v1375_v40 = vadd.f32 %v1374_v9, %v3259_v58 }
 0x295   : > { %v1615_v1 = vsel %vm1573_vm4, %v1363_v28, %v1595_v62 }
 0x296   : > { %v1626_v38 = vpack.c.bf16 %v1615_v1, %v1605_v36  ;;  %v1389_v29 = vadd.f32 %v1388_v43, %v1375_v40  ;;  %v1416_v34 = vpop.f32.mrf.mxu3 }
 0x298   : > { %1676 = vmatpush.bf16.msrb.mxu2 %v1626_v38  ;;  %v1586_v2 = vmul.f32 %v3263_v53, %v1389_v29  ;;  %vm1564_vm5 = vcmp.ge.f32.partialorder %v1389_v29, 0.0 }
 0x29a   : > { %v1606_v45 = vsel %vm1564_vm5, %v1389_v29, %v1586_v2 }
 0x29b   : > { %2325 = vmatmul.msk.bf16.vlgmr.msrb.gmra.mxu2 %vm1277_vm14, %v3276_v51  ;;  %v1376_v41 = vpop.f32.mrf.mxu2 }
 0x29c   : > { %v1377_v52 = vadd.f32 %v1376_v41, %v3265_v55 }
 0x29e   : > { %v1391_v47 = vadd.f32 %v1390_v21, %v1377_v52  ;;  %v1418_v6 = vpop.f32.mrf.mxu3 }
 0x2a0   : > { %v1402_v50 = vpop.f32.mrf.mxu1  ;;  %vm1574_vm7 = vcmp.ge.f32.partialorder %v1391_v47, 0.0  ;;  %v1596_v12 = vmul.f32 %v3263_v53, %v1391_v47 }
 0x2a1   : > { %v1430_v54 = vpop.f32.mrf.mxu0  ;;  %v1403_v49 = vadd.f32 %v1402_v50, %v3259_v58 }
 0x2a2   : > { %v1616_v46 = vsel %vm1574_vm7, %v1391_v47, %v1596_v12  ;;  %v1431_v4 = vadd.f32 %v1430_v54, %v3259_v58 }
 0x2a3   : > { %v1444_v48 = vpop.f32.mrf.mxu2  ;;  %v1627_v30 = vpack.c.bf16 %v1616_v46, %v1606_v45  ;;  %v1417_v10 = vadd.f32 %v1416_v34, %v1403_v49 }
 0x2a4   : > { %v1445_v27 = vadd.f32 %v1444_v48, %v1431_v4 }
 0x2a5   : > { %1689 = vmatpush.bf16.msra.mxu3 %v1627_v30  ;;  %v1587_v59 = vmul.f32 %v3263_v53, %v1417_v10  ;;  %vm1565_vm9 = vcmp.ge.f32.partialorder %v1417_v10, 0.0 }
 0x2a6   : > { %v1588_v0 = vmul.f32 %v3263_v53, %v1445_v27  ;;  %vm1566_vm11 = vcmp.ge.f32.partialorder %v1445_v27, 0.0 }
 0x2a7   : > { %v1607_v56 = vsel %vm1565_vm9, %v1417_v10, %v1587_v59 }
 0x2a8   : > { %v1404_v60 = vpop.f32.mrf.mxu1  ;;  %2326 = vmatmul.msk.bf16.vlgmr.msra.gmra.mxu3 %vm1277_vm14, %v3276_v51  ;;  %v1608_v23 = vsel %vm1566_vm11, %v1445_v27, %v1588_v0 }
 0x2a9   : > { %v1405_v15 = vadd.f32 %v1404_v60, %v3265_v55  ;;  %v1432_v33 = vpop.f32.mrf.mxu0 }
 0x2aa   : > { %v1433_v44 = vadd.f32 %v1432_v33, %v3265_v55 }
 0x2ab   : > { %v1419_v13 = vadd.f32 %v1418_v6, %v1405_v15  ;;  %v1446_v22 = vpop.f32.mrf.mxu2 }
 0x2ac   : > { %v1447_v8 = vadd.f32 %v1446_v22, %v1433_v44 }
 0x2ad   : > { %vm1575_vm10 = vcmp.ge.f32.partialorder %v1419_v13, 0.0  ;;  %v1597_v16 = vmul.f32 %v3263_v53, %v1419_v13 }
 0x2ae   : > { %vm1576_vm12 = vcmp.ge.f32.partialorder %v1447_v8, 0.0  ;;  %v1598_v11 = vmul.f32 %v3263_v53, %v1447_v8 }
 0x2af   : > { %v1617_v63 = vsel %vm1575_vm10, %v1419_v13, %v1597_v16 }
 0x2b0   : > { %v1628_v18 = vpack.c.bf16 %v1617_v63, %v1607_v56  ;;  %v1618_v20 = vsel %vm1576_vm12, %v1447_v8, %v1598_v11  ;;  %v1472_v43 = vpop.f32.mrf.mxu1 }
 0x2b1   : > { %v1629_v19 = vpack.c.bf16 %v1618_v20, %v1608_v23 }
 0x2b2   : > { %1702 = vmatpush.bf16.msra.mxu0 %v1628_v18 }
 0x2b3   : > { %v1500_v26 = vpop.f32.mrf.mxu0  ;;  %1715 = vmatpush.bf16.msrb.mxu1 %v1629_v19 }
 0x2b4   : > { %v1458_v5 = vpop.f32.mrf.mxu3 }
 0x2b5   : > { %v1459_v28 = vadd.f32 %v1458_v5, %v3259_v58  ;;  %2327 = vmatmul.msk.bf16.vlgmr.msra.gmra.mxu0 %vm1277_vm14, %v3276_v51 }
 0x2b6   : > { %2328 = vmatmul.msk.bf16.vlgmr.msrb.gmra.mxu1 %vm1277_vm14, %v3276_v51 }
 0x2b7   : > { %v1486_v35 = vpop.f32.mrf.mxu2  ;;  %v1473_v62 = vadd.f32 %v1472_v43, %v1459_v28 }
 0x2b8   : > { %v1487_v36 = vadd.f32 %v1486_v35, %v3259_v58  ;;  %v1474_v1 = vpop.f32.mrf.mxu1 }
 0x2b9   : > { %v1589_v29 = vmul.f32 %v3263_v53, %v1473_v62  ;;  %vm1567_vm1 = vcmp.ge.f32.partialorder %v1473_v62, 0.0 }
 0x2ba   : > { %v1501_v38 = vadd.f32 %v1500_v26, %v1487_v36  ;;  %v1773_v36 = vunpack.c.l.bf16 %v2766_v61  ;;  %v1774_v61 = vunpack.c.l.bf16 %v2775_v7  ;;  %v1776_v7 = vunpack.c.l.bf16 %v2795_v24 }
 0x2bb   : > { %v1502_v52 = vpop.f32.mrf.mxu0  ;;  %v1609_v50 = vsel %vm1567_vm1, %v1473_v62, %v1589_v29 }
 0x2bc   : > { %v1460_v9 = vpop.f32.mrf.mxu3  ;;  %v1590_v34 = vmul.f32 %v3263_v53, %v1501_v38  ;;  %vm1568_vm6 = vcmp.ge.f32.partialorder %v1501_v38, 0.0  ;;  %v3334_v62 = vpop.permute.xlu1 %1637 }
 0x2bd   : > { %v1461_v40 = vadd.f32 %v1460_v9, %v3265_v55 }
 0x2be   : > { %v1610_v46 = vsel %vm1568_vm6, %v1501_v38, %v1590_v34  ;;  %v3337_v38 = vstv %s2333_s16 }
 0x2bf   : > { %v1488_v21 = vpop.f32.mrf.mxu2  ;;  %v1475_v41 = vadd.f32 %v1474_v1, %v1461_v40 }
 0x2c0   : > { %v1489_v31 = vadd.f32 %v1488_v21, %v3265_v55  ;;  %v1775_v21 = vunpack.c.l.bf16 %v2787_v17 }
 0x2c1   : > { %vm1577_vm13 = vcmp.ge.f32.partialorder %v1475_v41, 0.0  ;;  %v1599_v2 = vmul.f32 %v3263_v53, %v1475_v41 }
 0x2c2   : > { %v1503_v47 = vadd.f32 %v1502_v52, %v1489_v31 }
 0x2c3   : > { %v1619_v12 = vsel %vm1577_vm13, %v1475_v41, %v1599_v2 }
 0x2c4   : > { %vm1578_vm8 = vcmp.ge.f32.partialorder %v1503_v47, 0.0  ;;  %v1600_v54 = vmul.f32 %v3263_v53, %v1503_v47  ;;  %v1630_v45 = vpack.c.bf16 %v1619_v12, %v1609_v50  ;;  %v1528_v30 = vpop.f32.mrf.mxu3 }
 0x2c6   : > { %v1620_v49 = vsel %vm1578_vm8, %v1503_v47, %v1600_v54  ;;  %1728 = vmatpush.bf16.msra.mxu2 %v1630_v45  ;;  %vm2053_vm8 = vcmask 130049  }
 0x2c7   : > { %v1631_v48 = vpack.c.bf16 %v1620_v49, %v1610_v46  ;;  %v1556_v6 = vpop.f32.mrf.mxu2 }
 0x2c8   : > { %v1514_v10 = vpop.f32.mrf.mxu1 }
 0x2c9   : > { %1741 = vmatpush.bf16.msrb.mxu3 %v1631_v48  ;;  %2329 = vmatmul.msk.bf16.vlgmr.msra.gmra.mxu2 %vm1277_vm14, %v3276_v51  ;;  %v1515_v4 = vadd.f32 %v1514_v10, %v3259_v58 }
 0x2cb   : > { %v1529_v60 = vadd.f32 %v1528_v30, %v1515_v4 }
 0x2cc   : > { %2330 = vmatmul.msk.bf16.vlgmr.msrb.gmra.mxu3 %vm1277_vm14, %v3276_v51  ;;  %v1530_v27 = vpop.f32.mrf.mxu3 }
 0x2cd   : > { %v1591_v13 = vmul.f32 %v3263_v53, %v1529_v60  ;;  %vm1569_vm15 = vcmp.ge.f32.partialorder %v1529_v60, 0.0 }
 0x2cf   : > { %v1611_v16 = vsel %vm1569_vm15, %v1529_v60, %v1591_v13  ;;  %v1558_v23 = vpop.f32.mrf.mxu2 }
 0x2d0   : > { %v1516_v15 = vpop.f32.mrf.mxu1 }
 0x2d1   : > { %v1542_v33 = vpop.f32.mrf.mxu0  ;;  %v1517_v59 = vadd.f32 %v1516_v15, %v3265_v55 }
 0x2d2   : > { %v1543_v44 = vadd.f32 %v1542_v33, %v3259_v58 }
 0x2d3   : > { %v1531_v22 = vadd.f32 %v1530_v27, %v1517_v59 }
 0x2d4   : > { %v1557_v8 = vadd.f32 %v1556_v6, %v1543_v44 }
 0x2d5   : > { %vm1579_vm2 = vcmp.ge.f32.partialorder %v1531_v22, 0.0  ;;  %v1601_v0 = vmul.f32 %v3263_v53, %v1531_v22 }
 0x2d6   : > { %v1592_v20 = vmul.f32 %v3263_v53, %v1557_v8  ;;  %vm1570_vm3 = vcmp.ge.f32.partialorder %v1557_v8, 0.0 }
 0x2d7   : > { %v1621_v56 = vsel %vm1579_vm2, %v1531_v22, %v1601_v0 }
 0x2d8   : > { %v1632_v63 = vpack.c.bf16 %v1621_v56, %v1611_v16  ;;  %v1612_v19 = vsel %vm1570_vm3, %v1557_v8, %v1592_v20 }
 0x2d9   : > { %v1544_v11 = vpop.f32.mrf.mxu0 }
 0x2da   : > { %v1545_v18 = vadd.f32 %v1544_v11, %v3265_v55  ;;  %1754 = vmatpush.bf16.msrb.mxu0 %v1632_v63 }
 0x2dc   : > { %v1559_v43 = vadd.f32 %v1558_v23, %v1545_v18 }
 0x2dd   : > { %2331 = vmatmul.msk.bf16.vlgmr.msrb.gmra.mxu0 %vm1277_vm14, %v3276_v51 }
 0x2de   : > { %vm1580_vm4 = vcmp.ge.f32.partialorder %v1559_v43, 0.0  ;;  %v1602_v58 = vmul.f32 %v3263_v53, %v1559_v43 }
 0x2e0   : > { %v1622_v5 = vsel %vm1580_vm4, %v1559_v43, %v1602_v58 }
 0x2e1   : > { %v1633_v26 = vpack.c.bf16 %v1622_v5, %v1612_v19 }
 0x2e3   : > { %1767 = vmatpush.bf16.msra.mxu1 %v1633_v26  ;;  %v1777_v26 = vunpack.c.l.bf16 %v2764_v57  ;;  %v1780_v57 = vunpack.c.l.bf16 %v2807_v32 }
 0x2e6   : > { %2332 = vmatmul.msk.bf16.vlgmr.msra.gmra.mxu1 %vm1277_vm14, %v3276_v51 }
 0x2f9   : > { %v1665_v28 = vpop.f32.mrf.mxu1 }
 0x2fa   : > { %v1666_v31 = vadd.f32 %v1665_v28, %v3334_v62 }
 0x2fc   : > { %v1784_v47 = vadd.f32 %v1774_v61, %v1666_v31 }
 0x2fe   : > { %v1806_v46 = vmul.f32 %v3337_v38, %v1784_v47  ;;  %vm1794_vm7 = vcmp.ge.f32.partialorder %v1784_v47, 0.0 }
 0x2ff   : > { %v1652_v55 = vpop.f32.mrf.mxu3 }
 0x300   : > { %v1653_v53 = vadd.f32 %v1652_v55, %v3334_v62  ;;  %v1816_v30 = vsel %vm1794_vm7, %v1784_v47, %v1806_v46 }
 0x301   : > { %v1667_v1 = vpop.f32.mrf.mxu1  ;;  %v1839_v4 = vrot.slane %v1816_v30, 4 }
 0x302   : > { %v1783_v9 = vadd.f32 %v1773_v36, %v1653_v53  ;;  %v1779_v1 = vunpack.c.l.bf16 %v2797_v25 }
 0x304   : > { %v1805_v40 = vmul.f32 %v3337_v38, %v1783_v9  ;;  %vm1793_vm5 = vcmp.ge.f32.partialorder %v1783_v9, 0.0 }
 0x306   : > { %v1815_v41 = vsel %vm1793_vm5, %v1783_v9, %v1805_v40 }
 0x307   : > { %v1654_v35 = vpop.f32.mrf.mxu3  ;;  %v1827_v34 = vrot.slane %v1815_v41, 4 }
 0x308   : > { %v1778_v35 = vunpack.c.l.bf16 %v2770_v3 }
 0x31e   : > { %v1678_v51 = vpop.f32.mrf.mxu2 }
 0x31f   : > { %v1679_v29 = vadd.f32 %v1678_v51, %v3334_v62 }
 0x321   : > { %v1785_v52 = vadd.f32 %v1775_v21, %v1679_v29 }
 0x323   : > { %vm1795_vm14 = vcmp.ge.f32.partialorder %v1785_v52, 0.0  ;;  %v1807_v2 = vmul.f32 %v3337_v38, %v1785_v52 }
 0x325   : > { %v1817_v50 = vsel %vm1795_vm14, %v1785_v52, %v1807_v2 }
 0x326   : > { %v1825_v12 = vrot.slane %v1817_v50, 4  ;;  %v1828_v54 = vsel %vm355_vm0, %v1817_v50, %v1827_v34  ;;  %v1680_v45 = vpop.f32.mrf.mxu2 }
 0x327   : > { %v1836_v60 = vperm.slane %v1828_v54, %v2732_v14 }
 0x328   : > { %v1826_v17 = vsel %vm355_vm0, %v1825_v12, %v1815_v41 }
 0x329   : > { %v1832_v27 = vperm.slane %v1826_v17, %v2732_v14  ;;  %v1887_v22 = vrot.slane %v1836_v60, 4 }
 0x32b   : > { %v1691_v49 = vpop.f32.mrf.mxu3  ;;  %v1875_v8 = vrot.slane %v1832_v27, 4 }
 0x32c   : > { %v1692_v48 = vadd.f32 %v1691_v49, %v3334_v62 }
 0x32e   : > { %v1786_v10 = vadd.f32 %v1776_v7, %v1692_v48 }
 0x330   : > { %vm1796_vm9 = vcmp.ge.f32.partialorder %v1786_v10, 0.0  ;;  %v1808_v6 = vmul.f32 %v3337_v38, %v1786_v10 }
 0x332   : > { %v1704_v15 = vpop.f32.mrf.mxu0  ;;  %v1818_v33 = vsel %vm1796_vm9, %v1786_v10, %v1808_v6 }
 0x333   : > { %v1837_v59 = vrot.slane %v1818_v33, 4  ;;  %v1840_v13 = vsel %vm355_vm0, %v1818_v33, %v1839_v4  ;;  %v1693_v44 = vpop.f32.mrf.mxu3  ;;  %v1717_v24 = vpop.f32.mrf.mxu1  ;;  %v1705_v5 = vadd.f32 %v1704_v15, %v3334_v62 }
 0x334   : > { %v1848_v0 = vperm.slane %v1840_v13, %v2732_v14  ;;  %v1718_v55 = vadd.f32 %v1717_v24, %v3334_v62  ;;  %v1781_v13 = vunpack.c.l.bf16 %v2815_v39 }
 0x335   : > { %v1838_v16 = vsel %vm355_vm0, %v1837_v59, %v1816_v30  ;;  %v1787_v28 = vadd.f32 %v1777_v26, %v1705_v5 }
 0x336   : > { %v1844_v56 = vperm.slane %v1838_v16, %v2732_v14  ;;  %v1885_v63 = vrot.slane %v1848_v0, 4  ;;  %v3358_v11 = vsel %vm355_vm0, %v1848_v0, %v1887_v22  ;;  %v1788_v36 = vadd.f32 %v1778_v35, %v1718_v55 }
 0x337   : > { %v1809_v53 = vmul.f32 %v3337_v38, %v1787_v28  ;;  %vm1797_vm10 = vcmp.ge.f32.partialorder %v1787_v28, 0.0 }
 0x338   : > { %v1873_v18 = vrot.slane %v1844_v56, 4  ;;  %v1886_v20 = vsel %vm355_vm0, %v1885_v63, %v1836_v60  ;;  %v1876_v43 = vsel %vm355_vm0, %v1844_v56, %v1875_v8  ;;  %v1810_v9 = vmul.f32 %v3337_v38, %v1788_v36 }
 0x339   : > { %vm1798_vm11 = vcmp.ge.f32.partialorder %v1788_v36, 0.0  ;;  %v1819_v21 = vsel %vm1797_vm10, %v1787_v28, %v1809_v53  ;;  %v1892_v4 = vperm.slane %v1886_v20, %v2748_v37  ;;  %v1884_v6 = vperm.slane %v1876_v43, %v2748_v37 }
 0x33a   : > { %v1706_v23 = vpop.f32.mrf.mxu0  ;;  %v1874_v58 = vsel %vm355_vm0, %v1873_v18, %v1832_v27  ;;  %v1820_v41 = vsel %vm1798_vm11, %v1788_v36, %v1810_v9  ;;  %v1851_v31 = vrot.slane %v1819_v21, 4  ;;  %v1782_v28 = vunpack.c.l.bf16 %v2819_v42 }
 0x33b   : > { %v1719_v19 = vpop.f32.mrf.mxu1  ;;  %v1863_v2 = vrot.slane %v1820_v41, 4  ;;  %v1880_v59 = vperm.slane %v1874_v58, %v2748_v37  ;;  %v1931_v0 = vrot.slane %v1892_v4, 4  ;;  %v1927_v23 = vrot.slane %v1884_v6, 4 }
 0x33d   : > { %v1923_v43 = vrot.slane %v1880_v59, 4 }
 0x34c   : > { %v1730_v40 = vpop.f32.mrf.mxu2 }
 0x34d   : > { %v1731_v51 = vadd.f32 %v1730_v40, %v3334_v62 }
 0x34f   : > { %v1743_v29 = vpop.f32.mrf.mxu3  ;;  %v1789_v61 = vadd.f32 %v1779_v1, %v1731_v51  ;;  %v1896_v51 = vperm.slane %v3358_v11, %v2748_v37 }
 0x350   : > { %v1744_v3 = vadd.f32 %v1743_v29, %v3334_v62 }
 0x351   : > { %vm1799_vm12 = vcmp.ge.f32.partialorder %v1789_v61, 0.0  ;;  %v1811_v52 = vmul.f32 %v3337_v38, %v1789_v61 }
 0x352   : > { %v1790_v34 = vadd.f32 %v1780_v57, %v1744_v3 }
 0x353   : > { %v1821_v47 = vsel %vm1799_vm12, %v1789_v61, %v1811_v52 }
 0x354   : > { %vm1800_vm1 = vcmp.ge.f32.partialorder %v1790_v34, 0.0  ;;  %v1812_v25 = vmul.f32 %v3337_v38, %v1790_v34  ;;  %v1849_v50 = vrot.slane %v1821_v47, 4  ;;  %v1852_v12 = vsel %vm355_vm0, %v1821_v47, %v1851_v31  ;;  %v1732_v54 = vpop.f32.mrf.mxu2 }
 0x355   : > { %v1860_v32 = vperm.slane %v1852_v12, %v2732_v14 }
 0x356   : > { %v1822_v45 = vsel %vm1800_vm1, %v1790_v34, %v1812_v25  ;;  %v1850_v17 = vsel %vm355_vm0, %v1849_v50, %v1819_v21 }
 0x357   : > { %v1861_v46 = vrot.slane %v1822_v45, 4  ;;  %v1864_v7 = vsel %vm355_vm0, %v1822_v45, %v1863_v2  ;;  %v1745_v49 = vpop.f32.mrf.mxu3  ;;  %v1856_v48 = vperm.slane %v1850_v17, %v2732_v14  ;;  %v1911_v30 = vrot.slane %v1860_v32, 4 }
 0x358   : > { %v1872_v10 = vperm.slane %v1864_v7, %v2732_v14 }
 0x359   : > { %v1862_v60 = vsel %vm355_vm0, %v1861_v46, %v1820_v41  ;;  %v1899_v33 = vrot.slane %v1856_v48, 4 }
 0x35a   : > { %v1909_v27 = vrot.slane %v1872_v10, 4  ;;  %v1868_v15 = vperm.slane %v1862_v60, %v2732_v14  ;;  %v1912_v44 = vsel %vm355_vm0, %v1872_v10, %v1911_v30  ;;  %v1756_v24 = vpop.f32.mrf.mxu0 }
 0x35b   : > { %v1757_v56 = vadd.f32 %v1756_v24, %v3334_v62  ;;  %v3395_v39 = vperm.slane %v1912_v44, %v2748_v37 }
 0x35c   : > { %v1910_v22 = vsel %vm355_vm0, %v1909_v27, %v1860_v32  ;;  %v1900_v16 = vsel %vm355_vm0, %v1868_v15, %v1899_v33  ;;  %v1897_v8 = vrot.slane %v1868_v15, 4 }
 0x35d   : > { %v1916_v63 = vperm.slane %v1910_v22, %v2748_v37  ;;  %v1908_v18 = vperm.slane %v1900_v16, %v2748_v37  ;;  %v1791_v58 = vadd.f32 %v1781_v13, %v1757_v56  ;;  %v1933_v36 = vrot.slane %v3395_v39, 4 }
 0x35e   : > { %v1898_v20 = vsel %vm355_vm0, %v1897_v8, %v1856_v48  ;;  %v1935_v13 = vrot.slane %v1896_v51, 4 }
 0x35f   : > { %v1932_v19 = vsel %vm355_vm0, %v1916_v63, %v1931_v0  ;;  %v1928_v5 = vsel %vm355_vm0, %v1908_v18, %v1927_v23  ;;  %v1904_v26 = vperm.slane %v1898_v20, %v2748_v37  ;;  %v1813_v55 = vmul.f32 %v3337_v38, %v1791_v58 }
 0x360   : > { %2025 = vrot.lane.b32.xlu0 %v1932_v19, %s2584_s22  ;;  %2017 = vrot.lane.b32.xlu2 %v1928_v5, %s2584_s22  ;;  %vm1801_vm13 = vcmp.ge.f32.partialorder %v1791_v58, 0.0  ;;  %v1925_v53 = vrot.slane %v1908_v18, 4  ;;  %v1929_v57 = vrot.slane %v1916_v63, 4  ;;  %v1934_v41 = vsel %vm355_vm0, %v1933_v36, %v1896_v51 }
 0x361   : > { %v1924_v35 = vsel %vm355_vm0, %v1904_v26, %v1923_v43  ;;  %v1823_v40 = vsel %vm1801_vm13, %v1791_v58, %v1813_v55  ;;  %v1921_v52 = vrot.slane %v1904_v26, 4  ;;  %v1936_v24 = vsel %vm355_vm0, %v3395_v39, %v1935_v13 }
 0x362   : > { %2009 = vrot.lane.b32.xlu1 %v1924_v35, %s2584_s22  ;;  %v1758_v1 = vpop.f32.mrf.mxu0  ;;  %v1926_v61 = vsel %vm355_vm0, %v1925_v53, %v1884_v6  ;;  %v1942_v3 = vperm.slane %v1823_v40, %v2732_v14  ;;  %v1937_v31 = vrot.slane %v1823_v40, 4 }
 0x363   : > { %v1769_v9 = vpop.f32.mrf.mxu1  ;;  %v1922_v45 = vsel %vm355_vm0, %v1921_v52, %v1880_v59 }
 0x364   : > { %v1770_v21 = vadd.f32 %v1769_v9, %v3334_v62  ;;  %v1930_v62 = vsel %vm355_vm0, %v1929_v57, %v1892_v4  ;;  %v1959_v25 = vrot.slane %v1942_v3, 4  ;;  %v1938_v50 = vsel %vm355_vm0, 0.0, %v1937_v31 }
 0x365   : > { %v1946_v7 = vperm.slane %v1938_v50, %v2732_v14 }
 0x366   : > { %v1792_v29 = vadd.f32 %v1782_v28, %v1770_v21 }
 0x367   : > { %v1971_v33 = vrot.slane %v1946_v7, 4 }
 0x368   : > { %2029 = vrot.lane.b32.xlu2 %v1934_v41, %s2584_s22  ;;  %2013 = vrot.lane.b32.xlu0 %v1926_v61, %s2584_s22  ;;  %vm1802_vm6 = vcmp.ge.f32.partialorder %v1792_v29, 0.0  ;;  %v1814_v42 = vmul.f32 %v3337_v38, %v1792_v29 }
 0x36a   : > { %2021 = vrot.lane.b32.xlu1 %v1930_v62, %s2584_s22  ;;  %v1824_v11 = vsel %vm1802_vm6, %v1792_v29, %v1814_v42 }
 0x36b   : > { %v1947_v34 = vrot.slane %v1824_v11, 4  ;;  %v1952_v2 = vperm.slane %v1824_v11, %v2732_v14  ;;  %v1771_v47 = vpop.f32.mrf.mxu1 }
 0x36d   : > { %v1948_v12 = vsel %vm355_vm0, 0.0, %v1947_v34  ;;  %v1960_v54 = vsel %vm355_vm0, %v1952_v2, %v1959_v25  ;;  %v1957_v32 = vrot.slane %v1952_v2, 4 }
 0x36e   : > { %v1956_v38 = vperm.slane %v1948_v12, %v2732_v14  ;;  %v1968_v17 = vperm.slane %v1960_v54, %v2748_v37 }
 0x36f   : > { %v1958_v46 = vsel %vm355_vm0, %v1957_v32, %v1942_v3 }
 0x370   : > { %2005 = vrot.lane.b32.xlu2 %v1922_v45, %s2584_s22  ;;  %v1964_v49 = vperm.slane %v1958_v46, %v2748_v37  ;;  %v1969_v48 = vrot.slane %v1956_v38, 4  ;;  %v1983_v6 = vrot.slane %v1968_v17, 4  ;;  %v1972_v59 = vsel %vm355_vm0, %v1956_v38, %v1971_v33 }
 0x371   : > { %v1980_v44 = vperm.slane %v1972_v59, %v2748_v37 }
 0x372   : > { %2015 = vrot.lane.b32.xlu1 %v1968_v17, %s2584_s22  ;;  %2007 = vrot.lane.b32.xlu0 %v1964_v49, %s2584_s22  ;;  %v1981_v30 = vrot.slane %v1964_v49, 4  ;;  %v1970_v10 = vsel %vm355_vm0, %v1969_v48, %v1946_v7  ;;  %v1984_v15 = vsel %vm355_vm0, 0.0, %v1983_v6 }
 0x373   : > { %v1976_v4 = vperm.slane %v1970_v10, %v2748_v37  ;;  %v1987_v22 = vrot.slane %v1980_v44, 4 }
 0x374   : > { %v1982_v27 = vsel %vm355_vm0, 0.0, %v1981_v30 }
 0x375   : > { %v1985_v60 = vrot.slane %v1976_v4, 4  ;;  %v1988_v0 = vsel %vm355_vm0, 0.0, %v1987_v22 }
 0x377   : > { %v1986_v14 = vsel %vm355_vm0, 0.0, %v1985_v60  ;;  %vm2055_vm0 = vcmask 122880  }
 0x378   : > { %2011 = vrot.lane.b32.xlu2 %v1982_v27, %s2584_s22 }
 0x37a   : > { %2027 = vrot.lane.b32.xlu1 %v1986_v14, %s2584_s22  ;;  %2019 = vrot.lane.b32.xlu0 %v1984_v15, %s2584_s22 }
 0x380   : > { %2023 = vrot.lane.b32.xlu2 %v1976_v4, %s2584_s22 }
 0x382   : > { %2033 = vrot.lane.b32.xlu1 %v1936_v24, %s2584_s22  ;;  %2031 = vrot.lane.b32.xlu0 %v1980_v44, %s2584_s22 }
 0x388   : > { %2035 = vrot.lane.b32.xlu2 %v1988_v0, %s2584_s22  ;;  %s2335_s22 = sshll.u32 %s2564_s9, 4 }
 0x389   : > { %s2082_s25 = sadd.s32 %s2560_s30, %s2335_s22  ;;  %s2072_s30 = scalar_lea.sflag [#allocation4], %s324_s13 }
 0x38a   : > { %s2336_s14 = sshll.u32 %s2082_s25, 3 }
 0x38b   : > { %s2084_s7 = scalar_lea.hbm %s3539_s8, %s2336_s14  ;;  %s2498_s14 = scalar_lea.hbm %s3539_s8, 256 }
 0x38c   : > { %s2087_s16 = sshll.u32 %s2084_s7, 4  ;;  %s2088_s16 = int_to_ptr.hbm [resolvable:$true] %s2087_s16 }
 0x38d   : > { %s2492_s9 = sshra.s32 %s2088_s16, 4  ;;  %s2493_s9 = int_to_ptr.hbm [resolvable:$true] %s2492_s9 }
 0x38e   : > { %s2494_s23 = scalar_lea.hbm %s2493_s9, 64  ;;  %p2499_p6 = scmp.lt.s32.totalorder %s2493_s9, %s3539_s8 }
 0x38f   : > { %p2495_p2 = scmp.ne.s32.totalorder %s2493_s9, %s2494_s23  ;;  %p2500_p7 = scmp.lt.s32.totalorder %s2498_s14, %s2494_s23 }
 0x391   : > { %p2496_p4 = pnand %p2495_p2, %p2686_p3  ;;  %p2501_p9 = por %p2500_p7, %p2499_p6 }
 0x393   : > { %p2497_p5 = pneg %p2496_p4 }
 0x395   : > { %p2502_p10 = pnand %p2501_p9, %p2497_p5 }
 0x3ba   : > { %v2018_v16 = vpop.permute.xlu2 %2017 }
 0x3bb   : > { %2061 = vst.msk [vmem:[%s3451_s24 + $0x17] sm:$0xfe] %vm2053_vm8, %v2018_v16 }
 0x3c2   : > { %v2030_v37 = vpop.permute.xlu2 %2029 }
 0x3c3   : > { %2067 = vst.msk [vmem:[%s3451_s24 + $0x2f] sm:$0xfe] %vm2053_vm8, %v2030_v37 }
 0x3ca   : > { %v2006_v8 = vpop.permute.xlu2 %2005 }
 0x3cb   : > { %2054 = vst.msk [vmem:[%s3451_s24 - $0x1] sm:$0xfe] %vm2053_vm8, %v2006_v8 }
 0x3d2   : > { %v2026_v56 = vpop.permute.xlu0 %2025  ;;  %v2012_v63 = vpop.permute.xlu2 %2011 }
 0x3d3   : > { %2065 = vst.msk [vmem:[%s3451_s24 + $0x27] sm:$0xfe] %vm2053_vm8, %v2026_v56 }
 0x3d4   : > { %2058 = vst.msk [vmem:[%s3451_s24 + $0xf] sm:$0x1] %vm2055_vm0, %v2012_v63  ;;  %v2010_v18 = vpop.permute.xlu1 %2009 }
 0x3d5   : > { %2057 = vst.msk [vmem:[%s3451_s24 + $0x7] sm:$0xfe] %vm2053_vm8, %v2010_v18 }
 0x3da   : > { %v2014_v23 = vpop.permute.xlu0 %2013  ;;  %v2024_v20 = vpop.permute.xlu2 %2023 }
 0x3db   : > { %2059 = vst.msk [vmem:[%s3451_s24 + $0xf] sm:$0xfe] %vm2053_vm8, %v2014_v23 }
 0x3dc   : > { %2064 = vst.msk [vmem:[%s3451_s24 + $0x27] sm:$0x1] %vm2055_vm0, %v2024_v20  ;;  %v2022_v43 = vpop.permute.xlu1 %2021 }
 0x3dd   : > { %2063 = vst.msk [vmem:[%s3451_s24 + $0x1f] sm:$0xfe] %vm2053_vm8, %v2022_v43 }
 0x3e2   : > { %v2036_v39 = vpop.permute.xlu2 %2035 }
 0x3e3   : > { %2070 = vst.msk [vmem:[%s3451_s24 + $0x3f] sm:$0x1] %vm2055_vm0, %v2036_v39 }
 0x3e4   : > { %v2016_v58 = vpop.permute.xlu1 %2015  ;;  %v2008_v19 = vpop.permute.xlu0 %2007 }
 0x3e5   : > { %2060 = vst.msk [vmem:[%s3451_s24 + $0x17] sm:$0x1] %vm2055_vm0, %v2016_v58 }
 0x3e6   : > { %2056 = vst.msk [vmem:[%s3451_s24 + $0x7] sm:$0x1] %vm2055_vm0, %v2008_v19 }
 0x3ec   : > { %v2028_v5 = vpop.permute.xlu1 %2027  ;;  %v2020_v26 = vpop.permute.xlu0 %2019 }
 0x3ed   : > { %2066 = vst.msk [vmem:[%s3451_s24 + $0x2f] sm:$0x1] %vm2055_vm0, %v2028_v5 }
 0x3ee   : > { %2062 = vst.msk [vmem:[%s3451_s24 + $0x1f] sm:$0x1] %vm2055_vm0, %v2020_v26 }
 0x3f4   : > { %v2034_v55 = vpop.permute.xlu1 %2033  ;;  %v2032_v35 = vpop.permute.xlu0 %2031 }
 0x3f5   : > { %2069 = vst.msk [vmem:[%s3451_s24 + $0x37] sm:$0xfe] %vm2053_vm8, %v2034_v55 }
 0x3f6   : > { %2068 = vst.msk [vmem:[%s3451_s24 + $0x37] sm:$0x1] %vm2055_vm0, %v2032_v35 }
 0x3f7   : > { %2505 = shalt.err (!%p2502_p10)
}
 0x3f8   : > { %s2586_s13 = smov 128   ;;  %s2587_s24 = smov 256  }
 0x3f9   : > { %s2588_s7 = smov 8  }
 0x3fa   : > { %2372 = dma.vmem_to_hbm [thread:$0]  (%p2686_p3), %s2086_s18, 1024, %s2088_s16, %s2072_s30, %s2586_s13, %s2587_s24, %s2588_s7  }
 0x3fb PF: > { %p2384_p11 = scmp.ge.s32.totalorder %s2576_s12, 2  ;;  %s2102_s22 = sand.u32 1, %s2548_s27  }
 0x3fc   : > { %s2103_s9 = scalar_lea.sflag [#allocation4], %s2102_s22 }
 0x3fd   : > { %p2379_p12 = pnand %p2384_p11, %p2695_p8 }
 0x3ff   : > { %p2380_p13 = pneg %p2379_p12 }
 0x401   : > { %2543 = dma.done.wait (%p2380_p13), %s2103_s9, 1024  }
 0x402   : > { %2545 = vsyncadd (%p2380_p13), %s2103_s9, 4294966272  ;;  %s22_s12 = sadd.s32 1, %s2576_s12   ;;  %s3546_s19 = sld [smem:[#allocation9_spill]] }
 0x403   : > { %p19_p0 = scmp.ge.s32.totalorder %s22_s12, 6   ;;  %s3547_s27 = smov %s2552_s28 }
 0x404   : > { %s3548_s28 = smov %s2556_s29  ;;  %s3549_s29 = smov %s2706_s26 }
 0x405   : > { %s3550_s30 = smov %s2568_s10  ;;  %s3551_s9 = smov %s2572_s11 }
 0x406   : > { %s3552_s10 = smov %s3555_s15  ;;  %21 = sbr.rel (!%p19_p0) target bundleno = 8 (0x8), region = 93 }
 0x408   : > { %s3553_s11 = smov %s3546_s19 }
 0x40b   :  { %2109 = vsyncpa [#allocation4], 1 }
 0x40c   :  { %2111 = vsyncpa [#allocation4 + $0x1], 1 }
 0x40d   :  { %2112 = vsyncpa [#allocation5], 1 }
 0x40e   :  { %2114 = vsyncpa [#allocation5 + $0x1], 1 }

</bundles_post_ra>
